<compile_context>
chip_gen: v6e
topology: v6e:2x2x1
jax: 0.10.0
libtpu: 0.0.40
codegen_flags: <defaults>
</compile_context>

<pallas_src>
import functools
import math

import jax
import jax.numpy as jnp
from jax.experimental import pallas as pl
from jax.experimental.pallas import tpu as pltpu

# Hyper-parameters consistent with the module's __init__
NUM_FILTERS = 4            # num_filters (input channels)
NUM_CLASS = 3              # num_class
NUM_ANCHOR_PER_LOC = 2     # num_anchor_per_loc
NUM_DIR_BINS = 2           # num_direction_bins
BOX_CODE_SIZE = 7 + 2 + 9  # module-level _box_code_size = 18
HIDDEN = 32                # final_num_filters inside self.net
BN_EPS = 1e-3
# use_direction_classifier=True, encode_background_as_zeros=True
HEAD_WIDTHS = (NUM_ANCHOR_PER_LOC * BOX_CODE_SIZE,   # 36
               NUM_ANCHOR_PER_LOC * NUM_CLASS,       # 6
               NUM_ANCHOR_PER_LOC * NUM_DIR_BINS)    # 4
HEAD_TOTAL = sum(HEAD_WIDTHS)                        # 46
HEAD_PAD = 128                                       # lane-dense output width


def _round_up(v, m):
    return (v + m - 1) // m * m


def _tap_offsets(wp):
    """Flat-row offsets of the 9 taps (tap index t = ky*3+kx) in padded-flat layout."""
    return tuple((ky - 1) * wp + (kx - 1) for ky in range(3) for kx in range(3))


# ------------------------------ in-kernel helpers ----------------------------

def _stage_x(xprev_ref, xcur_ref, xnext_ref, xbuf_ref, *, tm, halo):
    """Stitch the halo'd row window [i*tm - halo, i*tm + tm + halo) into VMEM."""
    xbuf_ref[pl.ds(0, halo), :] = xprev_ref[pl.ds(tm - halo, halo), :]
    xbuf_ref[pl.ds(halo, tm), :] = xcur_ref[...]
    xbuf_ref[pl.ds(halo + tm, halo), :] = xnext_ref[pl.ds(0, halo), :]


def _conv3x3(src_ref, w_ref, *, base, rows, offs):
    """3x3 conv as 9 accumulated small-K dots over row-offset slices (no im2col slab)."""
    acc = None
    for t, off in enumerate(offs):
        d = jnp.dot(src_ref[pl.ds(base + off, rows), :], w_ref[t],
                    preferred_element_type=jnp.float32)
        acc = d if acc is None else acc + d
    return acc


def _valid_mask(row0, rows, *, hp, wp, h, w, mp):
    """(rows, 1) bool: True at interior (non-padding) rows of the padded-flat layout.

    Row-index math is done in f32 with a +0.5 guard before floor — exact for
    mp < 2^23 and avoids integer div/mod on the VPU.
    """
    g = row0 + jax.lax.broadcasted_iota(jnp.int32, (rows, 1), 0)
    inb = (g >= 0) & (g < mp)
    gf = jnp.maximum(g, 0).astype(jnp.float32)
    hw = float(hp * wp)
    img = jnp.floor((gf + 0.5) * (1.0 / hw))
    q = gf - img * hw                       # row index within the padded image
    ry = jnp.floor((q + 0.5) * (1.0 / float(wp)))
    rx = q - ry * float(wp)
    return (inb & (ry >= 1.0) & (ry <= float(h)) & (rx >= 1.0) & (rx <= float(w)))


def _masked_moments(y, mask):
    ym = jnp.where(mask, y, 0.0)
    return jnp.concatenate([jnp.sum(ym, axis=0, keepdims=True),
                            jnp.sum(ym * ym, axis=0, keepdims=True)], axis=0)


# --------------------------------- kernels -----------------------------------

def _stats1_kernel(xp_ref, xc_ref, xn_ref, w1_ref, stat_ref, xbuf_ref,
                   *, tm, halo, offs, geom):
    """Pass 1: conv1 over the tile's tm rows; accumulate masked sum/sumsq of y1."""
    i = pl.program_id(0)

    @pl.when(i == 0)
    def _init():
        stat_ref[...] = jnp.zeros(stat_ref.shape, stat_ref.dtype)

    _stage_x(xp_ref, xc_ref, xn_ref, xbuf_ref, tm=tm, halo=halo)
    y1 = _conv3x3(xbuf_ref, w1_ref, base=halo, rows=tm, offs=offs)
    mask = _valid_mask(i * tm, tm, **geom)
    stat_ref[...] += _masked_moments(y1, mask)


def _stats2_kernel(xp_ref, xc_ref, xn_ref, w1_ref, sc1_ref, sh1_ref, w2_ref,
                   stat_ref, xbuf_ref, h1_ref, *, tm, halo, halo_in, offs, geom):
    """Pass 2: conv1 -> BN1(affine)+ReLU (masked) -> conv2; accumulate y2 stats."""
    i = pl.program_id(0)
    e1 = tm + 2 * halo_in

    @pl.when(i == 0)
    def _init():
        stat_ref[...] = jnp.zeros(stat_ref.shape, stat_ref.dtype)

    _stage_x(xp_ref, xc_ref, xn_ref, xbuf_ref, tm=tm, halo=halo)
    # conv1 over the (wp+1)-extended range that conv2's taps will reach into.
    y1 = _conv3x3(xbuf_ref, w1_ref, base=halo_in, rows=e1, offs=offs)
    m_ext = _valid_mask(i * tm - halo_in, e1, **geom)
    # padding rows are zeroed: they ARE conv2's zero padding.
    h1_ref[...] = jnp.where(m_ext,
                            jnp.maximum(y1 * sc1_ref[...] + sh1_ref[...], 0.0), 0.0)
    y2 = _conv3x3(h1_ref, w2_ref, base=halo_in, rows=tm, offs=offs)
    stat_ref[...] += _masked_moments(y2, m_ext[halo_in:halo_in + tm])


def _final_kernel(xp_ref, xc_ref, xn_ref, w1_ref, sc1_ref, sh1_ref, w2_ref,
                  sc2_ref, sh2_ref, wh_ref, bh_ref, out_ref, xbuf_ref, h1_ref,
                  *, tm, halo, halo_in, offs, geom):
    """Pass 3: recompute conv1/conv2, BN2+ReLU, fused box|cls|dir head (lane-dense)."""
    i = pl.program_id(0)
    e1 = tm + 2 * halo_in

    _stage_x(xp_ref, xc_ref, xn_ref, xbuf_ref, tm=tm, halo=halo)
    y1 = _conv3x3(xbuf_ref, w1_ref, base=halo_in, rows=e1, offs=offs)
    m_ext = _valid_mask(i * tm - halo_in, e1, **geom)
    h1_ref[...] = jnp.where(m_ext,
                            jnp.maximum(y1 * sc1_ref[...] + sh1_ref[...], 0.0), 0.0)
    y2 = _conv3x3(h1_ref, w2_ref, base=halo_in, rows=tm, offs=offs)
    # padding-row outputs are dropped by the wrapper, so h2 needs no mask.
    h2 = jnp.maximum(y2 * sc2_ref[...] + sh2_ref[...], 0.0)
    out_ref[...] = (jnp.dot(h2, wh_ref[...], preferred_element_type=jnp.float32)
                    + bh_ref[...])


# ------------------------------ forward wrapper ------------------------------

def tiny_object_head_forward(x_nchw, p, *, tm=256):
    """Forward pass of TinyObjectHead (train-mode BN, matching the PyTorch module).

    tm = rows per grid tile (multiple of 8; 256 feeds the v6e/v7x 256x256 MXU,
    use 128 on v5e).  Per-tile VMEM is roughly tm * 6 KB, so budget tm against
    64 MiB/TC on v7x (tm ~ 4-8K) and 128 MiB on v5e/v6e.
    """
    n, cin, h, w = x_nchw.shape
    hp, wp = h + 2, w + 2
    mp = n * hp * wp                       # padded-flat rows
    m_valid = n * h * w                    # rows entering the BN statistics
    halo_in = _round_up(wp + 1, 8)         # reach of one 3x3 conv past a tile edge
    halo = 2 * halo_in                     # two conv levels are recomputed per tile
    assert tm % 8 == 0 and halo <= tm, (tm, halo)
    assert mp + halo < 2 ** 23, "f32 in-kernel row-index math needs mp < 2^23"
    mp_pad = _round_up(mp, tm)
    ntiles = mp_pad // tm
    e1 = tm + 2 * halo_in
    offs = _tap_offsets(wp)
    geom = dict(hp=hp, wp=wp, h=h, w=w, mp=mp)

    # ---- layout glue (plain JAX): NCHW -> zero-padded flat NHWC rows ----
    x = jnp.transpose(x_nchw, (0, 2, 3, 1)).astype(jnp.float32)          # NHWC
    xflat = jnp.pad(x, ((0, 0), (1, 1), (1, 1), (0, 0))).reshape(mp, cin)
    # One full tile of zero rows at each end so the i-1 / i+1 shifted block reads
    # of the first/last tile stay in bounds; tail rows [mp, mp_pad) are zero+masked.
    x_ext = jnp.zeros(((ntiles + 2) * tm, cin), jnp.float32).at[tm:tm + mp].set(xflat)

    w1 = p["w1"]                                     # (9, cin, 32), tap-major
    w2 = p["w2"]                                     # (9, 32, 32)
    wh = jnp.pad(jnp.concatenate([p["wb"], p["wc"], p["wd"]], axis=1),
                 ((0, 0), (0, HEAD_PAD - HEAD_TOTAL)))
    bh = jnp.pad(jnp.concatenate([p["bb"], p["bc"], p["bd"]], axis=1),
                 ((0, 0), (0, HEAD_PAD - HEAD_TOTAL)))

    # prev / cur / next tm-row block views of x_ext (halo source, auto-pipelined)
    x_specs = [pl.BlockSpec((tm, cin), lambda i, s=s: (i + s, 0)) for s in range(3)]
    full = lambda a: pl.BlockSpec(a.shape, lambda i, nd=a.ndim: (0,) * nd)
    stat_spec = pl.BlockSpec((2, HIDDEN), lambda i: (0, 0))      # grid-resident acc
    cparams = lambda sem: pltpu.CompilerParams(
        dimension_semantics=(sem,), vmem_limit_bytes=64 * 1024 * 1024)

    conv_flops_row = 2 * (9 * cin * HIDDEN + 9 * HIDDEN * HIDDEN)
    head_flops_row = 2 * HIDDEN * HEAD_PAD
    x_bytes = 3 * mp_pad * cin * 4

    # ---- pass 1: conv1 + masked sum/sumsq of y1 (accumulated across the grid) ----
    stats1 = pl.pallas_call(
        functools.partial(_stats1_kernel, tm=tm, halo=halo, offs=offs, geom=geom),
        out_shape=jax.ShapeDtypeStruct((2, HIDDEN), jnp.float32),
        grid_spec=pltpu.PrefetchScalarGridSpec(
            num_scalar_prefetch=0, grid=(ntiles,),
            in_specs=[*x_specs, full(w1)],
            out_specs=stat_spec,
            scratch_shapes=[pltpu.VMEM((tm + 2 * halo, cin), jnp.float32)]),
        compiler_params=cparams("arbitrary"),
        cost_estimate=pl.CostEstimate(flops=mp_pad * 2 * 9 * cin * HIDDEN,
                                      transcendentals=0, bytes_accessed=x_bytes),
    )(x_ext, x_ext, x_ext, w1)

    def _affine(stats, gamma, beta):
        mean = stats[0:1] / m_valid
        # note: one-pass variance (E[x^2]-mean^2) can cancel if |mean| >> std;
        # a true two-pass variance would need one extra grid pass per BN.
        var = jnp.maximum(stats[1:2] / m_valid - mean * mean, 0.0)
        scale = gamma * jax.lax.rsqrt(var + BN_EPS)
        return scale, beta - mean * scale

    sc1, sh1 = _affine(stats1, p["g1"], p["b1"])

    # ---- pass 2: conv1 -> BN1+ReLU -> conv2, masked sum/sumsq of y2 ----
    stats2 = pl.pallas_call(
        functools.partial(_stats2_kernel, tm=tm, halo=halo, halo_in=halo_in,
                          offs=offs, geom=geom),
        out_shape=jax.ShapeDtypeStruct((2, HIDDEN), jnp.float32),
        grid_spec=pltpu.PrefetchScalarGridSpec(
            num_scalar_prefetch=0, grid=(ntiles,),
            in_specs=[*x_specs, full(w1), full(sc1), full(sh1), full(w2)],
            out_specs=stat_spec,
            scratch_shapes=[pltpu.VMEM((tm + 2 * halo, cin), jnp.float32),
                            pltpu.VMEM((e1, HIDDEN), jnp.float32)]),
        compiler_params=cparams("arbitrary"),
        cost_estimate=pl.CostEstimate(flops=mp_pad * conv_flops_row,
                                      transcendentals=0, bytes_accessed=x_bytes),
    )(x_ext, x_ext, x_ext, w1, sc1, sh1, w2)

    sc2, sh2 = _affine(stats2, p["g2"], p["b2"])

    # ---- pass 3: recompute convs, BN2+ReLU, fused heads -> lane-dense output ----
    out2d = pl.pallas_call(
        functools.partial(_final_kernel, tm=tm, halo=halo, halo_in=halo_in,
                          offs=offs, geom=geom),
        out_shape=jax.ShapeDtypeStruct((mp_pad, HEAD_PAD), jnp.float32),
        grid_spec=pltpu.PrefetchScalarGridSpec(
            num_scalar_prefetch=0, grid=(ntiles,),
            in_specs=[*x_specs, full(w1), full(sc1), full(sh1), full(w2),
                      full(sc2), full(sh2), full(wh), full(bh)],
            out_specs=pl.BlockSpec((tm, HEAD_PAD), lambda i: (i, 0)),
            scratch_shapes=[pltpu.VMEM((tm + 2 * halo, cin), jnp.float32),
                            pltpu.VMEM((e1, HIDDEN), jnp.float32)]),
        compiler_params=cparams("parallel"),
        cost_estimate=pl.CostEstimate(
            flops=mp_pad * (conv_flops_row + head_flops_row), transcendentals=0,
            bytes_accessed=x_bytes + mp_pad * HEAD_PAD * 4),
    )(x_ext, x_ext, x_ext, w1, sc1, sh1, w2, sc2, sh2, wh, bh)

    # ---- drop padding rows, split fused heads, PyTorch view/permute glue ----
    out4 = out2d[:mp].reshape(n, hp, wp, HEAD_PAD)[:, 1:h + 1, 1:w + 1, :]
    a = NUM_ANCHOR_PER_LOC
    c0, c1, c2 = HEAD_WIDTHS
    box4 = out4[..., :c0]
    cls4 = out4[..., c0:c0 + c1]
    dir4 = out4[..., c0 + c1:c0 + c1 + c2]

    def to_anchor_major(y4, d):
        # channel index (anchor*d + k) --> matches PyTorch's
        # view(-1, A, d, H, W).permute(0, 1, 3, 4, 2).contiguous().view(N, -1, d)
        return (y4.reshape(n, h, w, a, d)
                  .transpose(0, 3, 1, 2, 4)
                  .reshape(n, a * h * w, d))

    return {
        "box_preds": to_anchor_major(box4, BOX_CODE_SIZE),
        "cls_preds": to_anchor_major(cls4, NUM_CLASS),
        "dir_cls_preds": to_anchor_major(dir4, NUM_DIR_BINS),
    }


# ------------------------------ pure-JAX reference ---------------------------

def reference_forward(x_nchw, p):
    x = jnp.transpose(x_nchw, (0, 2, 3, 1))

    def conv_bn_relu(inp, w9, g, b):
        wh = w9.reshape(3, 3, w9.shape[1], w9.shape[2])  # HWIO
        y = jax.lax.conv_general_dilated(
            inp, wh, window_strides=(1, 1), padding="SAME",
            dimension_numbers=("NHWC", "HWIO", "NHWC"),
            precision=jax.lax.Precision.HIGHEST)
        mean = y.mean(axis=(0, 1, 2))
        var = ((y - mean) ** 2).mean(axis=(0, 1, 2))
        y = (y - mean) * jax.lax.rsqrt(var + BN_EPS) * g.reshape(-1) + b.reshape(-1)
        return jnp.maximum(y, 0.0)

    hh = conv_bn_relu(x, p["w1"], p["g1"], p["b1"])
    hh = conv_bn_relu(hh, p["w2"], p["g2"], p["b2"])
    n, H, W, _ = hh.shape
    hf = hh.reshape(n * H * W, HIDDEN)
    mm = lambda u, v: jnp.dot(u, v, precision=jax.lax.Precision.HIGHEST)
    box2d = mm(hf, p["wb"]) + p["bb"]
    cls2d = mm(hf, p["wc"]) + p["bc"]
    dir2d = mm(hf, p["wd"]) + p["bd"]
    a = NUM_ANCHOR_PER_LOC

    def to_anchor_major(y2d, d):
        return (y2d.reshape(n, H, W, a, d)
                    .transpose(0, 3, 1, 2, 4)
                    .reshape(n, a * H * W, d))

    return {
        "box_preds": to_anchor_major(box2d, BOX_CODE_SIZE),
        "cls_preds": to_anchor_major(cls2d, NUM_CLASS),
        "dir_cls_preds": to_anchor_major(dir2d, NUM_DIR_BINS),
    }


# -------------------------------- parameters ---------------------------------

def init_params(key):
    ks = jax.random.split(key, 6)
    s = 0.1
    a = NUM_ANCHOR_PER_LOC
    return {
        # conv weights stored as (tap=ky*3+kx, Cin, Cout) == PyTorch weight[o,i,ky,kx]
        "w1": s * jax.random.normal(ks[0], (9, NUM_FILTERS, HIDDEN), jnp.float32),
        "g1": jnp.ones((1, HIDDEN), jnp.float32),    # BatchNorm default gamma=1
        "b1": jnp.zeros((1, HIDDEN), jnp.float32),   # BatchNorm default beta=0
        "w2": s * jax.random.normal(ks[1], (9, HIDDEN, HIDDEN), jnp.float32),
        "g2": jnp.ones((1, HIDDEN), jnp.float32),
        "b2": jnp.zeros((1, HIDDEN), jnp.float32),
        "wb": s * jax.random.normal(ks[2], (HIDDEN, a * BOX_CODE_SIZE), jnp.float32),
        "bb": s * jax.random.normal(ks[3], (1, a * BOX_CODE_SIZE), jnp.float32),
        "wc": s * jax.random.normal(ks[4], (HIDDEN, a * NUM_CLASS), jnp.float32),
        # nn.init.constant_(conv_cls.bias, -log((1 - 0.01) / 0.01))
        "bc": jnp.full((1, a * NUM_CLASS), -math.log((1 - 0.01) / 0.01), jnp.float32),
        "wd": s * jax.random.normal(ks[5], (HIDDEN, a * NUM_DIR_BINS), jnp.float32),
        "bd": jnp.zeros((1, a * NUM_DIR_BINS), jnp.float32),
    }


if __name__ == "__main__":
    key = jax.random.PRNGKey(0)
    kx, kp = jax.random.split(key)
    N, H, W = 2, 16, 16
    x = jax.random.normal(kx, (N, NUM_FILTERS, H, W), jnp.float32)  # NCHW like PyTorch

    params = init_params(kp)
    out = tiny_object_head_forward(x, params, tm=256)   # 648 rows -> 3 grid tiles
    out = jax.block_until_ready(out)

    assert out["box_preds"].shape == (N, NUM_ANCHOR_PER_LOC * H * W, BOX_CODE_SIZE)
    assert out["cls_preds"].shape == (N, NUM_ANCHOR_PER_LOC * H * W, NUM_CLASS)
    assert out["dir_cls_preds"].shape == (N, NUM_ANCHOR_PER_LOC * H * W, NUM_DIR_BINS)

    ref = reference_forward(x, params)
    for k in out:
        err = float(jnp.max(jnp.abs(out[k] - ref[k])))
        assert err < 2e-3, (k, err)

    print("KERNEL_OK")
</pallas_src>

<mosaic_0001>
module attributes {stable_mosaic.version = 11 : i64} {
  func.func @_stats1_kernel(%arg0: i32, %arg1: memref<256x4xf32, #tpu.memory_space<vmem>>, %arg2: memref<256x4xf32, #tpu.memory_space<vmem>>, %arg3: memref<256x4xf32, #tpu.memory_space<vmem>>, %arg4: memref<9x4x32xf32, #tpu.memory_space<vmem>>, %arg5: memref<2x32xf32, #tpu.memory_space<vmem>>, %arg6: memref<352x4xf32, #tpu.memory_space<vmem>>) attributes {dimension_semantics = [#tpu.dimension_semantics<arbitrary>], iteration_bounds = array<i64: 3>, scalar_prefetch = 0 : i64, scratch_operands = 1 : i64, tpu.core_type = #tpu.core_type<tc>, window_params = [{transform_indices = @transform_0, window_bounds = array<i64: 256, 4>}, {transform_indices = @transform_1, window_bounds = array<i64: 256, 4>}, {transform_indices = @transform_2, window_bounds = array<i64: 256, 4>}, {pipeline_mode = #tpu.pipeline_mode<synchronous>, transform_indices = @transform_3, window_bounds = array<i64: 9, 4, 32>}, {pipeline_mode = #tpu.pipeline_mode<synchronous>, transform_indices = @transform_4, window_bounds = array<i64: 2, 32>}]} {
    %c0_i32 = arith.constant 0 : i32
    %0 = arith.cmpi eq, %arg0, %c0_i32 : i32
    %1 = arith.extui %0 : i1 to i32
    %c0_i32_0 = arith.constant 0 : i32
    %2 = arith.cmpi ne, %1, %c0_i32_0 : i32
    scf.if %2 {
      %cst_65 = arith.constant 0.000000e+00 : f32
      %106 = vector.broadcast %cst_65 : f32 to vector<2x32xf32>
      %c0_66 = arith.constant 0 : index
      %c0_67 = arith.constant 0 : index
      %107 = vector.load %arg5[%c0_66, %c0_67] : memref<2x32xf32, #tpu.memory_space<vmem>>, vector<2x32xf32>
      tpu.vector_store %arg5[%c0_66, %c0_67], %106 {strides = array<i32>} : memref<2x32xf32, #tpu.memory_space<vmem>>, vector<2x32xf32>,
    } else {
    }
    %c208 = arith.constant 208 : index
    %c0 = arith.constant 0 : index
    %3 = vector.load %arg1[%c208, %c0] : memref<256x4xf32, #tpu.memory_space<vmem>>, vector<48x4xf32>
    %c0_1 = arith.constant 0 : index
    %c0_2 = arith.constant 0 : index
    %4 = vector.load %arg6[%c0_1, %c0_2] : memref<352x4xf32, #tpu.memory_space<vmem>>, vector<48x4xf32>
    tpu.vector_store %arg6[%c0_1, %c0_2], %3 {strides = array<i32>} : memref<352x4xf32, #tpu.memory_space<vmem>>, vector<48x4xf32>,
    %c0_3 = arith.constant 0 : index
    %c0_4 = arith.constant 0 : index
    %5 = vector.load %arg2[%c0_3, %c0_4] : memref<256x4xf32, #tpu.memory_space<vmem>>, vector<256x4xf32>
    %c48 = arith.constant 48 : index
    %c0_5 = arith.constant 0 : index
    %6 = vector.load %arg6[%c48, %c0_5] : memref<352x4xf32, #tpu.memory_space<vmem>>, vector<256x4xf32>
    tpu.vector_store %arg6[%c48, %c0_5], %5 {strides = array<i32>} : memref<352x4xf32, #tpu.memory_space<vmem>>, vector<256x4xf32>,
    %c0_6 = arith.constant 0 : index
    %c0_7 = arith.constant 0 : index
    %7 = vector.load %arg3[%c0_6, %c0_7] : memref<256x4xf32, #tpu.memory_space<vmem>>, vector<48x4xf32>
    %c304 = arith.constant 304 : index
    %c0_8 = arith.constant 0 : index
    %8 = vector.load %arg6[%c304, %c0_8] : memref<352x4xf32, #tpu.memory_space<vmem>>, vector<48x4xf32>
    tpu.vector_store %arg6[%c304, %c0_8], %7 {strides = array<i32>} : memref<352x4xf32, #tpu.memory_space<vmem>>, vector<48x4xf32>,
    %c29 = arith.constant 29 : index
    %c0_9 = arith.constant 0 : index
    %9 = vector.load %arg6[%c29, %c0_9] : memref<352x4xf32, #tpu.memory_space<vmem>>, vector<256x4xf32>
    %c0_10 = arith.constant 0 : index
    %c0_11 = arith.constant 0 : index
    %c0_12 = arith.constant 0 : index
    %10 = vector.load %arg4[%c0_10, %c0_11, %c0_12] : memref<9x4x32xf32, #tpu.memory_space<vmem>>, vector<1x4x32xf32>
    %11 = vector.shape_cast %10 : vector<1x4x32xf32> to vector<4x32xf32>
    %cst = arith.constant dense<0.000000e+00> : vector<256x32xf32>
    %12 = tpu.matmul %9, %11, %cst {dimension_numbers = #tpu.dot_dimension_numbers<[1], [0], [0], [1], [0, 0, 1, 1], [], []>} : vector<256x4xf32>, vector<4x32xf32>, vector<256x32xf32> -> vector<256x32xf32>
    %c30 = arith.constant 30 : index
    %c0_13 = arith.constant 0 : index
    %13 = vector.load %arg6[%c30, %c0_13] : memref<352x4xf32, #tpu.memory_space<vmem>>, vector<256x4xf32>
    %c1 = arith.constant 1 : index
    %c0_14 = arith.constant 0 : index
    %c0_15 = arith.constant 0 : index
    %14 = vector.load %arg4[%c1, %c0_14, %c0_15] : memref<9x4x32xf32, #tpu.memory_space<vmem>>, vector<1x4x32xf32>
    %15 = vector.shape_cast %14 : vector<1x4x32xf32> to vector<4x32xf32>
    %cst_16 = arith.constant dense<0.000000e+00> : vector<256x32xf32>
    %16 = tpu.matmul %13, %15, %cst_16 {dimension_numbers = #tpu.dot_dimension_numbers<[1], [0], [0], [1], [0, 0, 1, 1], [], []>} : vector<256x4xf32>, vector<4x32xf32>, vector<256x32xf32> -> vector<256x32xf32>
    %17 = arith.addf %12, %16 : vector<256x32xf32>
    %c31 = arith.constant 31 : index
    %c0_17 = arith.constant 0 : index
    %18 = vector.load %arg6[%c31, %c0_17] : memref<352x4xf32, #tpu.memory_space<vmem>>, vector<256x4xf32>
    %c2 = arith.constant 2 : index
    %c0_18 = arith.constant 0 : index
    %c0_19 = arith.constant 0 : index
    %19 = vector.load %arg4[%c2, %c0_18, %c0_19] : memref<9x4x32xf32, #tpu.memory_space<vmem>>, vector<1x4x32xf32>
    %20 = vector.shape_cast %19 : vector<1x4x32xf32> to vector<4x32xf32>
    %cst_20 = arith.constant dense<0.000000e+00> : vector<256x32xf32>
    %21 = tpu.matmul %18, %20, %cst_20 {dimension_numbers = #tpu.dot_dimension_numbers<[1], [0], [0], [1], [0, 0, 1, 1], [], []>} : vector<256x4xf32>, vector<4x32xf32>, vector<256x32xf32> -> vector<256x32xf32>
    %22 = arith.addf %17, %21 : vector<256x32xf32>
    %c47 = arith.constant 47 : index
    %c0_21 = arith.constant 0 : index
    %23 = vector.load %arg6[%c47, %c0_21] : memref<352x4xf32, #tpu.memory_space<vmem>>, vector<256x4xf32>
    %c3 = arith.constant 3 : index
    %c0_22 = arith.constant 0 : index
    %c0_23 = arith.constant 0 : index
    %24 = vector.load %arg4[%c3, %c0_22, %c0_23] : memref<9x4x32xf32, #tpu.memory_space<vmem>>, vector<1x4x32xf32>
    %25 = vector.shape_cast %24 : vector<1x4x32xf32> to vector<4x32xf32>
    %cst_24 = arith.constant dense<0.000000e+00> : vector<256x32xf32>
    %26 = tpu.matmul %23, %25, %cst_24 {dimension_numbers = #tpu.dot_dimension_numbers<[1], [0], [0], [1], [0, 0, 1, 1], [], []>} : vector<256x4xf32>, vector<4x32xf32>, vector<256x32xf32> -> vector<256x32xf32>
    %27 = arith.addf %22, %26 : vector<256x32xf32>
    %c48_25 = arith.constant 48 : index
    %c0_26 = arith.constant 0 : index
    %28 = vector.load %arg6[%c48_25, %c0_26] : memref<352x4xf32, #tpu.memory_space<vmem>>, vector<256x4xf32>
    %c4 = arith.constant 4 : index
    %c0_27 = arith.constant 0 : index
    %c0_28 = arith.constant 0 : index
    %29 = vector.load %arg4[%c4, %c0_27, %c0_28] : memref<9x4x32xf32, #tpu.memory_space<vmem>>, vector<1x4x32xf32>
    %30 = vector.shape_cast %29 : vector<1x4x32xf32> to vector<4x32xf32>
    %cst_29 = arith.constant dense<0.000000e+00> : vector<256x32xf32>
    %31 = tpu.matmul %28, %30, %cst_29 {dimension_numbers = #tpu.dot_dimension_numbers<[1], [0], [0], [1], [0, 0, 1, 1], [], []>} : vector<256x4xf32>, vector<4x32xf32>, vector<256x32xf32> -> vector<256x32xf32>
    %32 = arith.addf %27, %31 : vector<256x32xf32>
    %c49 = arith.constant 49 : index
    %c0_30 = arith.constant 0 : index
    %33 = vector.load %arg6[%c49, %c0_30] : memref<352x4xf32, #tpu.memory_space<vmem>>, vector<256x4xf32>
    %c5 = arith.constant 5 : index
    %c0_31 = arith.constant 0 : index
    %c0_32 = arith.constant 0 : index
    %34 = vector.load %arg4[%c5, %c0_31, %c0_32] : memref<9x4x32xf32, #tpu.memory_space<vmem>>, vector<1x4x32xf32>
    %35 = vector.shape_cast %34 : vector<1x4x32xf32> to vector<4x32xf32>
    %cst_33 = arith.constant dense<0.000000e+00> : vector<256x32xf32>
    %36 = tpu.matmul %33, %35, %cst_33 {dimension_numbers = #tpu.dot_dimension_numbers<[1], [0], [0], [1], [0, 0, 1, 1], [], []>} : vector<256x4xf32>, vector<4x32xf32>, vector<256x32xf32> -> vector<256x32xf32>
    %37 = arith.addf %32, %36 : vector<256x32xf32>
    %c65 = arith.constant 65 : index
    %c0_34 = arith.constant 0 : index
    %38 = vector.load %arg6[%c65, %c0_34] : memref<352x4xf32, #tpu.memory_space<vmem>>, vector<256x4xf32>
    %c6 = arith.constant 6 : index
    %c0_35 = arith.constant 0 : index
    %c0_36 = arith.constant 0 : index
    %39 = vector.load %arg4[%c6, %c0_35, %c0_36] : memref<9x4x32xf32, #tpu.memory_space<vmem>>, vector<1x4x32xf32>
    %40 = vector.shape_cast %39 : vector<1x4x32xf32> to vector<4x32xf32>
    %cst_37 = arith.constant dense<0.000000e+00> : vector<256x32xf32>
    %41 = tpu.matmul %38, %40, %cst_37 {dimension_numbers = #tpu.dot_dimension_numbers<[1], [0], [0], [1], [0, 0, 1, 1], [], []>} : vector<256x4xf32>, vector<4x32xf32>, vector<256x32xf32> -> vector<256x32xf32>
    %42 = arith.addf %37, %41 : vector<256x32xf32>
    %c66 = arith.constant 66 : index
    %c0_38 = arith.constant 0 : index
    %43 = vector.load %arg6[%c66, %c0_38] : memref<352x4xf32, #tpu.memory_space<vmem>>, vector<256x4xf32>
    %c7 = arith.constant 7 : index
    %c0_39 = arith.constant 0 : index
    %c0_40 = arith.constant 0 : index
    %44 = vector.load %arg4[%c7, %c0_39, %c0_40] : memref<9x4x32xf32, #tpu.memory_space<vmem>>, vector<1x4x32xf32>
    %45 = vector.shape_cast %44 : vector<1x4x32xf32> to vector<4x32xf32>
    %cst_41 = arith.constant dense<0.000000e+00> : vector<256x32xf32>
    %46 = tpu.matmul %43, %45, %cst_41 {dimension_numbers = #tpu.dot_dimension_numbers<[1], [0], [0], [1], [0, 0, 1, 1], [], []>} : vector<256x4xf32>, vector<4x32xf32>, vector<256x32xf32> -> vector<256x32xf32>
    %47 = arith.addf %42, %46 : vector<256x32xf32>
    %c67 = arith.constant 67 : index
    %c0_42 = arith.constant 0 : index
    %48 = vector.load %arg6[%c67, %c0_42] : memref<352x4xf32, #tpu.memory_space<vmem>>, vector<256x4xf32>
    %c8 = arith.constant 8 : index
    %c0_43 = arith.constant 0 : index
    %c0_44 = arith.constant 0 : index
    %49 = vector.load %arg4[%c8, %c0_43, %c0_44] : memref<9x4x32xf32, #tpu.memory_space<vmem>>, vector<1x4x32xf32>
    %50 = vector.shape_cast %49 : vector<1x4x32xf32> to vector<4x32xf32>
    %cst_45 = arith.constant dense<0.000000e+00> : vector<256x32xf32>
    %51 = tpu.matmul %48, %50, %cst_45 {dimension_numbers = #tpu.dot_dimension_numbers<[1], [0], [0], [1], [0, 0, 1, 1], [], []>} : vector<256x4xf32>, vector<4x32xf32>, vector<256x32xf32> -> vector<256x32xf32>
    %52 = arith.addf %47, %51 : vector<256x32xf32>
    %c256_i32 = arith.constant 256 : i32
    %53 = arith.muli %arg0, %c256_i32 : i32
    %54 = tpu.iota {dimensions = array<i32: 0>} : vector<256x1xi32>
    %55 = vector.broadcast %53 : i32 to vector<256x1xi32>
    %56 = arith.addi %55, %54 : vector<256x1xi32>
    %c0_i32_46 = arith.constant 0 : i32
    %57 = vector.broadcast %c0_i32_46 : i32 to vector<256x1xi32>
    %58 = arith.cmpi sge, %56, %57 : vector<256x1xi32>
    %c648_i32 = arith.constant 648 : i32
    %59 = vector.broadcast %c648_i32 : i32 to vector<256x1xi32>
    %60 = arith.cmpi slt, %56, %59 : vector<256x1xi32>
    %61 = arith.andi %58, %60 : vector<256x1xi1>
    %c0_i32_47 = arith.constant 0 : i32
    %62 = vector.broadcast %c0_i32_47 : i32 to vector<256x1xi32>
    %63 = arith.maxsi %56, %62 : vector<256x1xi32>
    %64 = arith.sitofp %63 : vector<256x1xi32> to vector<256x1xf32>
    %cst_48 = arith.constant 5.000000e-01 : f32
    %65 = vector.broadcast %cst_48 : f32 to vector<256x1xf32>
    %66 = arith.addf %64, %65 : vector<256x1xf32>
    %cst_49 = arith.constant 0.00308641978 : f32
    %67 = vector.broadcast %cst_49 : f32 to vector<256x1xf32>
    %68 = arith.mulf %66, %67 : vector<256x1xf32>
    %69 = math.floor %68 : vector<256x1xf32>
    %cst_50 = arith.constant 3.240000e+02 : f32
    %70 = vector.broadcast %cst_50 : f32 to vector<256x1xf32>
    %71 = arith.mulf %69, %70 : vector<256x1xf32>
    %72 = arith.subf %64, %71 : vector<256x1xf32>
    %cst_51 = arith.constant 5.000000e-01 : f32
    %73 = vector.broadcast %cst_51 : f32 to vector<256x1xf32>
    %74 = arith.addf %72, %73 : vector<256x1xf32>
    %cst_52 = arith.constant 0.055555556 : f32
    %75 = vector.broadcast %cst_52 : f32 to vector<256x1xf32>
    %76 = arith.mulf %74, %75 : vector<256x1xf32>
    %77 = math.floor %76 : vector<256x1xf32>
    %cst_53 = arith.constant 1.800000e+01 : f32
    %78 = vector.broadcast %cst_53 : f32 to vector<256x1xf32>
    %79 = arith.mulf %77, %78 : vector<256x1xf32>
    %80 = arith.subf %72, %79 : vector<256x1xf32>
    %cst_54 = arith.constant 1.000000e+00 : f32
    %81 = vector.broadcast %cst_54 : f32 to vector<256x1xf32>
    %82 = arith.cmpf oge, %77, %81 : vector<256x1xf32>
    %83 = arith.andi %61, %82 : vector<256x1xi1>
    %cst_55 = arith.constant 1.600000e+01 : f32
    %84 = vector.broadcast %cst_55 : f32 to vector<256x1xf32>
    %85 = arith.cmpf ole, %77, %84 : vector<256x1xf32>
    %86 = arith.andi %83, %85 : vector<256x1xi1>
    %cst_56 = arith.constant 1.000000e+00 : f32
    %87 = vector.broadcast %cst_56 : f32 to vector<256x1xf32>
    %88 = arith.cmpf oge, %80, %87 : vector<256x1xf32>
    %89 = arith.andi %86, %88 : vector<256x1xi1>
    %cst_57 = arith.constant 1.600000e+01 : f32
    %90 = vector.broadcast %cst_57 : f32 to vector<256x1xf32>
    %91 = arith.cmpf ole, %80, %90 : vector<256x1xf32>
    %92 = arith.andi %89, %91 : vector<256x1xi1>
    %c0_58 = arith.constant 0 : index
    %c0_59 = arith.constant 0 : index
    %93 = vector.load %arg5[%c0_58, %c0_59] : memref<2x32xf32, #tpu.memory_space<vmem>>, vector<2x32xf32>
    %cst_60 = arith.constant 0.000000e+00 : f32
    %94 = vector.shape_cast %92 : vector<256x1xi1> to vector<256x1xi1>
    %95 = vector.broadcast %94 : vector<256x1xi1> to vector<256x32xi1>
    %96 = vector.broadcast %cst_60 : f32 to vector<256x32xf32>
    %97 = arith.select %95, %52, %96 : vector<256x32xi1>, vector<256x32xf32>
    %cst_61 = arith.constant dense<0.000000e+00> : vector<32xf32>
    %98 = vector.multi_reduction <add>, %97, %cst_61 [0] : vector<256x32xf32> to vector<32xf32>
    %99 = vector.shape_cast %98 : vector<32xf32> to vector<1x32xf32>
    %100 = arith.mulf %97, %97 : vector<256x32xf32>
    %cst_62 = arith.constant dense<0.000000e+00> : vector<32xf32>
    %101 = vector.multi_reduction <add>, %100, %cst_62 [0] : vector<256x32xf32> to vector<32xf32>
    %102 = vector.shape_cast %101 : vector<32xf32> to vector<1x32xf32>
    %103 = tpu.concatenate %99, %102 in 0 : vector<1x32xf32>, vector<1x32xf32> -> vector<2x32xf32>
    %104 = arith.addf %93, %103 : vector<2x32xf32>
    %c0_63 = arith.constant 0 : index
    %c0_64 = arith.constant 0 : index
    %105 = vector.load %arg5[%c0_63, %c0_64] : memref<2x32xf32, #tpu.memory_space<vmem>>, vector<2x32xf32>
    tpu.vector_store %arg5[%c0_63, %c0_64], %104 {strides = array<i32>} : memref<2x32xf32, #tpu.memory_space<vmem>>, vector<2x32xf32>,
    return
  }
  func.func @transform_0(%arg0: i32) -> (i32, i32) {
    %c0_i32 = arith.constant 0 : i32
    %0 = arith.addi %arg0, %c0_i32 : i32
    %c0_i32_0 = arith.constant 0 : i32
    %c0_i32_1 = arith.constant 0 : i32
    return %0, %c0_i32_0 : i32, i32
  }
  func.func @transform_1(%arg0: i32) -> (i32, i32) {
    %c1_i32 = arith.constant 1 : i32
    %0 = arith.addi %arg0, %c1_i32 : i32
    %c0_i32 = arith.constant 0 : i32
    %c0_i32_0 = arith.constant 0 : i32
    return %0, %c0_i32 : i32, i32
  }
  func.func @transform_2(%arg0: i32) -> (i32, i32) {
    %c2_i32 = arith.constant 2 : i32
    %0 = arith.addi %arg0, %c2_i32 : i32
    %c0_i32 = arith.constant 0 : i32
    %c0_i32_0 = arith.constant 0 : i32
    return %0, %c0_i32 : i32, i32
  }
  func.func @transform_3(%arg0: i32) -> (i32, i32, i32) {
    %c0_i32 = arith.constant 0 : i32
    %c0_i32_0 = arith.constant 0 : i32
    %c0_i32_1 = arith.constant 0 : i32
    %c0_i32_2 = arith.constant 0 : i32
    return %c0_i32, %c0_i32_0, %c0_i32_1 : i32, i32, i32
  }
  func.func @transform_4(%arg0: i32) -> (i32, i32) {
    %c0_i32 = arith.constant 0 : i32
    %c0_i32_0 = arith.constant 0 : i32
    %c0_i32_1 = arith.constant 0 : i32
    return %c0_i32, %c0_i32_0 : i32, i32
  }
}

</mosaic_0001>

<bundles_post_ra>
// kernel: tpu_custom_call.1
= control target key start
LH: loop header
LB: loop body
LE: loop exit
PB: predicated region body
PF: predicated region fallthrough
CT: control target
= control target key end

     0   :  { %9 = vsyncpa [#allocation4], 0  ;;  %s6182_s15 = smov 0   ;;  %s8920_s0 = inlined_call_operand.vmem [shape: f32[1280,4], index: 0, kind: input, shape index: {}]   ;;  %s8921_s1 = inlined_call_operand.vmem [shape: f32[1280,4], index: 1, kind: input, shape index: {}]   ;;  %s8922_s2 = inlined_call_operand.vmem [shape: f32[1280,4], index: 2, kind: input, shape index: {}]   ;;  %s8923_s3 = inlined_call_operand.vmem [shape: f32[9,4,32], index: 3, kind: input, shape index: {}]   ;;  %s8924_s4 = inlined_call_operand.hbm [shape: f32[2,32], index: 4, kind: output, shape index: {}]  }
   0x1 LB: > { %s6188_s16 = sadd.s32 4294967295, %s6152_s15   ;;  %p4966_p0 = scmp.ge.s32.totalorder %s6152_s15, 1  ;;  %s6152_s15 = sphi %s6182_s15, %s15_s15  }
   0x2   : > { %p189_p1 = scmp.lt.s32.totalorder %s6152_s15, 4 }
   0x4   : > { %p190_p2 = pnand %p4966_p0, %p189_p1 }
   0x6   : > { %193 = sbr.rel (%p190_p2) target bundleno = 636 (0x27c), region = 36 }
   0xb   : > { %s4967_s17 = sshll.u32 %s6188_s16, 5  ;;  %p4973_p6 = scmp.ne.s32.totalorder %s6188_s16, 0 }
   0xc   : > { %p223_p3 = scmp.lt.s32.totalorder %s4967_s17, 159  ;;  %s5349_s18 = sadd.s32 32, %s4967_s17 }
   0xd   : > { %p230_p4 = scmp.lt.s32.totalorder %s5349_s18, 159  ;;  %s5351_s19 = sadd.s32 64, %s4967_s17 }
   0xe   : > { %s9224_s17 = smov (!%p223_p3, %s4967_s17), 159  ;;  %p238_p5 = scmp.lt.s32.totalorder %s5351_s19, 159 }
   0xf   : > { %s9226_s18 = smov (!%p230_p4, %s5349_s18), 159  ;;  %s4968_s20 = sshll.u32 %s9224_s17, 3 }
  0x10   : > { %s226_s23 = scalar_lea.vmem %s8920_s0, %s4968_s20  ;;  %s4970_s24 = sshll.u32 %s9226_s18, 3 }
  0x11   : > { %s6199_s27 = scalar_lea.vmem %s8921_s1, %s4970_s24  ;;  %s9228_s19 = smov (!%p238_p5, %s5351_s19), 159 }
  0x12   : > { %s4972_s28 = sshll.u32 %s9228_s19, 3  ;;  %247 = sbr.rel (%p4973_p6) target bundleno = 25 (0x19), region = 40 }
  0x13   : > { %s6204_s5 = scalar_lea.vmem %s8922_s2, %s4972_s28 }
  0x17   : > { %vm248_vm0 = vcmask 254976   ;;  %v6154_v0 = vmov 0.0  }
  0x18   : > { %249 = vst.msk [vmem:[#allocation3] sm:$0x3] %vm248_vm0, %v6154_v0 }
  0x19 PF: > { %v4974_v1 = vld [vmem:[%s8923_s3 + $0x4] sm:$0xf]  ;;  %vm502_vm1 = vcmask 1043456   ;;  %vm256_vm2 = vcmask 31744   ;;  %v253_v2 = vld [vmem:[%s226_s23 + $0xe8] sm:$0xff]  ;;  %v254_v3 = vld [vmem:[%s226_s23 + $0xf0] sm:$0xff] }
  0x1a   : > { %6099 = vmatprep.subr.msk.mxu1 %vm502_vm1, %v4974_v1  ;;  %5649 = vmatprep.subr.msk.mxu0 %vm502_vm1, %v4974_v1  ;;  %260 = vst.msk [vmem:[#allocation2 + $0x18] sm:$0xff] %vm256_vm2, %v253_v2  ;;  %261 = vst.msk [vmem:[#allocation2 + $0x20] sm:$0xff] %vm256_vm2, %v254_v3  ;;  %v276_v4 = vld [vmem:[%s6199_s27 + $0x68] sm:$0xff]  ;;  %v277_v5 = vld [vmem:[%s6199_s27 + $0x70] sm:$0xff]  ;;  %s5279_s26 = sshll.u32 %s6188_s16, 8  ;;  %p6105_p7 = scmp.eq.s32.totalorder %s6188_s16, 2 }
  0x1b   : > { %6100 = vmatpush3.msk.msra.mxu1 %vm502_vm1, %v4974_v1  ;;  %5650 = vmatpush3.msk.msra.mxu0 %vm502_vm1, %v4974_v1  ;;  %v371_v6 = vld [vmem:[%s8923_s3] sm:$0xf]  ;;  %308 = vst.msk [vmem:[#allocation2 + $0x98] sm:$0xff] %vm256_vm2, %v276_v4  ;;  %309 = vst.msk [vmem:[#allocation2 + $0xa0] sm:$0xff] %vm256_vm2, %v277_v5  ;;  %v255_v7 = vld [vmem:[%s226_s23 + $0xf8] sm:$0xff] }
  0x1c   : > { %5699 = vmatprep.subr.msk.mxu1 %vm502_vm1, %v371_v6  ;;  %v278_v8 = vld [vmem:[%s6199_s27 + $0x78] sm:$0xff]  ;;  %v5041_v9 = vld [vmem:[%s8923_s3 + $0x8] sm:$0xf]  ;;  %262 = vst.msk [vmem:[#allocation2 + $0x28] sm:$0xff] %vm256_vm2, %v255_v7  ;;  %v263_v10 = vld [vmem:[%s6199_s27] sm:$0xff] }
  0x1d   : > { %310 = vst.msk [vmem:[#allocation2 + $0xa8] sm:$0xff] %vm256_vm2, %v278_v8  ;;  %5749 = vmatprep.subr.msk.mxu0 %vm502_vm1, %v5041_v9  ;;  %v279_v11 = vld [vmem:[%s6199_s27 + $0x80] sm:$0xff]  ;;  %v264_v12 = vld [vmem:[%s6199_s27 + $0x8] sm:$0xff]  ;;  %295 = vst.msk [vmem:[#allocation2 + $0x30] sm:$0xff] %vm256_vm2, %v263_v10 }
  0x1e   : > { %311 = vst.msk [vmem:[#allocation2 + $0xb0] sm:$0xff] %vm256_vm2, %v279_v11  ;;  %296 = vst.msk [vmem:[#allocation2 + $0x38] sm:$0xff] %vm256_vm2, %v264_v12  ;;  %v280_v13 = vld [vmem:[%s6199_s27 + $0x88] sm:$0xff]  ;;  %v265_v14 = vld [vmem:[%s6199_s27 + $0x10] sm:$0xff] }
  0x1f   : > { %v281_v15 = vld [vmem:[%s6199_s27 + $0x90] sm:$0xff]  ;;  %312 = vst.msk [vmem:[#allocation2 + $0xb8] sm:$0xff] %vm256_vm2, %v280_v13  ;;  %297 = vst.msk [vmem:[#allocation2 + $0x40] sm:$0xff] %vm256_vm2, %v265_v14  ;;  %v266_v16 = vld [vmem:[%s6199_s27 + $0x18] sm:$0xff] }
  0x20   : > { %313 = vst.msk [vmem:[#allocation2 + $0xc0] sm:$0xff] %vm256_vm2, %v281_v15  ;;  %v282_v17 = vld [vmem:[%s6199_s27 + $0x98] sm:$0xff]  ;;  %v267_v18 = vld [vmem:[%s6199_s27 + $0x20] sm:$0xff]  ;;  %298 = vst.msk [vmem:[#allocation2 + $0x48] sm:$0xff] %vm256_vm2, %v266_v16 }
  0x21   : > { %314 = vst.msk [vmem:[#allocation2 + $0xc8] sm:$0xff] %vm256_vm2, %v282_v17  ;;  %299 = vst.msk [vmem:[#allocation2 + $0x50] sm:$0xff] %vm256_vm2, %v267_v18  ;;  %v283_v19 = vld [vmem:[%s6199_s27 + $0xa0] sm:$0xff]  ;;  %v268_v20 = vld [vmem:[%s6199_s27 + $0x28] sm:$0xff] }
  0x22   : > { %v284_v21 = vld [vmem:[%s6199_s27 + $0xa8] sm:$0xff]  ;;  %315 = vst.msk [vmem:[#allocation2 + $0xd0] sm:$0xff] %vm256_vm2, %v283_v19  ;;  %300 = vst.msk [vmem:[#allocation2 + $0x58] sm:$0xff] %vm256_vm2, %v268_v20  ;;  %v269_v22 = vld [vmem:[%s6199_s27 + $0x30] sm:$0xff] }
  0x23   : > { %316 = vst.msk [vmem:[#allocation2 + $0xd8] sm:$0xff] %vm256_vm2, %v284_v21  ;;  %v285_v23 = vld [vmem:[%s6199_s27 + $0xb0] sm:$0xff]  ;;  %v270_v24 = vld [vmem:[%s6199_s27 + $0x38] sm:$0xff]  ;;  %301 = vst.msk [vmem:[#allocation2 + $0x60] sm:$0xff] %vm256_vm2, %v269_v22 }
  0x24   : > { %v372_v25 = vld [vmem:[#allocation2 + $0x1e] sm:$0xff]  ;;  %317 = vst.msk [vmem:[#allocation2 + $0xe0] sm:$0xff] %vm256_vm2, %v285_v23  ;;  %302 = vst.msk [vmem:[#allocation2 + $0x68] sm:$0xff] %vm256_vm2, %v270_v24  ;;  %v272_v30 = vld [vmem:[%s6199_s27 + $0x48] sm:$0xff] }
  0x25   : > { %v286_v26 = vld [vmem:[%s6199_s27 + $0xb8] sm:$0xff]  ;;  %v271_v27 = vld [vmem:[%s6199_s27 + $0x40] sm:$0xff]  ;;  %5651 = vmatprep.mubr.msk.f32.mxu0 %vm256_vm2, %v372_v25  ;;  %304 = vst.msk [vmem:[#allocation2 + $0x78] sm:$0xff] %vm256_vm2, %v272_v30  ;;  %v288_v33 = vld [vmem:[%s6199_s27 + $0xc8] sm:$0xff] }
  0x26   : > { %v388_v28 = vld [vmem:[#allocation2 + $0x9e] sm:$0xff]  ;;  %318 = vst.msk [vmem:[#allocation2 + $0xe8] sm:$0xff] %vm256_vm2, %v286_v26  ;;  %303 = vst.msk [vmem:[#allocation2 + $0x70] sm:$0xff] %vm256_vm2, %v271_v27  ;;  %v373_v31 = vld [vmem:[#allocation2 + $0x26] sm:$0xff] }
  0x27   : > { %v287_v29 = vld [vmem:[%s6199_s27 + $0xc0] sm:$0xff]  ;;  %5675 = vmatprep.mubr.msk.f32.mxu1 %vm256_vm2, %v388_v28  ;;  %5652 = vmatmul.mubr.msk.f32.vlgmr.msra.gmra.mxu0 %vm256_vm2, %v373_v31  ;;  %v374_v34 = vld [vmem:[#allocation2 + $0x2e] sm:$0xff]  ;;  %320 = vst.msk [vmem:[#allocation2 + $0xf8] sm:$0xff] %vm256_vm2, %v288_v33  ;;  %v375_v36 = vld [vmem:[#allocation2 + $0x36] sm:$0xff] }
  0x28   : > { %v389_v32 = vld [vmem:[#allocation2 + $0xa6] sm:$0xff]  ;;  %319 = vst.msk [vmem:[#allocation2 + $0xf0] sm:$0xff] %vm256_vm2, %v287_v29  ;;  %v390_v35 = vld [vmem:[#allocation2 + $0xae] sm:$0xff]  ;;  %5750 = vmatpush3.msk.msra.mxu0 %vm502_vm1, %v5041_v9  ;;  %v391_v37 = vld [vmem:[#allocation2 + $0xb6] sm:$0xff]  ;;  %5654 = vmatprep.mubr.msk.f32.mxu0 %vm256_vm2, %v374_v34 }
  0x29   : > { %5676 = vmatmul.mubr.msk.f32.vlgmr.msra.gmra.mxu1 %vm256_vm2, %v389_v32  ;;  %v376_v38 = vld [vmem:[#allocation2 + $0x3e] sm:$0xff]  ;;  %v377_v40 = vld [vmem:[#allocation2 + $0x46] sm:$0xff]  ;;  %v273_v42 = vld [vmem:[%s6199_s27 + $0x50] sm:$0xff] }
  0x2a   : > { %5700 = vmatpush3.msk.msra.mxu1 %vm502_vm1, %v371_v6  ;;  %5678 = vmatprep.mubr.msk.f32.mxu1 %vm256_vm2, %v390_v35  ;;  %v392_v39 = vld [vmem:[#allocation2 + $0xbe] sm:$0xff]  ;;  %v393_v41 = vld [vmem:[#allocation2 + $0xc6] sm:$0xff]  ;;  %v378_v43 = vld [vmem:[#allocation2 + $0x4e] sm:$0xff]  ;;  %305 = vst.msk [vmem:[#allocation2 + $0x80] sm:$0xff] %vm256_vm2, %v273_v42 }
  0x2b   : > { %5655 = vmatmul.mubr.msk.f32.gmra.mxu0 %vm256_vm2, %v375_v36  ;;  %v394_v44 = vld [vmem:[#allocation2 + $0xce] sm:$0xff]  ;;  %v274_v46 = vld [vmem:[%s6199_s27 + $0x58] sm:$0xff]  ;;  %v275_v48 = vld [vmem:[%s6199_s27 + $0x60] sm:$0xff] }
  0x2c   : > { %5657 = vmatprep.mubr.msk.f32.mxu0 %vm256_vm2, %v376_v38  ;;  %v289_v45 = vld [vmem:[%s6199_s27 + $0xd0] sm:$0xff]  ;;  %v290_v47 = vld [vmem:[%s6199_s27 + $0xd8] sm:$0xff]  ;;  %306 = vst.msk [vmem:[#allocation2 + $0x88] sm:$0xff] %vm256_vm2, %v274_v46  ;;  %v291_v49 = vld [vmem:[%s6199_s27 + $0xe0] sm:$0xff] }
  0x2d   : > { %5679 = vmatmul.mubr.msk.f32.gmra.mxu1 %vm256_vm2, %v391_v37  ;;  %321 = vst.msk [vmem:[#allocation2 + $0x100] sm:$0xff] %vm256_vm2, %v289_v45  ;;  %322 = vst.msk [vmem:[#allocation2 + $0x108] sm:$0xff] %vm256_vm2, %v290_v47  ;;  %v292_v50 = vld [vmem:[%s6199_s27 + $0xe8] sm:$0xff]  ;;  %v379_v51 = vld [vmem:[#allocation2 + $0x56] sm:$0xff] }
  0x2e   : > { %5681 = vmatprep.mubr.msk.f32.mxu1 %vm256_vm2, %v392_v39  ;;  %v395_v52 = vld [vmem:[#allocation2 + $0xd6] sm:$0xff]  ;;  %307 = vst.msk [vmem:[#allocation2 + $0x90] sm:$0xff] %vm256_vm2, %v275_v48  ;;  %323 = vst.msk [vmem:[#allocation2 + $0x110] sm:$0xff] %vm256_vm2, %v291_v49  ;;  %v5075_v53 = vld [vmem:[%s8923_s3 + $0xc] sm:$0xf] }
  0x2f   : > { %5658 = vmatmul.mubr.msk.f32.gmra.mxu0 %vm256_vm2, %v377_v40  ;;  %324 = vst.msk [vmem:[#allocation2 + $0x118] sm:$0xff] %vm256_vm2, %v292_v50  ;;  %v380_v54 = vld [vmem:[#allocation2 + $0x5e] sm:$0xff]  ;;  %5799 = vmatprep.subr.msk.mxu1 %vm502_vm1, %v5075_v53  ;;  %v5109_v56 = vld [vmem:[%s8923_s3 + $0x10] sm:$0xf]  ;;  %v381_v57 = vld [vmem:[#allocation2 + $0x66] sm:$0xff] }
  0x30   : > { %5660 = vmatprep.mubr.msk.f32.mxu0 %vm256_vm2, %v378_v43  ;;  %v396_v55 = vld [vmem:[#allocation2 + $0xde] sm:$0xff]  ;;  %5849 = vmatprep.subr.msk.mxu0 %vm502_vm1, %v5109_v56  ;;  %v397_v58 = vld [vmem:[#allocation2 + $0xe6] sm:$0xff]  ;;  %v382_v59 = vld [vmem:[#allocation2 + $0x6e] sm:$0xff] }
  0x31   : > { %5682 = vmatmul.mubr.msk.f32.gmra.mxu1 %vm256_vm2, %v393_v41  ;;  %v398_v60 = vld [vmem:[#allocation2 + $0xee] sm:$0xff]  ;;  %v383_v61 = vld [vmem:[#allocation2 + $0x76] sm:$0xff]  ;;  %v384_v63 = vld [vmem:[#allocation2 + $0x7e] sm:$0xff] }
  0x32   : > { %5684 = vmatprep.mubr.msk.f32.mxu1 %vm256_vm2, %v394_v44  ;;  %v399_v62 = vld [vmem:[#allocation2 + $0xf6] sm:$0xff]  ;;  %v1055_v8 = vld [vmem:[#allocation2 + $0x1f] sm:$0xff]  ;;  %v1056_v10 = vld [vmem:[#allocation2 + $0x27] sm:$0xff] }
  0x33   : > { %5661 = vmatmul.mubr.msk.f32.gmra.mxu0 %vm256_vm2, %v379_v51  ;;  %v385_v1 = vld [vmem:[#allocation2 + $0x86] sm:$0xff]  ;;  %v339_v7 = vld [vmem:[#allocation2 + $0x1d] sm:$0xff]  ;;  %v6329_v12 = vld [vmem:[#allocation2 + $0x2f] sm:$0xff] }
  0x34   : > { %5663 = vmatprep.mubr.msk.f32.mxu0 %vm256_vm2, %v380_v54  ;;  %v400_v0 = vld [vmem:[#allocation2 + $0xfe] sm:$0xff]  ;;  %v401_v2 = vld [vmem:[#allocation2 + $0x106] sm:$0xff]  ;;  %v342_v13 = vld [vmem:[#allocation2 + $0x35] sm:$0xff] }
  0x35   : > { %5685 = vmatmul.mubr.msk.f32.gmra.mxu1 %vm256_vm2, %v395_v52  ;;  %v386_v3 = vld [vmem:[#allocation2 + $0x8e] sm:$0xff]  ;;  %v387_v5 = vld [vmem:[#allocation2 + $0x96] sm:$0xff]  ;;  %v340_v9 = vld [vmem:[#allocation2 + $0x25] sm:$0xff] }
  0x36   : > { %5687 = vmatprep.mubr.msk.f32.mxu1 %vm256_vm2, %v396_v55  ;;  %v402_v4 = vld [vmem:[#allocation2 + $0x10e] sm:$0xff]  ;;  %v403_v6 = vld [vmem:[#allocation2 + $0x116] sm:$0xff]  ;;  %v6340_v16 = vld [vmem:[#allocation2 + $0x3f] sm:$0xff] }
  0x37   : > { %5664 = vmatmul.mubr.msk.f32.gmra.mxu0 %vm256_vm2, %v381_v57  ;;  %v341_v11 = vld [vmem:[#allocation2 + $0x2d] sm:$0xff]  ;;  %v6335_v14 = vld [vmem:[#allocation2 + $0x37] sm:$0xff]  ;;  %v344_v19 = vld [vmem:[#allocation2 + $0x45] sm:$0xff] }
  0x38   : > { %5666 = vmatprep.mubr.msk.f32.mxu0 %vm256_vm2, %v382_v59  ;;  %v343_v15 = vld [vmem:[#allocation2 + $0x3d] sm:$0xff]  ;;  %v6345_v17 = vld [vmem:[%s8923_s3 + $0x14] sm:$0xf]  ;;  %v6350_v18 = vld [vmem:[%s8923_s3 + $0x18] sm:$0xf] }
  0x39   : > { %5688 = vmatmul.mubr.msk.f32.gmra.mxu1 %vm256_vm2, %v397_v58  ;;  %v6362_v20 = vld [vmem:[#allocation2 + $0x47] sm:$0xff]  ;;  %v6364_v22 = vld [vmem:[#allocation2 + $0x4f] sm:$0xff]  ;;  %v6372_v24 = vld [vmem:[#allocation2 + $0x57] sm:$0xff] }
  0x3a   : > { %5690 = vmatprep.mubr.msk.f32.mxu1 %vm256_vm2, %v398_v60  ;;  %v345_v21 = vld [vmem:[#allocation2 + $0x4d] sm:$0xff]  ;;  %v346_v23 = vld [vmem:[#allocation2 + $0x55] sm:$0xff]  ;;  %v347_v25 = vld [vmem:[#allocation2 + $0x5d] sm:$0xff] }
  0x3b   : > { %5667 = vmatmul.mubr.msk.f32.gmra.mxu0 %vm256_vm2, %v383_v61  ;;  %v6374_v26 = vld [vmem:[#allocation2 + $0x5f] sm:$0xff]  ;;  %v293_v27 = vld [vmem:[%s6199_s27 + $0xf0] sm:$0xff]  ;;  %v6384_v30 = vld [vmem:[#allocation2 + $0x67] sm:$0xff] }
  0x3c   : > { %5669 = vmatprep.mubr.msk.f32.mxu0 %vm256_vm2, %v384_v63  ;;  %v294_v28 = vld [vmem:[%s6199_s27 + $0xf8] sm:$0xff]  ;;  %v348_v29 = vld [vmem:[#allocation2 + $0x65] sm:$0xff]  ;;  %325 = vst.msk [vmem:[#allocation2 + $0x120] sm:$0xff] %vm256_vm2, %v293_v27  ;;  %v349_v31 = vld [vmem:[#allocation2 + $0x6d] sm:$0xff]  ;;  %s6156_s27 = smov [#allocation3]  }
  0x3d   : > { %5691 = vmatmul.mubr.msk.f32.gmra.mxu1 %vm256_vm2, %v399_v62  ;;  %326 = vst.msk [vmem:[#allocation2 + $0x128] sm:$0xff] %vm256_vm2, %v294_v28  ;;  %v6388_v32 = vld [vmem:[#allocation2 + $0x6f] sm:$0xff]  ;;  %v6396_v34 = vld [vmem:[#allocation2 + $0x77] sm:$0xff]  ;;  %v6398_v36 = vld [vmem:[#allocation2 + $0x7f] sm:$0xff]  ;;  %s4900_s28 = sshll.u32 %s6156_s27, 4  ;;  %s4901_s28 = int_to_ptr.vmem [resolvable:$true] %s4900_s28 }
  0x3e   : > { %5693 = vmatprep.mubr.msk.f32.mxu1 %vm256_vm2, %v400_v0  ;;  %v350_v33 = vld [vmem:[#allocation2 + $0x75] sm:$0xff]  ;;  %v351_v35 = vld [vmem:[#allocation2 + $0x7d] sm:$0xff]  ;;  %v352_v37 = vld [vmem:[#allocation2 + $0x85] sm:$0xff]  ;;  %s6118_s29 = scalar_lea.vmem %s4901_s28, 32  ;;  %p6125_p11 = scmp.lt.s32.totalorder %s4901_s28, %s4901_s28 }
  0x3f   : > { %5670 = vmatmul.mubr.msk.f32.gmra.mxu0 %vm256_vm2, %v385_v1  ;;  %v6406_v38 = vld [vmem:[#allocation2 + $0x87] sm:$0xff]  ;;  %v6408_v40 = vld [vmem:[#allocation2 + $0x8f] sm:$0xff]  ;;  %v6416_v42 = vld [vmem:[#allocation2 + $0x97] sm:$0xff]  ;;  %p6119_p8 = scmp.ne.s32.totalorder %s4901_s28, %s6118_s29  ;;  %p6126_p12 = scmp.lt.s32.totalorder %s6118_s29, %s6118_s29 }
  0x40   : > { %5672 = vmatprep.mubr.msk.f32.mxu0 %vm256_vm2, %v386_v3  ;;  %v353_v39 = vld [vmem:[#allocation2 + $0x8d] sm:$0xff]  ;;  %v354_v41 = vld [vmem:[#allocation2 + $0x95] sm:$0xff]  ;;  %v355_v43 = vld [vmem:[#allocation2 + $0x9d] sm:$0xff] }
  0x41   : > { %5694 = vmatmul.mubr.msk.f32.gmra.mxu1 %vm256_vm2, %v401_v2  ;;  %v6418_v44 = vld [vmem:[#allocation2 + $0x9f] sm:$0xff]  ;;  %v6426_v46 = vld [vmem:[#allocation2 + $0xa7] sm:$0xff]  ;;  %v6428_v48 = vld [vmem:[#allocation2 + $0xaf] sm:$0xff]  ;;  %p6120_p9 = pnand %p6119_p8, %p6105_p7  ;;  %p6127_p13 = por %p6126_p12, %p6125_p11 }
  0x42   : > { %5696 = vmatprep.mubr.msk.f32.mxu1 %vm256_vm2, %v402_v4  ;;  %v356_v45 = vld [vmem:[#allocation2 + $0xa5] sm:$0xff]  ;;  %v357_v47 = vld [vmem:[#allocation2 + $0xad] sm:$0xff]  ;;  %v358_v49 = vld [vmem:[#allocation2 + $0xb5] sm:$0xff] }
  0x43   : > { %5673 = vmatmul.mubr.msk.f32.gmra.mxu0 %vm256_vm2, %v387_v5  ;;  %v6436_v50 = vld [vmem:[#allocation2 + $0xb7] sm:$0xff]  ;;  %v6438_v52 = vld [vmem:[#allocation2 + $0xbf] sm:$0xff]  ;;  %v6446_v54 = vld [vmem:[#allocation2 + $0xc7] sm:$0xff]  ;;  %p6121_p10 = pneg %p6120_p9 }
  0x44   : > { %5751 = vmatprep.mubr.msk.f32.mxu0 %vm256_vm2, %v1055_v8  ;;  %v359_v51 = vld [vmem:[#allocation2 + $0xbd] sm:$0xff]  ;;  %v361_v55 = vld [vmem:[#allocation2 + $0xcd] sm:$0xff]  ;;  %v362_v57 = vld [vmem:[#allocation2 + $0xd5] sm:$0xff] }
  0x45   : > { %5697 = vmatmul.mubr.msk.f32.gmra.mxu1 %vm256_vm2, %v403_v6  ;;  %v6456_v58 = vld [vmem:[#allocation2 + $0xd7] sm:$0xff]  ;;  %v6458_v60 = vld [vmem:[#allocation2 + $0xdf] sm:$0xff]  ;;  %v6466_v62 = vld [vmem:[#allocation2 + $0xe7] sm:$0xff]  ;;  %p6128_p0 = pnand %p6127_p13, %p6121_p10 }
  0x46   : > { %5701 = vmatprep.mubr.msk.f32.mxu1 %vm256_vm2, %v339_v7  ;;  %v363_v59 = vld [vmem:[#allocation2 + $0xdd] sm:$0xff]  ;;  %v364_v61 = vld [vmem:[#allocation2 + $0xe5] sm:$0xff]  ;;  %v365_v63 = vld [vmem:[#allocation2 + $0xed] sm:$0xff] }
  0x47   : > { %5752 = vmatmul.mubr.msk.f32.vlgmr.msra.gmra.mxu0 %vm256_vm2, %v1056_v10  ;;  %v6468_v0 = vld [vmem:[#allocation2 + $0xef] sm:$0xff]  ;;  %v327_v1 = vld [vmem:[%s6204_s5] sm:$0xff]  ;;  %v6478_v3 = vld [vmem:[#allocation2 + $0xf7] sm:$0xff] }
  0x48   : > { %5850 = vmatpush3.msk.msra.mxu0 %vm502_vm1, %v5109_v56  ;;  %5754 = vmatprep.mubr.msk.f32.mxu0 %vm256_vm2, %v6329_v12  ;;  %v6448_v56 = vld [vmem:[#allocation2 + $0xcf] sm:$0xff]  ;;  %333 = vst.msk [vmem:[#allocation2 + $0x130] sm:$0xff] %vm256_vm2, %v327_v1  ;;  %v367_v4 = vld [vmem:[#allocation2 + $0xfd] sm:$0xff]  ;;  %v368_v8 = vld [vmem:[#allocation2 + $0x105] sm:$0xff] }
  0x49   : > { %5702 = vmatmul.mubr.msk.f32.vlgmr.msra.gmra.mxu1 %vm256_vm2, %v340_v9  ;;  %5949 = vmatprep.subr.msk.mxu0 %vm502_vm1, %v6350_v18  ;;  %v366_v2 = vld [vmem:[#allocation2 + $0xf5] sm:$0xff]  ;;  %v6480_v5 = vld [vmem:[#allocation2 + $0xff] sm:$0xff]  ;;  %v328_v6 = vld [vmem:[%s6204_s5 + $0x8] sm:$0xff] }
  0x4a   : > { %5800 = vmatpush3.msk.msra.mxu1 %vm502_vm1, %v5075_v53  ;;  %5704 = vmatprep.mubr.msk.f32.mxu1 %vm256_vm2, %v341_v11  ;;  %v360_v53 = vld [vmem:[#allocation2 + $0xc5] sm:$0xff]  ;;  %334 = vst.msk [vmem:[#allocation2 + $0x138] sm:$0xff] %vm256_vm2, %v328_v6  ;;  %v329_v7 = vld [vmem:[%s6204_s5 + $0x10] sm:$0xff]  ;;  %v6521_v27 = vld [vmem:[%s8923_s3 + $0x20] sm:$0xf] }
  0x4b   : > { %5899 = vmatprep.subr.msk.mxu1 %vm502_vm1, %v6345_v17  ;;  %5755 = vmatmul.mubr.msk.f32.gmra.mxu0 %vm256_vm2, %v6335_v14  ;;  %335 = vst.msk [vmem:[#allocation2 + $0x140] sm:$0xff] %vm256_vm2, %v329_v7  ;;  %v6492_v9 = vld [vmem:[#allocation2 + $0x107] sm:$0xff]  ;;  %v6494_v11 = vld [vmem:[#allocation2 + $0x10f] sm:$0xff] }
  0x4c   : > { %5757 = vmatprep.mubr.msk.f32.mxu0 %vm256_vm2, %v6340_v16  ;;  %v369_v10 = vld [vmem:[#allocation2 + $0x10d] sm:$0xff] }
  0x4d   : > { %5705 = vmatmul.mubr.msk.f32.gmra.mxu1 %vm256_vm2, %v342_v13  ;;  %v370_v13 = vld [vmem:[#allocation2 + $0x115] sm:$0xff]  ;;  %v2628_v1 = vld [vmem:[#allocation2 + $0xa9] sm:$0xff] }
  0x4e   : > { %5707 = vmatprep.mubr.msk.f32.mxu1 %vm256_vm2, %v343_v15  ;;  %v6502_v15 = vld [vmem:[#allocation2 + $0x117] sm:$0xff] }
  0x4f   : > { %5758 = vmatmul.mubr.msk.f32.gmra.mxu0 %vm256_vm2, %v6362_v20  ;;  %v1847_v28 = vld [vmem:[#allocation2 + $0x90] sm:$0xff] }
  0x50   : > { %5760 = vmatprep.mubr.msk.f32.mxu0 %vm256_vm2, %v6364_v22  ;;  %v2633_v6 = vld [vmem:[#allocation2 + $0xd1] sm:$0xff] }
  0x51   : > { %5708 = vmatmul.mubr.msk.f32.gmra.mxu1 %vm256_vm2, %v344_v19  ;;  %v1835_v19 = vld [vmem:[#allocation2 + $0x30] sm:$0xff] }
  0x52   : > { %5710 = vmatprep.mubr.msk.f32.mxu1 %vm256_vm2, %v345_v21  ;;  %v1836_v21 = vld [vmem:[#allocation2 + $0x38] sm:$0xff] }
  0x53   : > { %5761 = vmatmul.mubr.msk.f32.gmra.mxu0 %vm256_vm2, %v6372_v24 }
  0x54   : > { %5763 = vmatprep.mubr.msk.f32.mxu0 %vm256_vm2, %v6374_v26 }
  0x55   : > { %5711 = vmatmul.mubr.msk.f32.gmra.mxu1 %vm256_vm2, %v346_v23  ;;  %v1837_v23 = vld [vmem:[#allocation2 + $0x40] sm:$0xff] }
  0x56   : > { %5713 = vmatprep.mubr.msk.f32.mxu1 %vm256_vm2, %v347_v25  ;;  %v6516_v25 = vld [vmem:[%s8923_s3 + $0x1c] sm:$0xf] }
  0x57   : > { %5764 = vmatmul.mubr.msk.f32.gmra.mxu0 %vm256_vm2, %v6384_v30 }
  0x58   : > { %5766 = vmatprep.mubr.msk.f32.mxu0 %vm256_vm2, %v6388_v32 }
  0x59   : > { %5714 = vmatmul.mubr.msk.f32.gmra.mxu1 %vm256_vm2, %v348_v29  ;;  %v1848_v29 = vld [vmem:[#allocation2 + $0x98] sm:$0xff] }
  0x5a   : > { %5716 = vmatprep.mubr.msk.f32.mxu1 %vm256_vm2, %v349_v31  ;;  %v1850_v31 = vld [vmem:[#allocation2 + $0xa8] sm:$0xff] }
  0x5b   : > { %5767 = vmatmul.mubr.msk.f32.gmra.mxu0 %vm256_vm2, %v6396_v34 }
  0x5c   : > { %5769 = vmatprep.mubr.msk.f32.mxu0 %vm256_vm2, %v6398_v36 }
  0x5d   : > { %5717 = vmatmul.mubr.msk.f32.gmra.mxu1 %vm256_vm2, %v350_v33  ;;  %v1852_v33 = vld [vmem:[#allocation2 + $0xb8] sm:$0xff] }
  0x5e   : > { %5719 = vmatprep.mubr.msk.f32.mxu1 %vm256_vm2, %v351_v35  ;;  %v1854_v35 = vld [vmem:[#allocation2 + $0xc8] sm:$0xff] }
  0x5f   : > { %5770 = vmatmul.mubr.msk.f32.gmra.mxu0 %vm256_vm2, %v6406_v38 }
  0x60   : > { %5772 = vmatprep.mubr.msk.f32.mxu0 %vm256_vm2, %v6408_v40 }
  0x61   : > { %5720 = vmatmul.mubr.msk.f32.gmra.mxu1 %vm256_vm2, %v352_v37  ;;  %v1856_v37 = vld [vmem:[#allocation2 + $0xd8] sm:$0xff] }
  0x62   : > { %5722 = vmatprep.mubr.msk.f32.mxu1 %vm256_vm2, %v353_v39  ;;  %v1858_v39 = vld [vmem:[#allocation2 + $0xe8] sm:$0xff] }
  0x63   : > { %5773 = vmatmul.mubr.msk.f32.gmra.mxu0 %vm256_vm2, %v6416_v42 }
  0x64   : > { %5775 = vmatprep.mubr.msk.f32.mxu0 %vm256_vm2, %v6418_v44 }
  0x65   : > { %5723 = vmatmul.mubr.msk.f32.gmra.mxu1 %vm256_vm2, %v354_v41  ;;  %v1860_v41 = vld [vmem:[#allocation2 + $0xf8] sm:$0xff] }
  0x66   : > { %5725 = vmatprep.mubr.msk.f32.mxu1 %vm256_vm2, %v355_v43  ;;  %v1862_v43 = vld [vmem:[#allocation2 + $0x108] sm:$0xff] }
  0x67   : > { %5776 = vmatmul.mubr.msk.f32.gmra.mxu0 %vm256_vm2, %v6426_v46 }
  0x68   : > { %5778 = vmatprep.mubr.msk.f32.mxu0 %vm256_vm2, %v6428_v48 }
  0x69   : > { %5726 = vmatmul.mubr.msk.f32.gmra.mxu1 %vm256_vm2, %v356_v45  ;;  %v1864_v45 = vld [vmem:[#allocation2 + $0x118] sm:$0xff] }
  0x6a   : > { %5728 = vmatprep.mubr.msk.f32.mxu1 %vm256_vm2, %v357_v47  ;;  %v1865_v47 = vld [vmem:[#allocation2 + $0x120] sm:$0xff] }
  0x6b   : > { %5779 = vmatmul.mubr.msk.f32.gmra.mxu0 %vm256_vm2, %v6436_v50 }
  0x6c   : > { %5781 = vmatprep.mubr.msk.f32.mxu0 %vm256_vm2, %v6438_v52 }
  0x6d   : > { %5729 = vmatmul.mubr.msk.f32.gmra.mxu1 %vm256_vm2, %v358_v49  ;;  %v1866_v49 = vld [vmem:[#allocation2 + $0x128] sm:$0xff] }
  0x6e   : > { %5731 = vmatprep.mubr.msk.f32.mxu1 %vm256_vm2, %v359_v51  ;;  %v2615_v51 = vld [vmem:[#allocation2 + $0x41] sm:$0xff] }
  0x6f   : > { %5782 = vmatmul.mubr.msk.f32.gmra.mxu0 %vm256_vm2, %v6446_v54 }
  0x70   : > { %5784 = vmatprep.mubr.msk.f32.mxu0 %vm256_vm2, %v6448_v56 }
  0x71   : > { %5732 = vmatmul.mubr.msk.f32.gmra.mxu1 %vm256_vm2, %v360_v53  ;;  %v2616_v53 = vld [vmem:[#allocation2 + $0x49] sm:$0xff] }
  0x72   : > { %5734 = vmatprep.mubr.msk.f32.mxu1 %vm256_vm2, %v361_v55  ;;  %v2618_v55 = vld [vmem:[#allocation2 + $0x59] sm:$0xff] }
  0x73   : > { %5785 = vmatmul.mubr.msk.f32.gmra.mxu0 %vm256_vm2, %v6456_v58 }
  0x74   : > { %5787 = vmatprep.mubr.msk.f32.mxu0 %vm256_vm2, %v6458_v60 }
  0x75   : > { %5735 = vmatmul.mubr.msk.f32.gmra.mxu1 %vm256_vm2, %v362_v57  ;;  %v2620_v57 = vld [vmem:[#allocation2 + $0x69] sm:$0xff] }
  0x76   : > { %5737 = vmatprep.mubr.msk.f32.mxu1 %vm256_vm2, %v363_v59  ;;  %v2622_v59 = vld [vmem:[#allocation2 + $0x79] sm:$0xff] }
  0x77   : > { %5788 = vmatmul.mubr.msk.f32.gmra.mxu0 %vm256_vm2, %v6466_v62 }
  0x78   : > { %5790 = vmatprep.mubr.msk.f32.mxu0 %vm256_vm2, %v6468_v0 }
  0x79   : > { %5738 = vmatmul.mubr.msk.f32.gmra.mxu1 %vm256_vm2, %v364_v61  ;;  %v2624_v61 = vld [vmem:[#allocation2 + $0x89] sm:$0xff] }
  0x7a   : > { %5740 = vmatprep.mubr.msk.f32.mxu1 %vm256_vm2, %v365_v63  ;;  %v2626_v63 = vld [vmem:[#allocation2 + $0x99] sm:$0xff] }
  0x7b   : > { %5791 = vmatmul.mubr.msk.f32.gmra.mxu0 %vm256_vm2, %v6478_v3 }
  0x7c   : > { %5793 = vmatprep.mubr.msk.f32.mxu0 %vm256_vm2, %v6480_v5 }
  0x7d   : > { %5741 = vmatmul.mubr.msk.f32.gmra.mxu1 %vm256_vm2, %v366_v2  ;;  %v2629_v2 = vld [vmem:[#allocation2 + $0xb1] sm:$0xff] }
  0x7e   : > { %5743 = vmatprep.mubr.msk.f32.mxu1 %vm256_vm2, %v367_v4  ;;  %v2631_v4 = vld [vmem:[#allocation2 + $0xc1] sm:$0xff] }
  0x7f   : > { %5794 = vmatmul.mubr.msk.f32.gmra.mxu0 %vm256_vm2, %v6492_v9 }
  0x80   : > { %5796 = vmatprep.mubr.msk.f32.mxu0 %vm256_vm2, %v6494_v11 }
  0x81   : > { %5744 = vmatmul.mubr.msk.f32.gmra.mxu1 %vm256_vm2, %v368_v8 }
  0x82   : > { %5746 = vmatprep.mubr.msk.f32.mxu1 %vm256_vm2, %v369_v10 }
  0x83   : > { %5797 = vmatmul.mubr.msk.f32.gmra.mxu0 %vm256_vm2, %v6502_v15 }
  0x84   : > { %5851 = vmatprep.mubr.msk.f32.mxu0 %vm256_vm2, %v1835_v19 }
  0x85   : > { %5747 = vmatmul.mubr.msk.f32.gmra.mxu1 %vm256_vm2, %v370_v13  ;;  %v2635_v13 = vld [vmem:[#allocation2 + $0xe1] sm:$0xff] }
  0x86   : > { %5801 = vmatprep.mubr.msk.f32.mxu1 %vm256_vm2, %v6329_v12  ;;  %v1838_v12 = vld [vmem:[#allocation2 + $0x48] sm:$0xff] }
  0x87   : > { %5852 = vmatmul.mubr.msk.f32.vlgmr.msra.gmra.mxu0 %vm256_vm2, %v1836_v21  ;;  %v2636_v21 = vld [vmem:[#allocation2 + $0xe9] sm:$0xff] }
  0x88   : > { %5950 = vmatpush3.msk.msra.mxu0 %vm502_vm1, %v6350_v18  ;;  %5854 = vmatprep.mubr.msk.f32.mxu0 %vm256_vm2, %v1837_v23  ;;  %v1842_v18 = vld [vmem:[#allocation2 + $0x68] sm:$0xff] }
  0x89   : > { %5802 = vmatmul.mubr.msk.f32.vlgmr.msra.gmra.mxu1 %vm256_vm2, %v6335_v14  ;;  %v1839_v14 = vld [vmem:[#allocation2 + $0x50] sm:$0xff]  ;;  %6049 = vmatprep.subr.msk.mxu0 %vm502_vm1, %v6521_v27 }
  0x8a   : > { %5900 = vmatpush3.msk.msra.mxu1 %vm502_vm1, %v6345_v17  ;;  %5804 = vmatprep.mubr.msk.f32.mxu1 %vm256_vm2, %v6340_v16  ;;  %v1840_v16 = vld [vmem:[#allocation2 + $0x58] sm:$0xff]  ;;  %v1841_v17 = vld [vmem:[#allocation2 + $0x60] sm:$0xff] }
  0x8b   : > { %5999 = vmatprep.subr.msk.mxu1 %vm502_vm1, %v6516_v25  ;;  %5855 = vmatmul.mubr.msk.f32.gmra.mxu0 %vm256_vm2, %v1838_v12 }
  0x8c   : > { %5857 = vmatprep.mubr.msk.f32.mxu0 %vm256_vm2, %v1839_v14 }
  0x8d   : > { %5805 = vmatmul.mubr.msk.f32.gmra.mxu1 %vm256_vm2, %v6362_v20  ;;  %v1843_v20 = vld [vmem:[#allocation2 + $0x70] sm:$0xff] }
  0x8e   : > { %5807 = vmatprep.mubr.msk.f32.mxu1 %vm256_vm2, %v6364_v22  ;;  %v1844_v22 = vld [vmem:[#allocation2 + $0x78] sm:$0xff] }
  0x8f   : > { %5858 = vmatmul.mubr.msk.f32.gmra.mxu0 %vm256_vm2, %v1840_v16  ;;  %v2638_v16 = vld [vmem:[#allocation2 + $0xf9] sm:$0xff] }
  0x90   : > { %5860 = vmatprep.mubr.msk.f32.mxu0 %vm256_vm2, %v1841_v17 }
  0x91   : > { %5808 = vmatmul.mubr.msk.f32.gmra.mxu1 %vm256_vm2, %v6372_v24  ;;  %v1845_v24 = vld [vmem:[#allocation2 + $0x80] sm:$0xff] }
  0x92   : > { %5810 = vmatprep.mubr.msk.f32.mxu1 %vm256_vm2, %v6374_v26  ;;  %v1846_v26 = vld [vmem:[#allocation2 + $0x88] sm:$0xff] }
  0x93   : > { %5861 = vmatmul.mubr.msk.f32.gmra.mxu0 %vm256_vm2, %v1842_v18 }
  0x94   : > { %5863 = vmatprep.mubr.msk.f32.mxu0 %vm256_vm2, %v1843_v20  ;;  %v2639_v20 = vld [vmem:[#allocation2 + $0x101] sm:$0xff] }
  0x95   : > { %5811 = vmatmul.mubr.msk.f32.gmra.mxu1 %vm256_vm2, %v6384_v30  ;;  %v1849_v30 = vld [vmem:[#allocation2 + $0xa0] sm:$0xff] }
  0x96   : > { %5813 = vmatprep.mubr.msk.f32.mxu1 %vm256_vm2, %v6388_v32  ;;  %v1851_v32 = vld [vmem:[#allocation2 + $0xb0] sm:$0xff] }
  0x97   : > { %5864 = vmatmul.mubr.msk.f32.gmra.mxu0 %vm256_vm2, %v1844_v22 }
  0x98   : > { %5866 = vmatprep.mubr.msk.f32.mxu0 %vm256_vm2, %v1845_v24 }
  0x99   : > { %5814 = vmatmul.mubr.msk.f32.gmra.mxu1 %vm256_vm2, %v6396_v34  ;;  %v1853_v34 = vld [vmem:[#allocation2 + $0xc0] sm:$0xff] }
  0x9a   : > { %5816 = vmatprep.mubr.msk.f32.mxu1 %vm256_vm2, %v6398_v36  ;;  %v1855_v36 = vld [vmem:[#allocation2 + $0xd0] sm:$0xff] }
  0x9b   : > { %5867 = vmatmul.mubr.msk.f32.gmra.mxu0 %vm256_vm2, %v1846_v26  ;;  %v2640_v26 = vld [vmem:[#allocation2 + $0x109] sm:$0xff] }
  0x9c   : > { %5869 = vmatprep.mubr.msk.f32.mxu0 %vm256_vm2, %v1847_v28 }
  0x9d   : > { %5817 = vmatmul.mubr.msk.f32.gmra.mxu1 %vm256_vm2, %v6406_v38  ;;  %v1857_v38 = vld [vmem:[#allocation2 + $0xe0] sm:$0xff] }
  0x9e   : > { %5819 = vmatprep.mubr.msk.f32.mxu1 %vm256_vm2, %v6408_v40  ;;  %v1859_v40 = vld [vmem:[#allocation2 + $0xf0] sm:$0xff] }
  0x9f   : > { %5870 = vmatmul.mubr.msk.f32.gmra.mxu0 %vm256_vm2, %v1848_v29 }
  0xa0   : > { %5872 = vmatprep.mubr.msk.f32.mxu0 %vm256_vm2, %v1849_v30  ;;  %v2641_v30 = vld [vmem:[#allocation2 + $0x111] sm:$0xff] }
  0xa1   : > { %5820 = vmatmul.mubr.msk.f32.gmra.mxu1 %vm256_vm2, %v6416_v42  ;;  %v1861_v42 = vld [vmem:[#allocation2 + $0x100] sm:$0xff] }
  0xa2   : > { %5822 = vmatprep.mubr.msk.f32.mxu1 %vm256_vm2, %v6418_v44  ;;  %v1863_v44 = vld [vmem:[#allocation2 + $0x110] sm:$0xff] }
  0xa3   : > { %5873 = vmatmul.mubr.msk.f32.gmra.mxu0 %vm256_vm2, %v1850_v31 }
  0xa4   : > { %5875 = vmatprep.mubr.msk.f32.mxu0 %vm256_vm2, %v1851_v32 }
  0xa5   : > { %5823 = vmatmul.mubr.msk.f32.gmra.mxu1 %vm256_vm2, %v6426_v46  ;;  %v1475_v46 = vld [vmem:[#allocation2 + $0x11f] sm:$0xff] }
  0xa6   : > { %5825 = vmatprep.mubr.msk.f32.mxu1 %vm256_vm2, %v6428_v48  ;;  %v1476_v48 = vld [vmem:[#allocation2 + $0x127] sm:$0xff] }
  0xa7   : > { %5876 = vmatmul.mubr.msk.f32.gmra.mxu0 %vm256_vm2, %v1852_v33  ;;  %v2642_v33 = vld [vmem:[#allocation2 + $0x119] sm:$0xff] }
  0xa8   : > { %5878 = vmatprep.mubr.msk.f32.mxu0 %vm256_vm2, %v1853_v34 }
  0xa9   : > { %5826 = vmatmul.mubr.msk.f32.gmra.mxu1 %vm256_vm2, %v6436_v50  ;;  %v2225_v50 = vld [vmem:[#allocation2 + $0x31] sm:$0xff] }
  0xaa   : > { %5828 = vmatprep.mubr.msk.f32.mxu1 %vm256_vm2, %v6438_v52  ;;  %v2226_v52 = vld [vmem:[#allocation2 + $0x39] sm:$0xff] }
  0xab   : > { %5879 = vmatmul.mubr.msk.f32.gmra.mxu0 %vm256_vm2, %v1854_v35 }
  0xac   : > { %5881 = vmatprep.mubr.msk.f32.mxu0 %vm256_vm2, %v1855_v36  ;;  %v2643_v36 = vld [vmem:[#allocation2 + $0x121] sm:$0xff] }
  0xad   : > { %5829 = vmatmul.mubr.msk.f32.gmra.mxu1 %vm256_vm2, %v6446_v54  ;;  %v2617_v54 = vld [vmem:[#allocation2 + $0x51] sm:$0xff] }
  0xae   : > { %5831 = vmatprep.mubr.msk.f32.mxu1 %vm256_vm2, %v6448_v56  ;;  %v2619_v56 = vld [vmem:[#allocation2 + $0x61] sm:$0xff] }
  0xaf   : > { %5882 = vmatmul.mubr.msk.f32.gmra.mxu0 %vm256_vm2, %v1856_v37 }
  0xb0   : > { %5884 = vmatprep.mubr.msk.f32.mxu0 %vm256_vm2, %v1857_v38 }
  0xb1   : > { %5832 = vmatmul.mubr.msk.f32.gmra.mxu1 %vm256_vm2, %v6456_v58  ;;  %v2621_v58 = vld [vmem:[#allocation2 + $0x71] sm:$0xff] }
  0xb2   : > { %5834 = vmatprep.mubr.msk.f32.mxu1 %vm256_vm2, %v6458_v60  ;;  %v2623_v60 = vld [vmem:[#allocation2 + $0x81] sm:$0xff] }
  0xb3   : > { %5885 = vmatmul.mubr.msk.f32.gmra.mxu0 %vm256_vm2, %v1858_v39  ;;  %v2644_v39 = vld [vmem:[#allocation2 + $0x129] sm:$0xff] }
  0xb4   : > { %5887 = vmatprep.mubr.msk.f32.mxu0 %vm256_vm2, %v1859_v40 }
  0xb5   : > { %5835 = vmatmul.mubr.msk.f32.gmra.mxu1 %vm256_vm2, %v6466_v62  ;;  %v2625_v62 = vld [vmem:[#allocation2 + $0x91] sm:$0xff] }
  0xb6   : > { %5837 = vmatprep.mubr.msk.f32.mxu1 %vm256_vm2, %v6468_v0  ;;  %v2627_v0 = vld [vmem:[#allocation2 + $0xa1] sm:$0xff] }
  0xb7   : > { %5888 = vmatmul.mubr.msk.f32.gmra.mxu0 %vm256_vm2, %v1860_v41 }
  0xb8   : > { %5890 = vmatprep.mubr.msk.f32.mxu0 %vm256_vm2, %v1861_v42  ;;  %v2645_v42 = vld [vmem:[#allocation2 + $0x131] sm:$0xff] }
  0xb9   : > { %5838 = vmatmul.mubr.msk.f32.gmra.mxu1 %vm256_vm2, %v6478_v3  ;;  %v2630_v3 = vld [vmem:[#allocation2 + $0xb9] sm:$0xff] }
  0xba   : > { %5840 = vmatprep.mubr.msk.f32.mxu1 %vm256_vm2, %v6480_v5  ;;  %v2632_v5 = vld [vmem:[#allocation2 + $0xc9] sm:$0xff] }
  0xbb   : > { %5891 = vmatmul.mubr.msk.f32.gmra.mxu0 %vm256_vm2, %v1862_v43 }
  0xbc   : > { %5893 = vmatprep.mubr.msk.f32.mxu0 %vm256_vm2, %v1863_v44 }
  0xbd   : > { %5841 = vmatmul.mubr.msk.f32.gmra.mxu1 %vm256_vm2, %v6492_v9  ;;  %v2634_v9 = vld [vmem:[#allocation2 + $0xd9] sm:$0xff] }
  0xbe   : > { %5843 = vmatprep.mubr.msk.f32.mxu1 %vm256_vm2, %v6494_v11 }
  0xbf   : > { %5894 = vmatmul.mubr.msk.f32.gmra.mxu0 %vm256_vm2, %v1864_v45  ;;  %v2646_v45 = vld [vmem:[#allocation2 + $0x139] sm:$0xff] }
  0xc0   : > { %5896 = vmatprep.mubr.msk.f32.mxu0 %vm256_vm2, %v1865_v47 }
  0xc1   : > { %5844 = vmatmul.mubr.msk.f32.gmra.mxu1 %vm256_vm2, %v6502_v15 }
  0xc2   : > { %5846 = vmatprep.mubr.msk.f32.mxu1 %vm256_vm2, %v1475_v46 }
  0xc3   : > { %5897 = vmatmul.mubr.msk.f32.gmra.mxu0 %vm256_vm2, %v1866_v49  ;;  %v3395_v49 = vld [vmem:[#allocation2 + $0x43] sm:$0xff] }
  0xc4   : > { %5951 = vmatprep.mubr.msk.f32.mxu0 %vm256_vm2, %v2615_v51 }
  0xc5   : > { %5847 = vmatmul.mubr.msk.f32.gmra.mxu1 %vm256_vm2, %v1476_v48  ;;  %v3005_v48 = vld [vmem:[#allocation2 + $0x42] sm:$0xff] }
  0xc6   : > { %5901 = vmatprep.mubr.msk.f32.mxu1 %vm256_vm2, %v2225_v50 }
  0xc7   : > { %5952 = vmatmul.mubr.msk.f32.vlgmr.msra.gmra.mxu0 %vm256_vm2, %v2616_v53 }
  0xc8   : > { %6050 = vmatpush3.msk.msra.mxu0 %vm502_vm1, %v6521_v27  ;;  %5954 = vmatprep.mubr.msk.f32.mxu0 %vm256_vm2, %v2617_v54  ;;  %v2637_v27 = vld [vmem:[#allocation2 + $0xf1] sm:$0xff] }
  0xc9   : > { %5902 = vmatmul.mubr.msk.f32.vlgmr.msra.gmra.mxu1 %vm256_vm2, %v2226_v52  ;;  %v3006_v52 = vld [vmem:[#allocation2 + $0x4a] sm:$0xff] }
  0xca   : > { %6000 = vmatpush3.msk.msra.mxu1 %vm502_vm1, %v6516_v25  ;;  %5904 = vmatprep.mubr.msk.f32.mxu1 %vm256_vm2, %v2615_v51 }
  0xcb   : > { %5955 = vmatmul.mubr.msk.f32.gmra.mxu0 %vm256_vm2, %v2618_v55 }
  0xcc   : > { %5957 = vmatprep.mubr.msk.f32.mxu0 %vm256_vm2, %v2619_v56 }
  0xcd   : > { %5905 = vmatmul.mubr.msk.f32.gmra.mxu1 %vm256_vm2, %v2616_v53  ;;  %v3396_v53 = vld [vmem:[#allocation2 + $0x4b] sm:$0xff] }
  0xce   : > { %5907 = vmatprep.mubr.msk.f32.mxu1 %vm256_vm2, %v2617_v54 }
  0xcf   : > { %5958 = vmatmul.mubr.msk.f32.gmra.mxu0 %vm256_vm2, %v2620_v57 }
  0xd0   : > { %5960 = vmatprep.mubr.msk.f32.mxu0 %vm256_vm2, %v2621_v58 }
  0xd1   : > { %5908 = vmatmul.mubr.msk.f32.gmra.mxu1 %vm256_vm2, %v2618_v55 }
  0xd2   : > { %5910 = vmatprep.mubr.msk.f32.mxu1 %vm256_vm2, %v2619_v56  ;;  %v3007_v56 = vld [vmem:[#allocation2 + $0x52] sm:$0xff] }
  0xd3   : > { %5961 = vmatmul.mubr.msk.f32.gmra.mxu0 %vm256_vm2, %v2622_v59 }
  0xd4   : > { %5963 = vmatprep.mubr.msk.f32.mxu0 %vm256_vm2, %v2623_v60 }
  0xd5   : > { %5911 = vmatmul.mubr.msk.f32.gmra.mxu1 %vm256_vm2, %v2620_v57  ;;  %v3397_v57 = vld [vmem:[#allocation2 + $0x53] sm:$0xff] }
  0xd6   : > { %5913 = vmatprep.mubr.msk.f32.mxu1 %vm256_vm2, %v2621_v58 }
  0xd7   : > { %5964 = vmatmul.mubr.msk.f32.gmra.mxu0 %vm256_vm2, %v2624_v61 }
  0xd8   : > { %5966 = vmatprep.mubr.msk.f32.mxu0 %vm256_vm2, %v2625_v62 }
  0xd9   : > { %5914 = vmatmul.mubr.msk.f32.gmra.mxu1 %vm256_vm2, %v2622_v59 }
  0xda   : > { %5916 = vmatprep.mubr.msk.f32.mxu1 %vm256_vm2, %v2623_v60 }
  0xdb   : > { %5967 = vmatmul.mubr.msk.f32.gmra.mxu0 %vm256_vm2, %v2626_v63 }
  0xdc   : > { %5969 = vmatprep.mubr.msk.f32.mxu0 %vm256_vm2, %v2627_v0 }
  0xdd   : > { %5917 = vmatmul.mubr.msk.f32.gmra.mxu1 %vm256_vm2, %v2624_v61  ;;  %v3008_v61 = vld [vmem:[#allocation2 + $0x5a] sm:$0xff] }
  0xde   : > { %5919 = vmatprep.mubr.msk.f32.mxu1 %vm256_vm2, %v2625_v62  ;;  %v3398_v62 = vld [vmem:[#allocation2 + $0x5b] sm:$0xff] }
  0xdf   : > { %5970 = vmatmul.mubr.msk.f32.gmra.mxu0 %vm256_vm2, %v2628_v1 }
  0xe0   : > { %5972 = vmatprep.mubr.msk.f32.mxu0 %vm256_vm2, %v2629_v2 }
  0xe1   : > { %5920 = vmatmul.mubr.msk.f32.gmra.mxu1 %vm256_vm2, %v2626_v63 }
  0xe2   : > { %5922 = vmatprep.mubr.msk.f32.mxu1 %vm256_vm2, %v2627_v0 }
  0xe3   : > { %5973 = vmatmul.mubr.msk.f32.gmra.mxu0 %vm256_vm2, %v2630_v3 }
  0xe4   : > { %5975 = vmatprep.mubr.msk.f32.mxu0 %vm256_vm2, %v2631_v4 }
  0xe5   : > { %5923 = vmatmul.mubr.msk.f32.gmra.mxu1 %vm256_vm2, %v2628_v1  ;;  %v3009_v1 = vld [vmem:[#allocation2 + $0x62] sm:$0xff] }
  0xe6   : > { %5925 = vmatprep.mubr.msk.f32.mxu1 %vm256_vm2, %v2629_v2  ;;  %v3399_v2 = vld [vmem:[#allocation2 + $0x63] sm:$0xff] }
  0xe7   : > { %v6657_v7 = vpop.f32.mrf.mxu0  ;;  %5976 = vmatmul.mubr.msk.f32.gmra.mxu0 %vm256_vm2, %v2632_v5 }
  0xe8   : > { %5978 = vmatprep.mubr.msk.f32.mxu0 %vm256_vm2, %v2633_v6 }
  0xe9   : > { %v6659_v8 = vpop.f32.mrf.mxu1  ;;  %5926 = vmatmul.mubr.msk.f32.gmra.mxu1 %vm256_vm2, %v2630_v3  ;;  %v6665_v10 = vpop.f32.mrf.mxu0 }
  0xea   : > { %5928 = vmatprep.mubr.msk.f32.mxu1 %vm256_vm2, %v2631_v4 }
  0xeb   : > { %v6667_v11 = vpop.f32.mrf.mxu1  ;;  %v6669_v15 = vpop.f32.mrf.mxu0  ;;  %5979 = vmatmul.mubr.msk.f32.gmra.mxu0 %vm256_vm2, %v2634_v9 }
  0xec   : > { %5981 = vmatprep.mubr.msk.f32.mxu0 %vm256_vm2, %v2635_v13 }
  0xed   : > { %v6671_v19 = vpop.f32.mrf.mxu1  ;;  %5929 = vmatmul.mubr.msk.f32.gmra.mxu1 %vm256_vm2, %v2632_v5  ;;  %v6677_v23 = vpop.f32.mrf.mxu0 }
  0xee   : > { %5931 = vmatprep.mubr.msk.f32.mxu1 %vm256_vm2, %v2633_v6 }
  0xef   : > { %v6679_v25 = vpop.f32.mrf.mxu1  ;;  %v6681_v12 = vpop.f32.mrf.mxu0  ;;  %5982 = vmatmul.mubr.msk.f32.gmra.mxu0 %vm256_vm2, %v2636_v21 }
  0xf0   : > { %5984 = vmatprep.mubr.msk.f32.mxu0 %vm256_vm2, %v2637_v27 }
  0xf1   : > { %v6683_v14 = vpop.f32.mrf.mxu1  ;;  %5932 = vmatmul.mubr.msk.f32.gmra.mxu1 %vm256_vm2, %v2634_v9  ;;  %v6689_v17 = vpop.f32.mrf.mxu0 }
  0xf2   : > { %5934 = vmatprep.mubr.msk.f32.mxu1 %vm256_vm2, %v2635_v13  ;;  %v3010_v13 = vld [vmem:[#allocation2 + $0x6a] sm:$0xff] }
  0xf3   : > { %v6691_v18 = vpop.f32.mrf.mxu1  ;;  %v6693_v22 = vpop.f32.mrf.mxu0  ;;  %5985 = vmatmul.mubr.msk.f32.gmra.mxu0 %vm256_vm2, %v2638_v16 }
  0xf4   : > { %5987 = vmatprep.mubr.msk.f32.mxu0 %vm256_vm2, %v2639_v20 }
  0xf5   : > { %v6695_v24 = vpop.f32.mrf.mxu1  ;;  %5935 = vmatmul.mubr.msk.f32.gmra.mxu1 %vm256_vm2, %v2636_v21  ;;  %v6701_v28 = vpop.f32.mrf.mxu0  ;;  %v3400_v21 = vld [vmem:[#allocation2 + $0x6b] sm:$0xff] }
  0xf6   : > { %5937 = vmatprep.mubr.msk.f32.mxu1 %vm256_vm2, %v2637_v27 }
  0xf7   : > { %v6703_v29 = vpop.f32.mrf.mxu1  ;;  %v6705_v31 = vpop.f32.mrf.mxu0  ;;  %5988 = vmatmul.mubr.msk.f32.gmra.mxu0 %vm256_vm2, %v2640_v26 }
  0xf8   : > { %5990 = vmatprep.mubr.msk.f32.mxu0 %vm256_vm2, %v2641_v30 }
  0xf9   : > { %v6707_v32 = vpop.f32.mrf.mxu1  ;;  %5938 = vmatmul.mubr.msk.f32.gmra.mxu1 %vm256_vm2, %v2638_v16  ;;  %v6713_v34 = vpop.f32.mrf.mxu0 }
  0xfa   : > { %5940 = vmatprep.mubr.msk.f32.mxu1 %vm256_vm2, %v2639_v20  ;;  %v3011_v20 = vld [vmem:[#allocation2 + $0x72] sm:$0xff] }
  0xfb   : > { %v6715_v35 = vpop.f32.mrf.mxu1  ;;  %v6717_v37 = vpop.f32.mrf.mxu0  ;;  %5991 = vmatmul.mubr.msk.f32.gmra.mxu0 %vm256_vm2, %v2642_v33 }
  0xfc   : > { %5993 = vmatprep.mubr.msk.f32.mxu0 %vm256_vm2, %v2643_v36 }
  0xfd   : > { %v6719_v38 = vpop.f32.mrf.mxu1  ;;  %5941 = vmatmul.mubr.msk.f32.gmra.mxu1 %vm256_vm2, %v2640_v26  ;;  %v6725_v40 = vpop.f32.mrf.mxu0 }
  0xfe   : > { %5943 = vmatprep.mubr.msk.f32.mxu1 %vm256_vm2, %v2641_v30 }
  0xff   : > { %v6727_v41 = vpop.f32.mrf.mxu1  ;;  %v6729_v43 = vpop.f32.mrf.mxu0  ;;  %5994 = vmatmul.mubr.msk.f32.gmra.mxu0 %vm256_vm2, %v2644_v39 }
 0x100   : > { %5996 = vmatprep.mubr.msk.f32.mxu0 %vm256_vm2, %v2645_v42  ;;  %v3012_v42 = vld [vmem:[#allocation2 + $0x7a] sm:$0xff] }
 0x101   : > { %v6731_v44 = vpop.f32.mrf.mxu1  ;;  %5944 = vmatmul.mubr.msk.f32.gmra.mxu1 %vm256_vm2, %v2642_v33  ;;  %v6737_v46 = vpop.f32.mrf.mxu0 }
 0x102   : > { %5946 = vmatprep.mubr.msk.f32.mxu1 %vm256_vm2, %v2643_v36 }
 0x103   : > { %v6739_v47 = vpop.f32.mrf.mxu1  ;;  %v6741_v50 = vpop.f32.mrf.mxu0  ;;  %5997 = vmatmul.mubr.msk.f32.gmra.mxu0 %vm256_vm2, %v2646_v45  ;;  %v3402_v45 = vld [vmem:[#allocation2 + $0x7b] sm:$0xff] }
 0x104   : > { %6051 = vmatprep.mubr.msk.f32.mxu0 %vm256_vm2, %v3395_v49 }
 0x105   : > { %v6743_v51 = vpop.f32.mrf.mxu1  ;;  %5947 = vmatmul.mubr.msk.f32.gmra.mxu1 %vm256_vm2, %v2644_v39  ;;  %v6749_v54 = vpop.f32.mrf.mxu0 }
 0x106   : > { %6001 = vmatprep.mubr.msk.f32.mxu1 %vm256_vm2, %v3005_v48 }
 0x107   : > { %v6751_v55 = vpop.f32.mrf.mxu1  ;;  %v5753_v59 = vpop.f32.mrf.mxu0  ;;  %6052 = vmatmul.mubr.msk.f32.vlgmr.msra.gmra.mxu0 %vm256_vm2, %v3396_v53 }
 0x108   : > { %6054 = vmatprep.mubr.msk.f32.mxu0 %vm256_vm2, %v3397_v57 }
 0x109   : > { %v5703_v58 = vpop.f32.mrf.mxu1  ;;  %6002 = vmatmul.mubr.msk.f32.vlgmr.msra.gmra.mxu1 %vm256_vm2, %v3006_v52  ;;  %v1254_v0 = vpop.f32.mrf.mxu0  ;;  %v3013_v52 = vld [vmem:[#allocation2 + $0x82] sm:$0xff] }
 0x10a   : > { %v902_v60 = vadd.f32 %v5703_v58, %v6657_v7  ;;  %6004 = vmatprep.mubr.msk.f32.mxu1 %vm256_vm2, %v3007_v56 }
 0x10b   : > { %v896_v63 = vpop.f32.mrf.mxu1  ;;  %v5756_v6 = vpop.f32.mrf.mxu0  ;;  %6055 = vmatmul.mubr.msk.f32.gmra.mxu0 %vm256_vm2, %v3398_v62 }
 0x10c   : > { %v6758_v3 = vadd.f32 %v5753_v59, %v902_v60  ;;  %v897_v4 = vadd.f32 %v896_v63, %v6665_v10  ;;  %6057 = vmatprep.mubr.msk.f32.mxu0 %vm256_vm2, %v3399_v2  ;;  %v3401_v10 = vld [vmem:[#allocation2 + $0x73] sm:$0xff]  ;;  %v3014_v60 = vld [vmem:[#allocation2 + $0x8a] sm:$0xff] }
 0x10d   : > { %v5706_v5 = vpop.f32.mrf.mxu1  ;;  %6005 = vmatmul.mubr.msk.f32.gmra.mxu1 %vm256_vm2, %v3008_v61  ;;  %v1264_v16 = vpop.f32.mrf.mxu0  ;;  %v3404_v61 = vld [vmem:[#allocation2 + $0x8b] sm:$0xff] }
 0x10e   : > { %v6763_v7 = vadd.f32 %v1254_v0, %v897_v4  ;;  %v912_v9 = vadd.f32 %v5706_v5, %v6669_v15  ;;  %6007 = vmatprep.mubr.msk.f32.mxu1 %vm256_vm2, %v3009_v1  ;;  %v3015_v0 = vld [vmem:[#allocation2 + $0x92] sm:$0xff] }
 0x10f   : > { %v906_v27 = vpop.f32.mrf.mxu1  ;;  %v5759_v36 = vpop.f32.mrf.mxu0  ;;  %6058 = vmatmul.mubr.msk.f32.gmra.mxu0 %vm256_vm2, %v3400_v21 }
 0x110   : > { %v6768_v26 = vadd.f32 %v5756_v6, %v912_v9  ;;  %v907_v30 = vadd.f32 %v906_v27, %v6677_v23  ;;  %6060 = vmatprep.mubr.msk.f32.mxu0 %vm256_vm2, %v3401_v10  ;;  %v3403_v23 = vld [vmem:[#allocation2 + $0x83] sm:$0xff]  ;;  %v3016_v9 = vld [vmem:[#allocation2 + $0x9a] sm:$0xff] }
 0x111   : > { %v5709_v33 = vpop.f32.mrf.mxu1  ;;  %6008 = vmatmul.mubr.msk.f32.gmra.mxu1 %vm256_vm2, %v3010_v13  ;;  %v1274_v49 = vpop.f32.mrf.mxu0  ;;  %v3406_v13 = vld [vmem:[#allocation2 + $0x9b] sm:$0xff] }
 0x112   : > { %v6773_v15 = vadd.f32 %v1264_v16, %v907_v30  ;;  %v922_v39 = vadd.f32 %v5709_v33, %v6681_v12  ;;  %6010 = vmatprep.mubr.msk.f32.mxu1 %vm256_vm2, %v3011_v20  ;;  %v3017_v16 = vld [vmem:[#allocation2 + $0xa2] sm:$0xff] }
 0x113   : > { %v916_v48 = vpop.f32.mrf.mxu1  ;;  %v5762_v58 = vpop.f32.mrf.mxu0  ;;  %6061 = vmatmul.mubr.msk.f32.gmra.mxu0 %vm256_vm2, %v3402_v45 }
 0x114   : > { %v6778_v53 = vadd.f32 %v5759_v36, %v922_v39  ;;  %v917_v56 = vadd.f32 %v916_v48, %v6689_v17  ;;  %6063 = vmatprep.mubr.msk.f32.mxu0 %vm256_vm2, %v3403_v23  ;;  %v3405_v17 = vld [vmem:[#allocation2 + $0x93] sm:$0xff]  ;;  %v3018_v39 = vld [vmem:[#allocation2 + $0xaa] sm:$0xff] }
 0x115   : > { %v5712_v57 = vpop.f32.mrf.mxu1  ;;  %6011 = vmatmul.mubr.msk.f32.gmra.mxu1 %vm256_vm2, %v3012_v42  ;;  %v1284_v63 = vpop.f32.mrf.mxu0  ;;  %v3408_v42 = vld [vmem:[#allocation2 + $0xab] sm:$0xff] }
 0x116   : > { %v6783_v12 = vadd.f32 %v1274_v49, %v917_v56  ;;  %v932_v59 = vadd.f32 %v5712_v57, %v6693_v22  ;;  %6013 = vmatprep.mubr.msk.f32.mxu1 %vm256_vm2, %v3013_v52  ;;  %v3019_v49 = vld [vmem:[#allocation2 + $0xb2] sm:$0xff] }
 0x117   : > { %v926_v62 = vpop.f32.mrf.mxu1  ;;  %v5765_v5 = vpop.f32.mrf.mxu0  ;;  %6064 = vmatmul.mubr.msk.f32.gmra.mxu0 %vm256_vm2, %v3404_v61 }
 0x118   : > { %v6788_v1 = vadd.f32 %v5762_v58, %v932_v59  ;;  %v927_v2 = vadd.f32 %v926_v62, %v6701_v28  ;;  %6066 = vmatprep.mubr.msk.f32.mxu0 %vm256_vm2, %v3405_v17  ;;  %v3407_v28 = vld [vmem:[#allocation2 + $0xa3] sm:$0xff]  ;;  %v3020_v59 = vld [vmem:[#allocation2 + $0xba] sm:$0xff] }
 0x119   : > { %v5715_v4 = vpop.f32.mrf.mxu1  ;;  %6014 = vmatmul.mubr.msk.f32.gmra.mxu1 %vm256_vm2, %v3014_v60  ;;  %v1294_v27 = vpop.f32.mrf.mxu0  ;;  %v3410_v60 = vld [vmem:[#allocation2 + $0xbb] sm:$0xff] }
 0x11a   : > { %v6793_v22 = vadd.f32 %v1284_v63, %v927_v2  ;;  %v942_v6 = vadd.f32 %v5715_v4, %v6705_v31  ;;  %6016 = vmatprep.mubr.msk.f32.mxu1 %vm256_vm2, %v3015_v0  ;;  %v3021_v63 = vld [vmem:[#allocation2 + $0xc2] sm:$0xff] }
 0x11b   : > { %v936_v21 = vpop.f32.mrf.mxu1  ;;  %v5768_v33 = vpop.f32.mrf.mxu0  ;;  %6067 = vmatmul.mubr.msk.f32.gmra.mxu0 %vm256_vm2, %v3406_v13 }
 0x11c   : > { %v6798_v20 = vadd.f32 %v5765_v5, %v942_v6  ;;  %v937_v10 = vadd.f32 %v936_v21, %v6713_v34  ;;  %6069 = vmatprep.mubr.msk.f32.mxu0 %vm256_vm2, %v3407_v28  ;;  %v3409_v34 = vld [vmem:[#allocation2 + $0xb3] sm:$0xff]  ;;  %v3022_v6 = vld [vmem:[#allocation2 + $0xca] sm:$0xff] }
 0x11d   : > { %v5718_v30 = vpop.f32.mrf.mxu1  ;;  %6017 = vmatmul.mubr.msk.f32.gmra.mxu1 %vm256_vm2, %v3016_v9  ;;  %v1304_v48 = vpop.f32.mrf.mxu0  ;;  %v3412_v9 = vld [vmem:[#allocation2 + $0xcb] sm:$0xff] }
 0x11e   : > { %v6803_v31 = vadd.f32 %v1294_v27, %v937_v10  ;;  %v952_v36 = vadd.f32 %v5718_v30, %v6717_v37  ;;  %6019 = vmatprep.mubr.msk.f32.mxu1 %vm256_vm2, %v3017_v16  ;;  %v3023_v27 = vld [vmem:[#allocation2 + $0xd2] sm:$0xff] }
 0x11f   : > { %v946_v45 = vpop.f32.mrf.mxu1  ;;  %v5771_v57 = vpop.f32.mrf.mxu0  ;;  %6070 = vmatmul.mubr.msk.f32.gmra.mxu0 %vm256_vm2, %v3408_v42  ;;  %v3786_v42 = vlaneseq }
 0x120   : > { %v6808_v52 = vadd.f32 %v5768_v33, %v952_v36  ;;  %v947_v23 = vadd.f32 %v946_v45, %v6725_v40  ;;  %6072 = vmatprep.mubr.msk.f32.mxu0 %vm256_vm2, %v3409_v34  ;;  %v3411_v40 = vld [vmem:[#allocation2 + $0xc3] sm:$0xff]  ;;  %v3024_v36 = vld [vmem:[#allocation2 + $0xda] sm:$0xff] }
 0x121   : > { %v5721_v56 = vpop.f32.mrf.mxu1  ;;  %6020 = vmatmul.mubr.msk.f32.gmra.mxu1 %vm256_vm2, %v3018_v39  ;;  %v1314_v62 = vpop.f32.mrf.mxu0  ;;  %v3414_v39 = vld [vmem:[#allocation2 + $0xdb] sm:$0xff] }
 0x122   : > { %v6813_v37 = vadd.f32 %v1304_v48, %v947_v23  ;;  %v962_v58 = vadd.f32 %v5721_v56, %v6729_v43  ;;  %6022 = vmatprep.mubr.msk.f32.mxu1 %vm256_vm2, %v3019_v49  ;;  %v3415_v49 = vld [vmem:[#allocation2 + $0xe3] sm:$0xff]  ;;  %v6841_v56 = vshrl.u32 %v3786_v42, 7 }
 0x123   : > { %v956_v61 = vpop.f32.mrf.mxu1  ;;  %v5774_v4 = vpop.f32.mrf.mxu0  ;;  %6073 = vmatmul.mubr.msk.f32.gmra.mxu0 %vm256_vm2, %v3410_v60  ;;  %v3026_v60 = vld [vmem:[#allocation2 + $0xea] sm:$0xff] }
 0x124   : > { %v6818_v0 = vadd.f32 %v5771_v57, %v962_v58  ;;  %v957_v17 = vadd.f32 %v956_v61, %v6737_v46  ;;  %6075 = vmatprep.mubr.msk.f32.mxu0 %vm256_vm2, %v3411_v40  ;;  %v3413_v46 = vld [vmem:[#allocation2 + $0xd3] sm:$0xff]  ;;  %v3416_v61 = vld [vmem:[#allocation2 + $0xeb] sm:$0xff] }
 0x125   : > { %v5724_v2 = vpop.f32.mrf.mxu1  ;;  %6023 = vmatmul.mubr.msk.f32.gmra.mxu1 %vm256_vm2, %v3020_v59  ;;  %v1324_v21 = vpop.f32.mrf.mxu0  ;;  %v3027_v40 = vld [vmem:[#allocation2 + $0xf2] sm:$0xff] }
 0x126   : > { %v6823_v43 = vadd.f32 %v1314_v62, %v957_v17  ;;  %v972_v5 = vadd.f32 %v5724_v2, %v6741_v50  ;;  %6025 = vmatprep.mubr.msk.f32.mxu1 %vm256_vm2, %v3021_v63  ;;  %v3417_v17 = vld [vmem:[#allocation2 + $0xf3] sm:$0xff]  ;;  %v6852_v2 = vstv %s5279_s26 }
 0x127   : > { %v966_v13 = vpop.f32.mrf.mxu1  ;;  %v5777_v30 = vpop.f32.mrf.mxu0  ;;  %6076 = vmatmul.mubr.msk.f32.gmra.mxu0 %vm256_vm2, %v3412_v9 }
 0x128   : > { %v6828_v16 = vadd.f32 %v5774_v4, %v972_v5  ;;  %v967_v28 = vadd.f32 %v966_v13, %v6749_v54  ;;  %6078 = vmatprep.mubr.msk.f32.mxu0 %vm256_vm2, %v3413_v46  ;;  %v3025_v54 = vld [vmem:[#allocation2 + $0xe2] sm:$0xff] }
 0x129   : > { %v5727_v10 = vpop.f32.mrf.mxu1  ;;  %6026 = vmatmul.mubr.msk.f32.gmra.mxu1 %vm256_vm2, %v3022_v6  ;;  %v1334_v48 = vpop.f32.mrf.mxu0  ;;  %v3418_v46 = vld [vmem:[#allocation2 + $0xfb] sm:$0xff] }
 0x12a   : > { %v6833_v50 = vadd.f32 %v1324_v21, %v967_v28  ;;  %v982_v33 = vadd.f32 %v5727_v10, %v6659_v8  ;;  %6028 = vmatprep.mubr.msk.f32.mxu1 %vm256_vm2, %v3023_v27  ;;  %v3028_v27 = vld [vmem:[#allocation2 + $0xfa] sm:$0xff]  ;;  %v6870_v28 = vadd.s32 %v6852_v2, %v6841_v56 }
 0x12b   : > { %v976_v45 = vpop.f32.mrf.mxu1  ;;  %v5780_v8 = vpop.f32.mrf.mxu0  ;;  %6079 = vmatmul.mubr.msk.f32.gmra.mxu0 %vm256_vm2, %v3414_v39 }
 0x12c   : > { %v6838_v34 = vadd.f32 %v5777_v30, %v982_v33  ;;  %v977_v23 = vadd.f32 %v976_v45, %v6667_v11  ;;  %6081 = vmatprep.mubr.msk.f32.mxu0 %vm256_vm2, %v3415_v49  ;;  %v3788_v11 = vadd.s32 8, %v6841_v56  ;;  %v3029_v33 = vld [vmem:[#allocation2 + $0x102] sm:$0xff]  ;;  %vm3948_vm4 = vcmp.gt.s32.totalorder %v6870_v28, 0 }
 0x12d   : > { %v5730_v57 = vpop.f32.mrf.mxu1  ;;  %6029 = vmatmul.mubr.msk.f32.gmra.mxu1 %vm256_vm2, %v3024_v36  ;;  %v1344_v63 = vpop.f32.mrf.mxu0  ;;  %v3419_v36 = vld [vmem:[#allocation2 + $0x103] sm:$0xff]  ;;  %vm3852_vm12 = vcmp.ge.s32.totalorder %v6870_v28, 0  ;;  %vm3884_vm14 = vcmp.lt.s32.totalorder %v6870_v28, 648 }
 0x12e   : > { %v6845_v58 = vadd.f32 %v1334_v48, %v977_v23  ;;  %v992_v59 = vadd.f32 %v5730_v57, %v6671_v19  ;;  %6031 = vmatprep.mubr.msk.f32.mxu1 %vm256_vm2, %v3025_v54  ;;  %v6858_v19 = vadd.s32 %v6852_v2, %v3788_v11  ;;  %v5280_v48 = vcvt.s32.f32 %v6870_v28  ;;  %v3031_v11 = vld [vmem:[#allocation2 + $0x112] sm:$0xff] }
 0x12f   : > { %v986_v62 = vpop.f32.mrf.mxu1  ;;  %v5783_v9 = vpop.f32.mrf.mxu0  ;;  %6082 = vmatmul.mubr.msk.f32.gmra.mxu0 %vm256_vm2, %v3416_v61 }
 0x130   : > { %v6854_v4 = vadd.f32 %v5780_v8, %v992_v59  ;;  %v987_v5 = vadd.f32 %v986_v62, %v6679_v25  ;;  %6084 = vmatprep.mubr.msk.f32.mxu0 %vm256_vm2, %v3417_v17  ;;  %v5282_v25 = vcvt.s32.f32 %v6858_v19  ;;  %vm3950_vm3 = vcmp.gt.s32.totalorder %v6858_v19, 0  ;;  %v3420_v8 = vld [vmem:[#allocation2 + $0x10b] sm:$0xff]  ;;  %v3421_v62 = vld [vmem:[#allocation2 + $0x113] sm:$0xff] }
 0x131   : > { %v5733_v6 = vpop.f32.mrf.mxu1  ;;  %6032 = vmatmul.mubr.msk.f32.gmra.mxu1 %vm256_vm2, %v3026_v60  ;;  %v1354_v30 = vpop.f32.mrf.mxu0  ;;  %v6892_v17 = vsel %vm3948_vm4, %v5280_v48, 0.0  ;;  %vm3853_vm9 = vcmp.ge.s32.totalorder %v6858_v19, 0  ;;  %vm3885_vm10 = vcmp.lt.s32.totalorder %v6858_v19, 648  ;;  %vm7075_vm4 = vmand %vm3852_vm12, %vm3884_vm14 }
 0x132   : > { %v6862_v13 = vadd.f32 %v1344_v63, %v987_v5  ;;  %v1002_v21 = vadd.f32 %v5733_v6, %v6683_v14  ;;  %6034 = vmatprep.mubr.msk.f32.mxu1 %vm256_vm2, %v3027_v40  ;;  %v3790_v14 = vadd.s32 24, %v6841_v56  ;;  %v6877_v45 = vsel %vm3950_vm3, %v5282_v25, 0.0  ;;  %vm7032_vm13 = vmand %vm3853_vm9, %vm3885_vm10 }
 0x133   : > { %v996_v10 = vpop.f32.mrf.mxu1  ;;  %v5786_v49 = vpop.f32.mrf.mxu0  ;;  %6085 = vmatmul.mubr.msk.f32.gmra.mxu0 %vm256_vm2, %v3418_v46  ;;  %v4045_v59 = vadd.f32 0.5, %v6877_v45 }
 0x134   : > { %v6874_v39 = vadd.f32 %v5783_v9, %v1002_v21  ;;  %v997_v42 = vadd.f32 %v996_v10, %v6691_v18  ;;  %6087 = vmatprep.mubr.msk.f32.mxu0 %vm256_vm2, %v3419_v36  ;;  %v3030_v18 = vld [vmem:[#allocation2 + $0x10a] sm:$0xff]  ;;  %v4044_v36 = vadd.f32 0.5, %v6892_v17 }
 0x135   : > { %v5736_v54 = vpop.f32.mrf.mxu1  ;;  %6035 = vmatmul.mubr.msk.f32.gmra.mxu1 %vm256_vm2, %v3028_v27  ;;  %v1364_v61 = vpop.f32.mrf.mxu0  ;;  %v3422_v27 = vld [vmem:[#allocation2 + $0x11b] sm:$0xff]  ;;  %v4077_v46 = vmul.f32 0.0030864198, %v4045_v59 }
 0x136   : > { %v6883_v23 = vadd.f32 %v1354_v30, %v997_v42  ;;  %v1012_v57 = vadd.f32 %v5736_v54, %v6695_v24  ;;  %6037 = vmatprep.mubr.msk.f32.mxu1 %vm256_vm2, %v3029_v33  ;;  %v6895_v24 = vadd.s32 %v6852_v2, %v3790_v14  ;;  %v3033_v30 = vld [vmem:[#allocation2 + $0x122] sm:$0xff] }
 0x137   : > { %v1006_v60 = vpop.f32.mrf.mxu1  ;;  %v5789_v6 = vpop.f32.mrf.mxu0  ;;  %6088 = vmatmul.mubr.msk.f32.gmra.mxu0 %vm256_vm2, %v3420_v8  ;;  %v3423_v33 = vld [vmem:[#allocation2 + $0x123] sm:$0xff]  ;;  %v3424_v8 = vld [vmem:[#allocation2 + $0x12b] sm:$0xff]  ;;  %v4109_v59 = vfloor.f32 %v4077_v46  ;;  %v3792_v46 = vadd.s32 40, %v6841_v56 }
 0x138   : > { %v6889_v63 = vadd.f32 %v5786_v49, %v1012_v57  ;;  %v1007_v40 = vadd.f32 %v1006_v60, %v6703_v29  ;;  %6090 = vmatprep.mubr.msk.f32.mxu0 %vm256_vm2, %v3421_v62  ;;  %v3032_v29 = vld [vmem:[#allocation2 + $0x11a] sm:$0xff]  ;;  %v5286_v48 = vcvt.s32.f32 %v6895_v24  ;;  %vm3954_vm5 = vcmp.gt.s32.totalorder %v6895_v24, 0 }
 0x139   : > { %v5739_v5 = vpop.f32.mrf.mxu1  ;;  %6038 = vmatmul.mubr.msk.f32.gmra.mxu1 %vm256_vm2, %v3030_v18  ;;  %v1374_v10 = vpop.f32.mrf.mxu0  ;;  %v3425_v62 = vld [vmem:[#allocation2 + $0x133] sm:$0xff]  ;;  %vm3855_vm14 = vcmp.ge.s32.totalorder %v6895_v24, 0 }
 0x13a   : > { %v6899_v9 = vadd.f32 %v1364_v61, %v1007_v40  ;;  %v1022_v21 = vadd.f32 %v5739_v5, %v6707_v32  ;;  %6040 = vmatprep.mubr.msk.f32.mxu1 %vm256_vm2, %v3031_v11  ;;  %v3789_v32 = vadd.s32 16, %v6841_v56  ;;  %v3035_v11 = vld [vmem:[#allocation2 + $0x132] sm:$0xff]  ;;  %v4076_v40 = vmul.f32 0.0030864198, %v4044_v36 }
 0x13b   : > { %v1016_v25 = vpop.f32.mrf.mxu1  ;;  %v5792_v49 = vpop.f32.mrf.mxu0  ;;  %6091 = vmatmul.mubr.msk.f32.gmra.mxu0 %vm256_vm2, %v3422_v27 }
 0x13c   : > { %v6905_v14 = vadd.f32 %v5789_v6, %v1022_v21  ;;  %v1017_v42 = vadd.f32 %v1016_v25, %v6715_v35  ;;  %6093 = vmatprep.mubr.msk.f32.mxu0 %vm256_vm2, %v3423_v33  ;;  %v3034_v35 = vld [vmem:[#allocation2 + $0x12a] sm:$0xff]  ;;  %v6921_v21 = vsel %vm3954_vm5, %v5286_v48, 0.0  ;;  %v4141_v33 = vmul.f32 324.0, %v4109_v59 }
 0x13d   : > { %v5742_v54 = vpop.f32.mrf.mxu1  ;;  %6041 = vmatmul.mubr.msk.f32.gmra.mxu1 %vm256_vm2, %v3032_v29  ;;  %v1384_v61 = vpop.f32.mrf.mxu0  ;;  %v4108_v48 = vfloor.f32 %v4076_v40 }
 0x13e   : > { %v6913_v57 = vadd.f32 %v1374_v10, %v1017_v42  ;;  %v1032_v18 = vadd.f32 %v5742_v54, %v6719_v38  ;;  %6043 = vmatprep.mubr.msk.f32.mxu1 %vm256_vm2, %v3033_v30  ;;  %v6924_v38 = vadd.s32 %v6852_v2, %v3789_v32  ;;  %v3426_v30 = vld [vmem:[#allocation2 + $0x13b] sm:$0xff]  ;;  %v4047_v32 = vadd.f32 0.5, %v6921_v21 }
 0x13f   : > { %v1026_v60 = vpop.f32.mrf.mxu1  ;;  %v5795_v27 = vpop.f32.mrf.mxu0  ;;  %6094 = vmatmul.mubr.msk.f32.gmra.mxu0 %vm256_vm2, %v3424_v8  ;;  %v6943_v8 = vadd.s32 %v6852_v2, %v3792_v46  ;;  %v4140_v40 = vmul.f32 324.0, %v4108_v48 }
 0x140   : > { %v6918_v5 = vadd.f32 %v5792_v49, %v1032_v18  ;;  %v1027_v6 = vadd.f32 %v1026_v60, %v6727_v41  ;;  %6096 = vmatprep.mubr.msk.f32.mxu0 %vm256_vm2, %v3425_v62  ;;  %v3036_v41 = vld [vmem:[#allocation2 + $0x13a] sm:$0xff]  ;;  %v5284_v18 = vcvt.s32.f32 %v6924_v38  ;;  %vm3952_vm6 = vcmp.gt.s32.totalorder %v6924_v38, 0 }
 0x141   : > { %v5745_v29 = vpop.f32.mrf.mxu1  ;;  %6044 = vmatmul.mubr.msk.f32.gmra.mxu1 %vm256_vm2, %v3034_v35  ;;  %v1394_v42 = vpop.f32.mrf.mxu0  ;;  %vm3958_vm7 = vcmp.gt.s32.totalorder %v6943_v8, 0 }
 0x142   : > { %v6929_v25 = vadd.f32 %v1384_v61, %v1027_v6  ;;  %v1042_v10 = vadd.f32 %v5745_v29, %v6731_v44  ;;  %6046 = vmatprep.mubr.msk.f32.mxu1 %vm256_vm2, %v3035_v11  ;;  %v6949_v61 = vsub.f32 %v6877_v45, %v4141_v33  ;;  %v4079_v6 = vmul.f32 0.0030864198, %v4047_v32 }
 0x143   : > { %v1036_v36 = vpop.f32.mrf.mxu1  ;;  %v5798_v44 = vpop.f32.mrf.mxu0  ;;  %6097 = vmatmul.mubr.msk.f32.gmra.mxu0 %vm256_vm2, %v3426_v30 }
 0x144   : > { %v6935_v54 = vadd.f32 %v5795_v27, %v1042_v10  ;;  %v1037_v49 = vadd.f32 %v1036_v36, %v6739_v47  ;;  %v3791_v47 = vadd.s32 32, %v6841_v56  ;;  %v6955_v10 = vsel %vm3952_vm6, %v5284_v18, 0.0 }
 0x145   : > { %v5748_v35 = vpop.f32.mrf.mxu1  ;;  %6047 = vmatmul.mubr.msk.f32.gmra.mxu1 %vm256_vm2, %v3036_v41  ;;  %v1404_v62 = vpop.f32.mrf.mxu0  ;;  %v4205_v33 = vadd.f32 0.5, %v6949_v61  ;;  %v4111_v32 = vfloor.f32 %v4079_v6 }
 0x146   : > { %v6945_v59 = vadd.f32 %v1394_v42, %v1037_v49  ;;  %v1052_v60 = vadd.f32 %v5748_v35, %v6743_v51  ;;  %v5290_v51 = vcvt.s32.f32 %v6943_v8  ;;  %v6964_v36 = vadd.s32 %v6852_v2, %v3791_v47 }
 0x147   : > { %v1046_v11 = vpop.f32.mrf.mxu1  ;;  %v5853_v41 = vpop.f32.mrf.mxu0  ;;  %v4046_v49 = vadd.f32 0.5, %v6955_v10 }
 0x148   : > { %v6952_v29 = vadd.f32 %v5798_v44, %v1052_v60  ;;  %v1047_v27 = vadd.f32 %v1046_v11, %v6751_v55  ;;  %v6967_v55 = vsub.f32 %v6892_v17, %v4140_v40  ;;  %vm3956_vm8 = vcmp.gt.s32.totalorder %v6964_v36, 0 }
 0x149   : > { %v5803_v46 = vpop.f32.mrf.mxu1  ;;  %v2034_v48 = vpop.f32.mrf.mxu0 }
 0x14a   : > { %v6959_v45 = vadd.f32 %v1404_v62, %v1047_v27  ;;  %v1804_v30 = vadd.f32 %v5803_v46, %v6758_v3  ;;  %v6973_v3 = vsel %vm3958_vm7, %v5290_v51, 0.0  ;;  %v4237_v62 = vmul.f32 0.055555556, %v4205_v33 }
 0x14b   : > { %v1644_v42 = vpop.f32.mrf.mxu1  ;;  %v5856_v60 = vpop.f32.mrf.mxu0  ;;  %v5288_v27 = vcvt.s32.f32 %v6964_v36  ;;  %v4204_v6 = vadd.f32 0.5, %v6967_v55  ;;  %v4143_v46 = vmul.f32 324.0, %v4111_v32 }
 0x14c   : > { %v6970_v18 = vadd.f32 %v5853_v41, %v1804_v30  ;;  %v1803_v35 = vadd.f32 %v1644_v42, %v6763_v7  ;;  %v4078_v41 = vmul.f32 0.0030864198, %v4046_v49  ;;  %v4049_v30 = vadd.f32 0.5, %v6973_v3 }
 0x14d   : > { %v5806_v44 = vpop.f32.mrf.mxu1  ;;  %v2044_v40 = vpop.f32.mrf.mxu0 }
 0x14e   : > { %v6975_v11 = vadd.f32 %v2034_v48, %v1803_v35  ;;  %v1806_v47 = vadd.f32 %v5806_v44, %v6768_v26  ;;  %v6988_v35 = vfloor.f32 %v4237_v62  ;;  %v6990_v44 = vsel %vm3956_vm8, %v5288_v27, 0.0 }
 0x14f   : > { %v1654_v17 = vpop.f32.mrf.mxu1  ;;  %v5859_v48 = vpop.f32.mrf.mxu0  ;;  %v3794_v62 = vadd.s32 56, %v6841_v56 }
 0x150   : > { %8932 = vst [vmem:[#allocation6_spill] sm:$0xff] %v6975_v11  ;;  %v6981_v7 = vadd.f32 %v5856_v60, %v1806_v47  ;;  %v1805_v51 = vadd.f32 %v1654_v17, %v6773_v15  ;;  %v4236_v11 = vmul.f32 0.055555556, %v4204_v6  ;;  %v6993_v60 = vsub.f32 %v6921_v21, %v4143_v46 }
 0x151   : > { %v5809_v42 = vpop.f32.mrf.mxu1  ;;  %v2054_v49 = vpop.f32.mrf.mxu0  ;;  %v4110_v47 = vfloor.f32 %v4078_v41  ;;  %v4301_v6 = vmul.f32 18.0, %v6988_v35  ;;  %vm4365_vm11 = vcmp.ge.f32.partialorder %v6988_v35, 1.0  ;;  %vm4429_vm1 = vcmp.le.f32.partialorder %v6988_v35, 16.0 }
 0x152   : > { %8933 = vst [vmem:[#allocation7_spill] sm:$0xff] %v6981_v7  ;;  %v6985_v26 = vadd.f32 %v2044_v40, %v1805_v51  ;;  %v1808_v33 = vadd.f32 %v5809_v42, %v6778_v53  ;;  %v4081_v7 = vmul.f32 0.0030864198, %v4049_v30  ;;  %v4048_v53 = vadd.f32 0.5, %v6990_v44  ;;  %vm7053_vm0 = vmand %vm7032_vm13, %vm4365_vm11 }
 0x153   : > { %v1664_v32 = vpop.f32.mrf.mxu1  ;;  %v5862_v51 = vpop.f32.mrf.mxu0  ;;  %v7004_v41 = vfloor.f32 %v4236_v11  ;;  %v3793_v11 = vadd.s32 48, %v6841_v56  ;;  %vm7091_vm6 = vmand %vm7053_vm0, %vm4429_vm1 }
 0x154   : > { %v6995_v15 = vadd.f32 %v5859_v48, %v1808_v33  ;;  %v1807_v17 = vadd.f32 %v1664_v32, %v6783_v12  ;;  %v4207_v48 = vadd.f32 0.5, %v6993_v60  ;;  %v4142_v12 = vmul.f32 324.0, %v4110_v47 }
 0x155   : > { %v5812_v40 = vpop.f32.mrf.mxu1  ;;  %v2064_v46 = vpop.f32.mrf.mxu0  ;;  %v4113_v32 = vfloor.f32 %v4081_v7  ;;  %v4300_v7 = vmul.f32 18.0, %v7004_v41  ;;  %vm4364_vm3 = vcmp.ge.f32.partialorder %v7004_v41, 1.0  ;;  %vm4428_vm8 = vcmp.le.f32.partialorder %v7004_v41, 16.0 }
 0x156   : > { %v7000_v27 = vadd.f32 %v2054_v49, %v1807_v17  ;;  %v1810_v42 = vadd.f32 %v5812_v40, %v6788_v1  ;;  %v4080_v1 = vmul.f32 0.0030864198, %v4048_v53  ;;  %v7013_v40 = vadd.s32 %v6852_v2, %v3794_v62  ;;  %vm7110_vm9 = vmand %vm7075_vm4, %vm4364_vm3 }
 0x157   : > { %v1674_v21 = vpop.f32.mrf.mxu1  ;;  %v5865_v17 = vpop.f32.mrf.mxu0  ;;  %v4239_v53 = vmul.f32 0.055555556, %v4207_v48  ;;  %v4145_v48 = vmul.f32 324.0, %v4113_v32  ;;  %vm7138_vm13 = vmand %vm7110_vm9, %vm4428_vm8  ;;  %vm3854_vm4 = vcmp.ge.s32.totalorder %v6924_v38, 0  ;;  %vm3857_vm8 = vcmp.ge.s32.totalorder %v6943_v8, 0 }
 0x158   : > { %8934 = vst [vmem:[#allocation8_spill] sm:$0xff] %v7000_v27  ;;  %v7007_v30 = vadd.f32 %v5862_v51, %v1810_v42  ;;  %v1809_v33 = vadd.f32 %v1674_v21, %v6793_v22  ;;  %v7020_v51 = vsub.f32 %v6949_v61, %v4301_v6  ;;  %v7038_v61 = vsub.f32 %v6955_v10, %v4142_v12 }
 0x159   : > { %v5815_v49 = vpop.f32.mrf.mxu1  ;;  %v2074_v42 = vpop.f32.mrf.mxu0  ;;  %vm3962_vm15 = vcmp.gt.s32.totalorder %v7013_v40, 0  ;;  %vm3889_vm9 = vcmp.lt.s32.totalorder %v6943_v8, 648 }
 0x15a   : > { %v7016_v27 = vadd.f32 %v2064_v46, %v1809_v33  ;;  %v1812_v47 = vadd.f32 %v5815_v49, %v6798_v20  ;;  %v4112_v33 = vfloor.f32 %v4080_v1  ;;  %vm4493_vm2 = vcmp.ge.f32.partialorder %v7020_v51, 1.0 }
 0x15b   : > { %v1684_v22 = vpop.f32.mrf.mxu1  ;;  %v5868_v46 = vpop.f32.mrf.mxu0  ;;  %vm4557_vm7 = vcmp.le.f32.partialorder %v7020_v51, 16.0  ;;  %vm7121_vm10 = vmand %vm7091_vm6, %vm4493_vm2  ;;  %vm3887_vm2 = vcmp.lt.s32.totalorder %v6895_v24, 648 }
 0x15c   : > { %v7025_v62 = vadd.f32 %v5865_v17, %v1812_v47  ;;  %v1811_v21 = vadd.f32 %v1684_v22, %v6803_v31  ;;  %v7042_v31 = vadd.s32 %v6852_v2, %v3793_v11  ;;  %v5294_v17 = vcvt.s32.f32 %v7013_v40 }
 0x15d   : > { %v5818_v6 = vpop.f32.mrf.mxu1  ;;  %v3796_v47 = vadd.s32 72, %v6841_v56  ;;  %v2084_v10 = vpop.f32.mrf.mxu0  ;;  %v4206_v11 = vadd.f32 0.5, %v7038_v61 }
 0x15e   : > { %v7044_v49 = vadd.f32 %v2074_v42, %v1811_v21  ;;  %v1814_v19 = vadd.f32 %v5818_v6, %v6808_v52  ;;  %v7060_v52 = vsub.f32 %v6967_v55, %v4300_v7  ;;  %v7069_v42 = vsel %vm3962_vm15, %v5294_v17, 0.0  ;;  %vm7152_vm15 = vmand %vm7121_vm10, %vm4557_vm7 }
 0x15f   : > { %v1694_v22 = vpop.f32.mrf.mxu1  ;;  %v5871_v20 = vpop.f32.mrf.mxu0  ;;  %v7080_v7 = vsub.f32 %v6973_v3, %v4145_v48  ;;  %vm3960_vm5 = vcmp.gt.s32.totalorder %v7042_v31, 0  ;;  %v5292_v6 = vcvt.s32.f32 %v7042_v31  ;;  %v4051_v3 = vadd.f32 0.5, %v7069_v42 }
 0x160   : > { %8937 = vst [vmem:[#allocation9_spill] sm:$0xff] %v7044_v49  ;;  %v7063_v32 = vadd.f32 %v5868_v46, %v1814_v19  ;;  %v1813_v1 = vadd.f32 %v1694_v22, %v6813_v37  ;;  %v4144_v37 = vmul.f32 324.0, %v4112_v33  ;;  %v7097_v48 = vadd.s32 %v6852_v2, %v3796_v47 }
 0x161   : > { %v5821_v21 = vpop.f32.mrf.mxu1  ;;  %v2094_v17 = vpop.f32.mrf.mxu0  ;;  %v7114_v47 = vfloor.f32 %v4239_v53  ;;  %vm4492_vm11 = vcmp.ge.f32.partialorder %v7060_v52, 1.0  ;;  %v4209_v55 = vadd.f32 0.5, %v7080_v7  ;;  %vm4556_vm0 = vcmp.le.f32.partialorder %v7060_v52, 16.0 }
 0x162   : > { %v7084_v46 = vadd.f32 %v2084_v10, %v1813_v1  ;;  %v1816_v19 = vadd.f32 %v5821_v21, %v6818_v0  ;;  %v7101_v0 = vsel %vm3960_vm5, %v5292_v6, 0.0  ;;  %v7128_v53 = vsub.f32 %v6990_v44, %v4144_v37  ;;  %vm7172_vm1 = vmand %vm7138_vm13, %vm4492_vm11 }
 0x163   : > { %v1704_v33 = vpop.f32.mrf.mxu1  ;;  %v4050_v12 = vadd.f32 0.5, %v7101_v0  ;;  %v5874_v21 = vpop.f32.mrf.mxu0  ;;  %vm3966_vm12 = vcmp.gt.s32.totalorder %v7097_v48, 0  ;;  %v5298_v37 = vcvt.s32.f32 %v7097_v48  ;;  %vm4367_vm3 = vcmp.ge.f32.partialorder %v7114_v47, 1.0  ;;  %vm7199_vm6 = vmand %vm7172_vm1, %vm4556_vm0 }
 0x164   : > { %8942 = vst [vmem:[#allocation10_spill] sm:$0xff] %v7084_v46  ;;  %v7103_v35 = vadd.f32 %v5871_v20, %v1816_v19  ;;  %v1815_v22 = vadd.f32 %v1704_v33, %v6823_v43  ;;  %v4238_v20 = vmul.f32 0.055555556, %v4206_v11  ;;  %v4083_v33 = vmul.f32 0.0030864198, %v4051_v3 }
 0x165   : > { %v5824_v1 = vpop.f32.mrf.mxu1  ;;  %v2104_v46 = vpop.f32.mrf.mxu0  ;;  %v4082_v44 = vmul.f32 0.0030864198, %v4050_v12  ;;  %vm3886_vm5 = vcmp.lt.s32.totalorder %v6924_v38, 648  ;;  %vm4431_vm7 = vcmp.le.f32.partialorder %v7114_v47, 16.0  ;;  %vm3888_vm0 = vcmp.lt.s32.totalorder %v6964_v36, 648 }
 0x166   : > { %v7130_v6 = vadd.f32 %v2094_v17, %v1815_v22  ;;  %v1818_v19 = vadd.f32 %v5824_v1, %v6828_v16  ;;  %v3795_v16 = vadd.s32 64, %v6841_v56  ;;  %v4303_v22 = vmul.f32 18.0, %v7114_v47 }
 0x167   : > { %v1714_v28 = vpop.f32.mrf.mxu1  ;;  %v5877_v12 = vpop.f32.mrf.mxu0  ;;  %v7158_v1 = vfloor.f32 %v4238_v20  ;;  %v4115_v20 = vfloor.f32 %v4083_v33 }
 0x168   : > { %8949 = vst [vmem:[#allocation11_spill] sm:$0xff] %v7130_v6  ;;  %v7145_v3 = vadd.f32 %v5874_v21, %v1818_v19  ;;  %v1817_v17 = vadd.f32 %v1714_v28, %v6833_v50  ;;  %v4241_v21 = vmul.f32 0.055555556, %v4209_v55  ;;  %v4208_v19 = vadd.f32 0.5, %v7128_v53 }
 0x169   : > { %v5827_v10 = vpop.f32.mrf.mxu1  ;;  %v7163_v50 = vsel %vm3966_vm12, %v5298_v37, 0.0  ;;  %v2114_v49 = vpop.f32.mrf.mxu0  ;;  %v7184_v11 = vadd.s32 %v6852_v2, %v3795_v16  ;;  %v4147_v52 = vmul.f32 324.0, %v4115_v20  ;;  %vm7237_vm12 = vmand %vm3855_vm14, %vm3887_vm2  ;;  %vm4366_vm13 = vcmp.ge.f32.partialorder %v7158_v1, 1.0 }
 0x16a   : > { %8952 = vst [vmem:[#allocation12_spill] sm:$0xff] %v7145_v3  ;;  %v7165_v51 = vadd.f32 %v2104_v46, %v1817_v17  ;;  %v1820_v43 = vadd.f32 %v5827_v10, %v6838_v34  ;;  %v4053_v55 = vadd.f32 0.5, %v7163_v50  ;;  %v8925_v3 = vmov 0   ;;  %vm7266_vm1 = vmand %vm7237_vm12, %vm4367_vm3 }
 0x16b   : > { %v1724_v6 = vpop.f32.mrf.mxu1  ;;  %v7180_v46 = vsel %vm7152_vm15, 1, %v8925_v3  ;;  %v4114_v34 = vfloor.f32 %v4082_v44  ;;  %v7190_v17 = vsub.f32 %v6993_v60, %v4303_v22  ;;  %v5880_v10 = vpop.f32.mrf.mxu0  ;;  %v7205_v60 = vfloor.f32 %v4241_v21  ;;  %vm7286_vm12 = vmand %vm3854_vm4, %vm3886_vm5 }
 0x16c   : > { %8955 = vst [vmem:[#allocation13_spill] sm:$0xff] %v7165_v51  ;;  %8958 = vst [vmem:[#allocation14_spill] sm:$0xff] %v7180_v46  ;;  %v7186_v37 = vadd.f32 %v5877_v12, %v1820_v43  ;;  %v1819_v33 = vadd.f32 %v1724_v6, %v6845_v58  ;;  %v4302_v58 = vmul.f32 18.0, %v7158_v1  ;;  %v4240_v6 = vmul.f32 0.055555556, %v4208_v19 }
 0x16d   : > { %v5830_v41 = vpop.f32.mrf.mxu1  ;;  %v4085_v16 = vmul.f32 0.0030864198, %v4053_v55  ;;  %v2124_v28 = vpop.f32.mrf.mxu0  ;;  %v4146_v3 = vmul.f32 324.0, %v4114_v34  ;;  %vm3964_vm10 = vcmp.gt.s32.totalorder %v7184_v11, 0  ;;  %v5296_v46 = vcvt.s32.f32 %v7184_v11  ;;  %vm7301_vm4 = vmand %vm7266_vm1, %vm4431_vm7 }
 0x16e   : > { %v7207_v22 = vadd.f32 %v2114_v49, %v1819_v33  ;;  %v1822_v12 = vadd.f32 %v5830_v41, %v6854_v4  ;;  %v3798_v21 = vadd.s32 88, %v6841_v56  ;;  %v8962_v55 = vmov 0   ;;  %vm7314_vm3 = vmand %vm3857_vm8, %vm3889_vm9 }
 0x16f   : > { %v1734_v43 = vpop.f32.mrf.mxu1  ;;  %v7221_v4 = vsel %vm7199_vm6, 1, %v8962_v55  ;;  %v4117_v33 = vfloor.f32 %v4085_v16  ;;  %v5883_v41 = vpop.f32.mrf.mxu0  ;;  %vm4495_vm11 = vcmp.ge.f32.partialorder %v7190_v17, 1.0  ;;  %v7225_v34 = vsub.f32 %v7038_v61, %v4302_v58  ;;  %vm7332_vm8 = vmand %vm7286_vm12, %vm4366_vm13 }
 0x170   : > { %8961 = vst [vmem:[#allocation15_spill] sm:$0xff] %v7207_v22  ;;  %v7215_v19 = vadd.f32 %v5880_v10, %v1822_v12  ;;  %v1821_v49 = vadd.f32 %v1734_v43, %v6862_v13  ;;  %v4305_v22 = vmul.f32 18.0, %v7205_v60  ;;  %v7228_v51 = vfloor.f32 %v4240_v6  ;;  %vm7346_vm5 = vmand %vm7301_vm4, %vm4495_vm11 }
 0x171   : > { %v5833_v20 = vpop.f32.mrf.mxu1  ;;  %v7244_v61 = vsel %vm3964_vm10, %v5296_v46, 0.0  ;;  %v2134_v6 = vpop.f32.mrf.mxu0  ;;  %vm3856_vm15 = vcmp.ge.s32.totalorder %v6964_v36, 0  ;;  %v7252_v24 = vsub.f32 %v7101_v0, %v4146_v3  ;;  %v7256_v12 = vadd.s32 %v6852_v2, %v3798_v21 }
 0x172   : > { %v7230_v10 = vadd.f32 %v2124_v28, %v1821_v49  ;;  %v1824_v13 = vadd.f32 %v5833_v20, %v6874_v39  ;;  %v7249_v39 = vsub.f32 %v7069_v42, %v4147_v52  ;;  %v4052_v16 = vadd.f32 0.5, %v7244_v61 }
 0x173   : > { %v1744_v58 = vpop.f32.mrf.mxu1  ;;  %vm4430_vm14 = vcmp.le.f32.partialorder %v7158_v1, 16.0  ;;  %v4149_v28 = vmul.f32 324.0, %v4117_v33  ;;  %v5886_v20 = vpop.f32.mrf.mxu0  ;;  %v7273_v0 = vsub.f32 %v7080_v7, %v4305_v22  ;;  %vm4369_vm10 = vcmp.ge.f32.partialorder %v7205_v60, 1.0 }
 0x174   : > { %v7258_v43 = vadd.f32 %v5883_v41, %v1824_v13  ;;  %v1823_v46 = vadd.f32 %v1744_v58, %v6883_v23  ;;  %v4304_v23 = vmul.f32 18.0, %v7228_v51  ;;  %v3797_v3 = vadd.s32 80, %v6841_v56  ;;  %vm7360_vm11 = vmand %vm7314_vm3, %vm4369_vm10 }
 0x175   : > { %v5836_v49 = vpop.f32.mrf.mxu1  ;;  %v4084_v33 = vmul.f32 0.0030864198, %v4052_v16  ;;  %v2144_v13 = vpop.f32.mrf.mxu0  ;;  %v4211_v22 = vadd.f32 0.5, %v7249_v39  ;;  %v4210_v44 = vadd.f32 0.5, %v7252_v24  ;;  %vm3970_vm6 = vcmp.gt.s32.totalorder %v7256_v12, 0 }
 0x176   : > { %v7278_v52 = vadd.f32 %v2134_v6, %v1823_v46  ;;  %v1826_v21 = vadd.f32 %v5836_v49, %v6889_v63  ;;  %v5302_v63 = vcvt.s32.f32 %v7256_v12  ;;  %vm3891_vm2 = vcmp.lt.s32.totalorder %v7013_v40, 648 }
 0x177   : > { %v1754_v41 = vpop.f32.mrf.mxu1  ;;  %v7308_v16 = vsub.f32 %v7163_v50, %v4149_v28  ;;  %v5889_v49 = vpop.f32.mrf.mxu0  ;;  %vm4497_vm7 = vcmp.ge.f32.partialorder %v7273_v0, 1.0  ;;  %v7320_v47 = vsub.f32 %v7128_v53, %v4304_v23  ;;  %v7323_v42 = vadd.s32 %v6852_v2, %v3797_v3 }
 0x178   : > { %v7294_v58 = vadd.f32 %v5886_v20, %v1826_v21  ;;  %v1825_v6 = vadd.f32 %v1754_v41, %v6899_v9  ;;  %v4116_v20 = vfloor.f32 %v4084_v33  ;;  %vm4558_vm9 = vcmp.le.f32.partialorder %v7225_v34, 16.0 }
 0x179   : > { %v5839_v46 = vpop.f32.mrf.mxu1  ;;  %v7340_v53 = vsel %vm3970_vm6, %v5302_v63, 0.0  ;;  %v2154_v3 = vpop.f32.mrf.mxu0  ;;  %vm4368_vm13 = vcmp.ge.f32.partialorder %v7228_v51, 1.0  ;;  %v4243_v21 = vmul.f32 0.055555556, %v4211_v22  ;;  %v4242_v33 = vmul.f32 0.055555556, %v4210_v44  ;;  %vm7369_vm6 = vmand %vm7332_vm8, %vm4430_vm14 }
 0x17a   : > { %v7325_v50 = vadd.f32 %v2144_v13, %v1825_v6  ;;  %v1828_v28 = vadd.f32 %v5839_v46, %v6905_v14  ;;  %v4213_v63 = vadd.f32 0.5, %v7308_v16  ;;  %v4148_v22 = vmul.f32 324.0, %v4116_v20  ;;  %vm7384_vm14 = vmand %vm3856_vm15, %vm3888_vm0 }
 0x17b   : > { %v1764_v23 = vpop.f32.mrf.mxu1  ;;  %v5892_v38 = vpop.f32.mrf.mxu0  ;;  %vm4432_vm4 = vcmp.le.f32.partialorder %v7228_v51, 16.0  ;;  %vm3968_vm3 = vcmp.gt.s32.totalorder %v7323_v42, 0  ;;  %vm3861_vm8 = vcmp.ge.s32.totalorder %v7097_v48, 0  ;;  %vm3893_vm10 = vcmp.lt.s32.totalorder %v7097_v48, 648 }
 0x17c   : > { %8973 = vst [vmem:[#allocation16_spill] sm:$0xff] %v7325_v50  ;;  %v7353_v41 = vadd.f32 %v5889_v49, %v1828_v28  ;;  %v1827_v13 = vadd.f32 %v1764_v23, %v6913_v57  ;;  %v4055_v57 = vadd.f32 0.5, %v7340_v53  ;;  %v7391_v9 = vsub.f32 %v7244_v61, %v4148_v22 }
 0x17d   : > { %v5842_v6 = vpop.f32.mrf.mxu1  ;;  %v5300_v20 = vcvt.s32.f32 %v7323_v42  ;;  %v2164_v8 = vpop.f32.mrf.mxu0  ;;  %vm8985_vm12 = vcmp.le.f32.partialorder %v7205_v60, 16.0  ;;  %v7403_v36 = vfloor.f32 %v4243_v21  ;;  %v7405_v23 = vfloor.f32 %v4242_v33 }
 0x17e   : > { %v7377_v46 = vadd.f32 %v2154_v3, %v1827_v13  ;;  %v1830_v49 = vadd.f32 %v5842_v6, %v6918_v5  ;;  %vm7398_vm1 = vmand %vm7360_vm11, %vm8985_vm12  ;;  %v4087_v61 = vmul.f32 0.0030864198, %v4055_v57  ;;  %v3800_v3 = vadd.s32 104, %v6841_v56 }
 0x17f   : > { %v1774_v28 = vpop.f32.mrf.mxu1  ;;  %vm8988_vm0 = vcmp.le.f32.partialorder %v7190_v17, 16.0  ;;  %vm8991_vm11 = vcmp.ge.f32.partialorder %v7225_v34, 1.0  ;;  %v4245_v33 = vmul.f32 0.055555556, %v4213_v63  ;;  %v5895_v17 = vpop.f32.mrf.mxu0  ;;  %v4212_v6 = vadd.f32 0.5, %v7391_v9 }
 0x180   : > { %8982 = vst [vmem:[#allocation17_spill] sm:$0xff] %v7377_v46  ;;  %v7408_v13 = vadd.f32 %v5892_v38, %v1830_v49  ;;  %v1829_v22 = vadd.f32 %v1774_v28, %v6929_v25  ;;  %vm7415_vm12 = vmand %vm7346_vm5, %vm8988_vm0  ;;  %v5301_v25 = vsel %vm3968_vm3, %v5300_v20, 0.0  ;;  %v4119_v38 = vfloor.f32 %v4087_v61 }
 0x181   : > { %vm7423_vm15 = vmand %vm7369_vm6, %vm8991_vm11  ;;  %v5845_v7 = vpop.f32.mrf.mxu1  ;;  %v4054_v44 = vadd.f32 0.5, %v5301_v25  ;;  %v7439_v57 = vadd.s32 %v6852_v2, %v3800_v3  ;;  %vm3892_vm3 = vcmp.lt.s32.totalorder %v7184_v11, 648  ;;  %v2174_v28 = vpop.f32.mrf.mxu0  ;;  %vm9006_vm11 = vcmp.le.f32.partialorder %v7273_v0, 16.0 }
 0x182   : > { %vm7433_vm5 = vmand %vm7384_vm14, %vm4368_vm13  ;;  %v7441_v63 = vadd.f32 %v2164_v8, %v1829_v22  ;;  %v1832_v49 = vadd.f32 %v5845_v7, %v6935_v54  ;;  %vm3860_vm13 = vcmp.ge.s32.totalorder %v7184_v11, 0  ;;  %vm8999_vm14 = vcmp.ge.s32.totalorder %v7013_v40, 0 }
 0x183   : > { %vm7448_vm6 = vmand %vm7398_vm1, %vm4497_vm7  ;;  %v1784_v20 = vpop.f32.mrf.mxu1  ;;  %v4307_v8 = vmul.f32 18.0, %v7403_v36  ;;  %vm4371_vm7 = vcmp.ge.f32.partialorder %v7403_v36, 1.0  ;;  %v4151_v5 = vmul.f32 324.0, %v4119_v38  ;;  %v4086_v61 = vmul.f32 0.0030864198, %v4054_v44  ;;  %v5898_v50 = vpop.f32.mrf.mxu0 }
 0x184   : > { %8996 = vst [vmem:[#allocation18_spill] sm:$0xff] %v7441_v63  ;;  %vm7458_vm0 = vmand %vm8999_vm14, %vm3891_vm2  ;;  %v7464_v3 = vadd.f32 %v5895_v17, %v1832_v49  ;;  %v1831_v22 = vadd.f32 %v1784_v20, %v6945_v59  ;;  %v4306_v7 = vmul.f32 18.0, %v7405_v23  ;;  %v7476_v63 = vfloor.f32 %v4245_v33 }
 0x185   : > { %vm7471_vm1 = vmand %vm7433_vm5, %vm4432_vm4  ;;  %v5848_v46 = vpop.f32.mrf.mxu1  ;;  %v4244_v33 = vmul.f32 0.055555556, %v4212_v6  ;;  %v4118_v17 = vfloor.f32 %v4086_v61  ;;  %vm3974_vm5 = vcmp.gt.s32.totalorder %v7439_v57, 0  ;;  %v5306_v34 = vcvt.s32.f32 %v7439_v57  ;;  %v2184_v49 = vpop.f32.mrf.mxu0 }
 0x186   : > { %vm7482_vm2 = vmand %vm7423_vm15, %vm4558_vm9  ;;  %v7496_v14 = vadd.f32 %v2174_v28, %v1831_v22  ;;  %v1834_v21 = vadd.f32 %v5848_v46, %v6952_v29  ;;  %vm9009_vm9 = vcmp.lt.s32.totalorder %v7042_v31, 648  ;;  %vm9010_vm15 = vcmp.ge.s32.totalorder %v7042_v31, 0  ;;  %v9030_v29 = vld [vmem:[#allocation7_spill] sm:$0xff] }
 0x187   : > { %vm7490_vm4 = vmand %vm7448_vm6, %vm9006_vm11  ;;  %v7508_v38 = vsub.f32 %v7340_v53, %v4151_v5  ;;  %v3799_v6 = vadd.s32 96, %v6841_v56  ;;  %v1794_v44 = vpop.f32.mrf.mxu1  ;;  %vm9013_vm6 = vcmp.ge.f32.partialorder %v7320_v47, 1.0  ;;  %v4339_v31 = vsub.f32 %v7249_v39, %v4307_v8  ;;  %v5953_v5 = vpop.f32.mrf.mxu0 }
 0x188   : > { %vm7503_vm14 = vmand %vm9010_vm15, %vm9009_vm9  ;;  %vm4435_vm9 = vcmp.le.f32.partialorder %v7403_v36, 16.0  ;;  %v4150_v46 = vmul.f32 324.0, %v4118_v17  ;;  %v7521_v1 = vsel %vm3974_vm5, %v5306_v34, 0.0  ;;  %v7523_v53 = vadd.f32 %v5898_v50, %v1834_v21 }
 0x189   : > { %vm7515_vm11 = vmand %vm7471_vm1, %vm9013_vm6  ;;  %v1833_v20 = vadd.f32 %v1794_v44, %v6959_v45  ;;  %vm4370_vm1 = vcmp.ge.f32.partialorder %v7405_v23, 1.0  ;;  %v4057_v39 = vadd.f32 0.5, %v7521_v1  ;;  %v5903_v8 = vpop.f32.mrf.mxu1  ;;  %v7537_v61 = vsub.f32 %v7252_v24, %v4306_v7 }
 0x18a   : > { %vm7530_vm15 = vmand %vm7458_vm0, %vm4371_vm7  ;;  %v4309_v50 = vmul.f32 18.0, %v7476_v63  ;;  %v7548_v54 = vfloor.f32 %v4244_v33  ;;  %v7550_v22 = vsub.f32 %v5301_v25, %v4150_v46  ;;  %v2584_v17 = vadd.f32 %v5903_v8, %v6970_v18  ;;  %v7569_v25 = vpop.f32.mrf.mxu0 }
 0x18b   : > { %vm7543_vm5 = vmand %vm3861_vm8, %vm3893_vm10  ;;  %v7552_v40 = vadd.f32 %v2184_v49, %v1833_v20  ;;  %vm9021_vm0 = vcmp.le.f32.partialorder %v7320_v47, 16.0  ;;  %v4215_v24 = vadd.f32 0.5, %v7508_v38  ;;  %v7565_v7 = vadd.s32 %v6852_v2, %v3799_v6  ;;  %v7567_v33 = vpop.f32.mrf.mxu1 }
 0x18c   : > { %vm7559_vm7 = vmand %vm7515_vm11, %vm9021_vm0  ;;  %v7574_v18 = vsel %vm7415_vm12, 1, %v8962_v55  ;;  %v4214_v34 = vadd.f32 0.5, %v7550_v22  ;;  %v4089_v21 = vmul.f32 0.0030864198, %v4057_v39  ;;  %v7585_v6 = vadd.f32 %v5953_v5, %v2584_v17  ;;  %v5956_v44 = vpop.f32.mrf.mxu0 }
 0x18d   : > { %9020 = vst [vmem:[#allocation19_spill] sm:$0xff] %v7552_v40  ;;  %vm7580_vm10 = vmand %vm7530_vm15, %vm4435_vm9  ;;  %vm4434_vm6 = vcmp.le.f32.partialorder %v7405_v23, 16.0  ;;  %vm3863_vm11 = vcmp.ge.s32.totalorder %v7256_v12, 0  ;;  %vm3895_vm9 = vcmp.lt.s32.totalorder %v7256_v12, 648  ;;  %v5906_v36 = vpop.f32.mrf.mxu1  ;;  %v7600_v49 = vsub.f32 %v7308_v16, %v4309_v50 }
 0x18e   : > { %vm7591_vm12 = vmand %vm7503_vm14, %vm4370_vm1  ;;  %vm4373_vm8 = vcmp.ge.f32.partialorder %v7476_v63, 1.0  ;;  %v2586_v46 = vadd.f32 %v5906_v36, %v9030_v29  ;;  %vm9031_vm1 = vcmp.ge.f32.partialorder %v4339_v31, 1.0  ;;  %v4308_v16 = vmul.f32 18.0, %v7548_v54  ;;  %v7623_v11 = vpop.f32.mrf.mxu0 }
 0x18f   : > { %vm7607_vm14 = vmand %vm3860_vm13, %vm3892_vm3  ;;  %v4247_v28 = vmul.f32 0.055555556, %v4215_v24  ;;  %vm3972_vm0 = vcmp.gt.s32.totalorder %v7565_v7, 0  ;;  %v7621_v39 = vpop.f32.mrf.mxu1  ;;  %v4246_v5 = vmul.f32 0.055555556, %v4214_v34  ;;  %v4121_v50 = vfloor.f32 %v4089_v21 }
 0x190   : > { %vm7615_vm15 = vmand %vm7580_vm10, %vm9031_vm1  ;;  %v5304_v17 = vcvt.s32.f32 %v7565_v7  ;;  %v3802_v24 = vadd.s32 120, %v6841_v56  ;;  %v7635_v47 = vadd.f32 %v5956_v44, %v2586_v46  ;;  %v7640_v36 = vsel %vm7482_vm2, 1, %v8962_v55  ;;  %v5959_v21 = vpop.f32.mrf.mxu0 }
 0x191   : > { %vm7629_vm13 = vmand %vm7591_vm12, %vm4434_vm6  ;;  %v7645_v23 = vsel %vm7490_vm4, 1, %v8962_v55  ;;  %vm4437_vm10 = vcmp.le.f32.partialorder %v7476_v63, 16.0  ;;  %v5909_v51 = vpop.f32.mrf.mxu1  ;;  %vm9040_vm4 = vcmp.le.f32.partialorder %v4339_v31, 16.0  ;;  %v4153_v60 = vmul.f32 324.0, %v4121_v50 }
 0x192   : > { %vm7651_vm3 = vmand %vm7543_vm5, %vm4373_vm8  ;;  %vm4562_vm5 = vcmp.le.f32.partialorder %v7537_v61, 16.0  ;;  %vm4372_vm8 = vcmp.ge.f32.partialorder %v7548_v54, 1.0  ;;  %v5305_v12 = vsel %vm3972_vm0, %v5304_v17, 0.0  ;;  %v2588_v44 = vadd.f32 %v5909_v51, %v6995_v15  ;;  %v7692_v50 = vpop.f32.mrf.mxu0 }
 0x193   : > { %vm7660_vm2 = vmand %vm3863_vm11, %vm3895_vm9  ;;  %vm9043_vm6 = vcmp.ge.f32.partialorder %v7537_v61, 1.0  ;;  %vm4501_vm9 = vcmp.ge.f32.partialorder %v7600_v49, 1.0  ;;  %v7686_v29 = vsub.f32 %v7391_v9, %v4308_v16  ;;  %v7688_v46 = vfloor.f32 %v4247_v28  ;;  %v7690_v20 = vpop.f32.mrf.mxu1 }
 0x194   : > { %vm7667_vm12 = vmand %vm7615_vm15, %vm9040_vm4  ;;  %v7702_v8 = vfloor.f32 %v4246_v5  ;;  %v7705_v17 = vsub.f32 %v7521_v1, %v4153_v60  ;;  %v4056_v9 = vadd.f32 0.5, %v5305_v12  ;;  %v7708_v16 = vadd.s32 %v6852_v2, %v3802_v24  ;;  %v5962_v24 = vpop.f32.mrf.mxu0 }
 0x195   : > { %vm7680_vm11 = vmand %vm7629_vm13, %vm9043_vm6  ;;  %v7710_v28 = vadd.f32 %v5959_v21, %v2588_v44  ;;  %v7715_v63 = vsel %vm7559_vm7, 1, %v8962_v55  ;;  %vm4436_vm1 = vcmp.le.f32.partialorder %v7548_v54, 16.0  ;;  %vm3862_vm13 = vcmp.ge.s32.totalorder %v7323_v42, 0  ;;  %v5912_v1 = vpop.f32.mrf.mxu1 }
 0x196   : > { %vm7698_vm15 = vmand %vm7651_vm3, %vm4437_vm10  ;;  %vm3894_vm3 = vcmp.lt.s32.totalorder %v7323_v42, 648  ;;  %v4217_v0 = vadd.f32 0.5, %v7705_v17  ;;  %v4088_v34 = vmul.f32 0.0030864198, %v4056_v9  ;;  %v3801_v51 = vadd.s32 112, %v6841_v56  ;;  %v7752_v31 = vpop.f32.mrf.mxu0 }
 0x197   : > { %9048 = vst [vmem:[#allocation7_spill] sm:$0xff] %v7710_v28  ;;  %vm7721_vm0 = vmand %vm7607_vm14, %vm4372_vm8  ;;  %v2590_v21 = vadd.f32 %v5912_v1, %v7007_v30  ;;  %vm4565_vm10 = vcmp.le.f32.partialorder %v7600_v49, 16.0  ;;  %vm4500_vm4 = vcmp.ge.f32.partialorder %v7686_v29, 1.0  ;;  %v4311_v60 = vmul.f32 18.0, %v7688_v46  ;;  %v7750_v44 = vpop.f32.mrf.mxu1 }
 0x198   : > { %vm7731_vm7 = vmand %vm7680_vm11, %vm4562_vm5  ;;  %v4310_v15 = vmul.f32 18.0, %v7702_v8  ;;  %v4120_v9 = vfloor.f32 %v4088_v34  ;;  %vm3978_vm8 = vcmp.gt.s32.totalorder %v7708_v16, 0  ;;  %v5310_v1 = vcvt.s32.f32 %v7708_v16 }
 0x199   : > { %vm7743_vm14 = vmand %vm7698_vm15, %vm4501_vm9  ;;  %v7765_v40 = vadd.f32 %v5962_v24, %v2590_v21  ;;  %v7770_v28 = vsel %vm7667_vm12, 1, %v8962_v55  ;;  %vm4375_vm6 = vcmp.ge.f32.partialorder %v7688_v46, 1.0  ;;  %vm4374_vm9 = vcmp.ge.f32.partialorder %v7702_v8, 1.0  ;;  %v5915_v5 = vpop.f32.mrf.mxu1  ;;  %v5965_v24 = vpop.f32.mrf.mxu0 }
 0x19a   : > { %vm7758_vm5 = vmand %vm7721_vm0, %vm4436_vm1  ;;  %9058 = vst [vmem:[#allocation21_spill] sm:$0xff] %v7770_v28  ;;  %v4249_v34 = vmul.f32 0.055555556, %v4217_v0  ;;  %v4152_v21 = vmul.f32 324.0, %v4120_v9  ;;  %v7791_v42 = vadd.s32 %v6852_v2, %v3801_v51  ;;  %v2592_v28 = vadd.f32 %v5915_v5, %v7025_v62 }
 0x19b   : > { %9057 = vst [vmem:[#allocation20_spill] sm:$0xff] %v7765_v40  ;;  %vm7777_vm11 = vmand %vm3862_vm13, %vm3894_vm3  ;;  %v5311_v40 = vsel %vm3978_vm8, %v5310_v1, 0.0  ;;  %vm4564_vm0 = vcmp.le.f32.partialorder %v7686_v29, 16.0  ;;  %v4343_v61 = vsub.f32 %v7508_v38, %v4311_v60  ;;  %v7804_v9 = vpop.f32.mrf.mxu1  ;;  %v7806_v1 = vpop.f32.mrf.mxu0  ;;  %v7811_v62 = vsel %vm7731_vm7, 1, %v8962_v55 }
 0x19c   : > { %vm7786_vm12 = vmand %vm7743_vm14, %vm4565_vm10  ;;  %v4059_v0 = vadd.f32 0.5, %v5311_v40  ;;  %vm4439_vm13 = vcmp.le.f32.partialorder %v7688_v46, 16.0  ;;  %v4342_v38 = vsub.f32 %v7550_v22, %v4310_v15  ;;  %v7823_v60 = vsub.f32 %v5305_v12, %v4152_v21 }
 0x19d   : > { %vm7798_vm15 = vmand %vm7758_vm5, %vm4500_vm4  ;;  %v7825_v30 = vadd.f32 %v5965_v24, %v2592_v28  ;;  %v7830_v48 = vsel %vm7786_vm12, 1, %v8962_v55  ;;  %vm4438_vm7 = vcmp.le.f32.partialorder %v7702_v8, 16.0  ;;  %v5918_v12 = vpop.f32.mrf.mxu1  ;;  %v5968_v15 = vpop.f32.mrf.mxu0  ;;  %vm3865_vm14 = vcmp.ge.s32.totalorder %v7439_v57, 0 }
 0x19e   : > { %vm7817_vm1 = vmand %vm7660_vm2, %vm4375_vm6  ;;  %9068 = vst [vmem:[#allocation23_spill] sm:$0xff] %v7830_v48  ;;  %v4091_v22 = vmul.f32 0.0030864198, %v4059_v0  ;;  %v7850_v54 = vfloor.f32 %v4249_v34  ;;  %vm3976_vm10 = vcmp.gt.s32.totalorder %v7791_v42, 0  ;;  %v3804_v5 = vadd.s32 136, %v6841_v56  ;;  %v9075_v34 = vld [vmem:[#allocation6_spill] sm:$0xff] }
 0x19f   : > { %9067 = vst [vmem:[#allocation22_spill] sm:$0xff] %v7825_v30  ;;  %vm7836_vm2 = vmand %vm7777_vm11, %vm4374_vm9  ;;  %v2594_v24 = vadd.f32 %v5918_v12, %v7063_v32  ;;  %vm4503_vm5 = vcmp.ge.f32.partialorder %v4343_v61, 1.0  ;;  %v5308_v21 = vcvt.s32.f32 %v7791_v42  ;;  %v2583_v49 = vadd.f32 %v7567_v33, %v9075_v34  ;;  %v7866_v0 = vpop.f32.mrf.mxu1  ;;  %v7868_v30 = vpop.f32.mrf.mxu0  ;;  %v9091_v34 = vld [vmem:[#allocation12_spill] sm:$0xff] }
 0x1a0   : > { %vm7845_vm3 = vmand %vm7798_vm15, %vm4564_vm0  ;;  %v4123_v45 = vfloor.f32 %v4091_v22  ;;  %vm4502_vm6 = vcmp.ge.f32.partialorder %v4342_v38, 1.0  ;;  %vm3897_vm11 = vcmp.lt.s32.totalorder %v7439_v57, 648  ;;  %v4216_v46 = vadd.f32 0.5, %v7823_v60 }
 0x1a1   : > { %vm7859_vm4 = vmand %vm7817_vm1, %vm4439_vm13  ;;  %v2585_v33 = vadd.f32 %v7621_v39, %v6985_v26  ;;  %v7882_v51 = vadd.f32 %v5968_v15, %v2594_v24  ;;  %v7886_v8 = vsel %vm3976_vm10, %v5308_v21, 0.0  ;;  %v5921_v59 = vpop.f32.mrf.mxu1  ;;  %v5971_v12 = vpop.f32.mrf.mxu0  ;;  %vm4567_vm12 = vcmp.le.f32.partialorder %v4343_v61, 16.0  ;;  %v9083_v21 = vld [vmem:[#allocation8_spill] sm:$0xff] }
 0x1a2   : > { %vm7874_vm8 = vmand %vm7836_vm2, %vm4438_vm7  ;;  %v4155_v22 = vmul.f32 324.0, %v4123_v45  ;;  %v4313_v48 = vmul.f32 18.0, %v7850_v54  ;;  %v4058_v26 = vadd.f32 0.5, %v7886_v8  ;;  %v7898_v39 = vadd.s32 %v6852_v2, %v3804_v5 }
 0x1a3   : > { %9078 = vst [vmem:[#allocation6_spill] sm:$0xff] %v7882_v51  ;;  %vm7891_vm9 = vmand %vm7859_vm4, %vm4503_vm5  ;;  %v2596_v15 = vadd.f32 %v5921_v59, %v7103_v35  ;;  %v7904_v24 = vsel %vm7845_vm3, 1, %v8962_v55  ;;  %vm4566_vm0 = vcmp.le.f32.partialorder %v4342_v38, 16.0  ;;  %v7916_v5 = vadd.f32 %v7569_v25, %v2583_v49  ;;  %v7920_v59 = vpop.f32.mrf.mxu1  ;;  %v7922_v28 = vpop.f32.mrf.mxu0 }
 0x1a4   : > { %vm7909_vm15 = vmand %vm7874_vm8, %vm4502_vm6  ;;  %v7913_v45 = vsub.f32 %v5311_v40, %v4155_v22  ;;  %v2587_v35 = vadd.f32 %v7690_v20, %v9083_v21  ;;  %vm4377_vm13 = vcmp.ge.f32.partialorder %v7850_v54, 1.0  ;;  %vm3864_vm2 = vcmp.ge.s32.totalorder %v7565_v7, 0 }
 0x1a5   : > { %vm7928_vm1 = vmand %vm3865_vm14, %vm3897_vm11  ;;  %vm3896_vm7 = vcmp.lt.s32.totalorder %v7565_v7, 648  ;;  %v4248_v40 = vmul.f32 0.055555556, %v4216_v46  ;;  %v7936_v25 = vadd.f32 %v7623_v11, %v2585_v33  ;;  %v7938_v20 = vadd.f32 %v5971_v12, %v2596_v15  ;;  %v5924_v21 = vpop.f32.mrf.mxu1  ;;  %v5974_v51 = vpop.f32.mrf.mxu0  ;;  %v9098_v11 = vld [vmem:[#allocation10_spill] sm:$0xff] }
 0x1a6   : > { %vm7943_vm3 = vmand %vm7891_vm9, %vm4567_vm12  ;;  %v4219_v49 = vadd.f32 0.5, %v7913_v45  ;;  %v4090_v22 = vmul.f32 0.0030864198, %v4058_v26  ;;  %v4345_v61 = vsub.f32 %v7705_v17, %v4313_v48  ;;  %vm3982_vm10 = vcmp.gt.s32.totalorder %v7898_v39, 0 }
 0x1a7   : > { %9086 = vst [vmem:[#allocation8_spill] sm:$0xff] %v7938_v20  ;;  %vm7951_vm14 = vmand %vm7909_vm15, %vm4566_vm0  ;;  %v5314_v46 = vcvt.s32.f32 %v7898_v39  ;;  %v3803_v33 = vadd.s32 128, %v6841_v56  ;;  %v2589_v12 = vadd.f32 %v7750_v44, %v7016_v27  ;;  %v2598_v26 = vadd.f32 %v5924_v21, %v9091_v34  ;;  %v7974_v15 = vpop.f32.mrf.mxu1  ;;  %v7976_v29 = vpop.f32.mrf.mxu0  ;;  %v9096_v34 = vld [vmem:[#allocation9_spill] sm:$0xff] }
 0x1a8   : > { %vm7966_vm4 = vmand %vm7928_vm1, %vm4377_vm13  ;;  %vm4441_vm5 = vcmp.le.f32.partialorder %v7850_v54, 16.0  ;;  %v4122_v17 = vfloor.f32 %v4090_v22  ;;  %v7972_v48 = vadd.f32 %v7692_v50, %v2587_v35  ;;  %v7981_v27 = vsel %vm7943_vm3, 1, %v8962_v55 }
 0x1a9   : > { %9094 = vst [vmem:[#allocation12_spill] sm:$0xff] %v7981_v27  ;;  %v7983_v44 = vfloor.f32 %v4248_v40  ;;  %v7985_v32 = vsel %vm3982_vm10, %v5314_v46, 0.0  ;;  %v7987_v21 = vadd.f32 %v5974_v51, %v2598_v26  ;;  %vm3867_vm8 = vcmp.ge.s32.totalorder %v7708_v16, 0  ;;  %v5927_v20 = vpop.f32.mrf.mxu1  ;;  %v5977_v27 = vpop.f32.mrf.mxu0  ;;  %vm4473_vm11 = vmand %vm7966_vm4, %vm4441_vm5 }
 0x1aa   : > { %vm3899_vm6 = vcmp.lt.s32.totalorder %v7708_v16, 648  ;;  %v4251_v50 = vmul.f32 0.055555556, %v4219_v49  ;;  %v4154_v35 = vmul.f32 324.0, %v4122_v17  ;;  %v7992_v22 = vadd.s32 %v6852_v2, %v3803_v33  ;;  %vm8042_vm3 = vmand %vm3864_vm2, %vm3896_vm7 }
 0x1ab   : > { %9095 = vst [vmem:[#allocation24_spill] sm:$0xff] %v7987_v21  ;;  %v2591_v57 = vadd.f32 %v7804_v9, %v9096_v34  ;;  %v7999_v40 = vsel %vm7951_vm14, 1, %v8962_v55  ;;  %vm4505_vm9 = vcmp.ge.f32.partialorder %v4345_v61, 1.0  ;;  %v4061_v51 = vadd.f32 0.5, %v7985_v32  ;;  %v8014_v33 = vpop.f32.mrf.mxu1  ;;  %v8016_v54 = vpop.f32.mrf.mxu0 }
 0x1ac   : > { %9097 = vst [vmem:[#allocation9_spill] sm:$0xff] %v7999_v40  ;;  %v8007_v49 = vadd.f32 %v7752_v31, %v2589_v12  ;;  %v2600_v9 = vadd.f32 %v5927_v20, %v7186_v37  ;;  %vm3866_vm12 = vcmp.ge.s32.totalorder %v7791_v42, 0  ;;  %vm3898_vm15 = vcmp.lt.s32.totalorder %v7791_v42, 648  ;;  %vm8024_vm1 = vmand %vm4473_vm11, %vm4505_vm9 }
 0x1ad   : > { %v2593_v46 = vadd.f32 %v7866_v0, %v9098_v11  ;;  %vm4569_vm0 = vcmp.le.f32.partialorder %v4345_v61, 16.0  ;;  %v4312_v26 = vmul.f32 18.0, %v7983_v44  ;;  %v8020_v38 = vsub.f32 %v7886_v8, %v4154_v35  ;;  %v5930_v17 = vpop.f32.mrf.mxu1  ;;  %v5980_v34 = vpop.f32.mrf.mxu0  ;;  %vm8103_vm9 = vmand %vm3867_vm8, %vm3899_vm6 }
 0x1ae   : > { %v8022_v31 = vadd.f32 %v5977_v27, %v2600_v9  ;;  %v8028_v20 = vfloor.f32 %v4251_v50  ;;  %v4093_v12 = vmul.f32 0.0030864198, %v4061_v51  ;;  %vm3980_vm13 = vcmp.gt.s32.totalorder %v7992_v22, 0  ;;  %vm8056_vm5 = vmand %vm8024_vm1, %vm4569_vm0 }
 0x1af   : > { %v8032_v0 = vadd.f32 %v7806_v1, %v2591_v57  ;;  %v4218_v11 = vadd.f32 0.5, %v8020_v38  ;;  %v5312_v8 = vcvt.s32.f32 %v7992_v22  ;;  %v3806_v27 = vadd.s32 152, %v6841_v56  ;;  %v8049_v1 = vpop.f32.mrf.mxu1  ;;  %v8051_v57 = vpop.f32.mrf.mxu0  ;;  %vm8129_vm6 = vmand %vm3866_vm12, %vm3898_vm15 }
 0x1b0   : > { %9099 = vst [vmem:[#allocation10_spill] sm:$0xff] %v8022_v31  ;;  %v2602_v35 = vadd.f32 %v5930_v17, %v7215_v19  ;;  %vm4376_vm14 = vcmp.ge.f32.partialorder %v7983_v44, 1.0  ;;  %vm3869_vm10 = vcmp.ge.s32.totalorder %v7898_v39, 0  ;;  %vm3901_vm4 = vcmp.lt.s32.totalorder %v7898_v39, 648 }
 0x1b1   : > { %9102 = vst [vmem:[#allocation25_spill] sm:$0xff] %v8032_v0  ;;  %v8061_v7 = vsub.f32 %v7823_v60, %v4312_v26  ;;  %v4250_v51 = vmul.f32 0.055555556, %v4218_v11  ;;  %v4125_v9 = vfloor.f32 %v4093_v12  ;;  %v5313_v17 = vsel %vm3980_vm13, %v5312_v8, 0.0  ;;  %v5933_v0 = vpop.f32.mrf.mxu1  ;;  %v5983_v40 = vpop.f32.mrf.mxu0  ;;  %vm8075_vm2 = vmand %vm8042_vm3, %vm4376_vm14 }
 0x1b2   : > { %v8066_v31 = vadd.f32 %v7868_v30, %v2593_v46  ;;  %v8068_v21 = vadd.f32 %v5980_v34, %v2602_v35  ;;  %v4315_v61 = vmul.f32 18.0, %v8028_v20  ;;  %v4060_v37 = vadd.f32 0.5, %v5313_v17  ;;  %v9110_v35 = vld [vmem:[#allocation11_spill] sm:$0xff] }
 0x1b3   : > { %vm4440_vm7 = vcmp.le.f32.partialorder %v7983_v44, 16.0  ;;  %v4157_v26 = vmul.f32 324.0, %v4125_v9  ;;  %v8081_v30 = vadd.s32 %v6852_v2, %v3806_v27  ;;  %v3805_v46 = vadd.s32 144, %v6841_v56  ;;  %v8096_v9 = vpop.f32.mrf.mxu0 }
 0x1b4   : > { %9107 = vst [vmem:[#allocation26_spill] sm:$0xff] %v8068_v21  ;;  %v2604_v12 = vadd.f32 %v5933_v0, %v7258_v43  ;;  %v8088_v34 = vsel %vm8056_vm5, 1, %v8962_v55  ;;  %v8090_v11 = vfloor.f32 %v4250_v51  ;;  %v4092_v8 = vmul.f32 0.0030864198, %v4060_v37  ;;  %v8094_v21 = vpop.f32.mrf.mxu1  ;;  %vm8117_vm1 = vmand %vm8075_vm2, %vm4440_vm7 }
 0x1b5   : > { %v2595_v50 = vadd.f32 %v7920_v59, %v9110_v35  ;;  %vm4504_vm11 = vcmp.ge.f32.partialorder %v8061_v7, 1.0  ;;  %vm4379_vm0 = vcmp.ge.f32.partialorder %v8028_v20, 1.0  ;;  %v8109_v0 = vsub.f32 %v7985_v32, %v4157_v26  ;;  %v5986_v37 = vpop.f32.mrf.mxu0  ;;  %vm8174_vm2 = vmand %vm3869_vm10, %vm3901_vm4 }
 0x1b6   : > { %v8111_v59 = vadd.f32 %v5983_v40, %v2604_v12  ;;  %vm4568_vm8 = vcmp.le.f32.partialorder %v8061_v7, 16.0  ;;  %v8123_v16 = vsub.f32 %v7913_v45, %v4315_v61  ;;  %v4124_v19 = vfloor.f32 %v4092_v8  ;;  %v5936_v51 = vpop.f32.mrf.mxu1  ;;  %vm8144_vm3 = vmand %vm8103_vm9, %vm4379_vm0  ;;  %v9120_v12 = vld [vmem:[#allocation13_spill] sm:$0xff] }
 0x1b7   : > { %v4221_v32 = vadd.f32 0.5, %v8109_v0  ;;  %vm3986_vm13 = vcmp.gt.s32.totalorder %v8081_v30, 0  ;;  %v5318_v40 = vcvt.s32.f32 %v8081_v30  ;;  %v8137_v45 = vadd.s32 %v6852_v2, %v3805_v46  ;;  %v8154_v35 = vpop.f32.mrf.mxu0  ;;  %vm8160_vm15 = vmand %vm8117_vm1, %vm4504_vm11 }
 0x1b8   : > { %9113 = vst [vmem:[#allocation11_spill] sm:$0xff] %v8111_v59  ;;  %v2606_v61 = vadd.f32 %v5936_v51, %v7294_v58  ;;  %vm4443_vm12 = vcmp.le.f32.partialorder %v8028_v20, 16.0  ;;  %v4314_v60 = vmul.f32 18.0, %v8090_v11  ;;  %v4156_v26 = vmul.f32 324.0, %v4124_v19  ;;  %v8152_v46 = vpop.f32.mrf.mxu1  ;;  %vm8195_vm4 = vmand %vm8160_vm15, %vm4568_vm8 }
 0x1b9   : > { %v2597_v8 = vadd.f32 %v7974_v15, %v9120_v12  ;;  %v4253_v43 = vmul.f32 0.055555556, %v4221_v32  ;;  %vm3868_vm14 = vcmp.ge.s32.totalorder %v7992_v22, 0  ;;  %v8165_v51 = vsel %vm3986_vm13, %v5318_v40, 0.0  ;;  %v5989_v59 = vpop.f32.mrf.mxu0  ;;  %vm8183_vm7 = vmand %vm8144_vm3, %vm4443_vm12 }
 0x1ba   : > { %v8167_v19 = vadd.f32 %v5986_v37, %v2606_v61  ;;  %vm4378_vm5 = vcmp.ge.f32.partialorder %v8090_v11, 1.0  ;;  %v4188_v27 = vsub.f32 %v5313_v17, %v4156_v26  ;;  %v4063_v12 = vadd.f32 0.5, %v8165_v51  ;;  %v5939_v32 = vpop.f32.mrf.mxu1 }
 0x1bb   : > { %vm4507_vm11 = vcmp.ge.f32.partialorder %v8123_v16, 1.0  ;;  %v4285_v39 = vfloor.f32 %v4253_v43  ;;  %vm3900_vm10 = vcmp.lt.s32.totalorder %v7992_v22, 648  ;;  %v5316_v40 = vcvt.s32.f32 %v8137_v45  ;;  %v9130_v43 = vld [vmem:[#allocation15_spill] sm:$0xff]  ;;  %v8208_v7 = vpop.f32.mrf.mxu0  ;;  %vm8214_vm0 = vmand %vm8129_vm6, %vm4378_vm5 }
 0x1bc   : > { %9123 = vst [vmem:[#allocation13_spill] sm:$0xff] %v8167_v19  ;;  %v2608_v17 = vadd.f32 %v5939_v32, %v7353_v41  ;;  %v4346_v61 = vsub.f32 %v8020_v38, %v4314_v60  ;;  %v4220_v42 = vadd.f32 0.5, %v4188_v27  ;;  %vm3984_vm9 = vcmp.gt.s32.totalorder %v8137_v45, 0  ;;  %v8206_v41 = vpop.f32.mrf.mxu1  ;;  %vm8225_vm8 = vmand %vm8183_vm7, %vm4507_vm11 }
 0x1bd   : > { %v8202_v26 = vadd.f32 %v7922_v28, %v2595_v50  ;;  %v2599_v19 = vadd.f32 %v8014_v33, %v9130_v43  ;;  %vm4442_vm1 = vcmp.le.f32.partialorder %v8090_v11, 16.0  ;;  %v4317_v38 = vmul.f32 18.0, %v4285_v39  ;;  %v5992_v43 = vpop.f32.mrf.mxu0  ;;  %vm8237_vm3 = vmand %vm3868_vm14, %vm3900_vm10 }
 0x1be   : > { %v8219_v28 = vadd.f32 %v5989_v59, %v2608_v17  ;;  %vm4571_vm13 = vcmp.le.f32.partialorder %v8123_v16, 16.0  ;;  %v4252_v50 = vmul.f32 0.055555556, %v4220_v42  ;;  %v4095_v44 = vmul.f32 0.0030864198, %v4063_v12  ;;  %v5942_v32 = vpop.f32.mrf.mxu1  ;;  %vm8251_vm12 = vmand %vm8214_vm0, %vm4442_vm1 }
 0x1bf   : > { %v8231_v60 = vadd.f32 %v7976_v29, %v2597_v8  ;;  %vm4381_vm6 = vcmp.ge.f32.partialorder %v4285_v39, 1.0  ;;  %v8243_v37 = vsel %vm3984_vm9, %v5316_v40, 0.0  ;;  %v3808_v12 = vadd.s32 168, %v6841_v56  ;;  %vm8271_vm14 = vmand %vm8225_vm8, %vm4571_vm13 }
 0x1c0   : > { %9133 = vst [vmem:[#allocation15_spill] sm:$0xff] %v8219_v28  ;;  %v2610_v29 = vadd.f32 %v5942_v32, %v7408_v13  ;;  %vm4506_vm15 = vcmp.ge.f32.partialorder %v4346_v61, 1.0  ;;  %v4284_v22 = vfloor.f32 %v4252_v50  ;;  %v4127_v17 = vfloor.f32 %v4095_v44  ;;  %v8258_v40 = vpop.f32.mrf.mxu1  ;;  %v8260_v28 = vpop.f32.mrf.mxu0  ;;  %vm8284_vm5 = vmand %vm8174_vm2, %vm4381_vm6 }
 0x1c1   : > { %v8256_v42 = vadd.f32 %v8016_v54, %v2599_v19  ;;  %v8265_v13 = vsel %vm8195_vm4, 1, %v8962_v55  ;;  %v8276_v54 = vsub.f32 %v8109_v0, %v4317_v38  ;;  %v4062_v19 = vadd.f32 0.5, %v8243_v37  ;;  %vm8291_vm10 = vmand %vm8251_vm12, %vm4506_vm15 }
 0x1c2   : > { %v8279_v58 = vadd.f32 %v5992_v43, %v2610_v29  ;;  %vm4445_vm7 = vcmp.le.f32.partialorder %v4285_v39, 16.0  ;;  %v4316_v16 = vmul.f32 18.0, %v4284_v22  ;;  %vm4380_vm11 = vcmp.ge.f32.partialorder %v4284_v22, 1.0  ;;  %v5945_v33 = vpop.f32.mrf.mxu1  ;;  %v5995_v50 = vpop.f32.mrf.mxu0 }
 0x1c3   : > { %vm4570_vm4 = vcmp.le.f32.partialorder %v4346_v61, 16.0  ;;  %v4159_v38 = vmul.f32 324.0, %v4127_v17  ;;  %v4094_v44 = vmul.f32 0.0030864198, %v4062_v19  ;;  %v8296_v15 = vadd.s32 %v6852_v2, %v3808_v12  ;;  %vm8303_vm2 = vmand %vm8237_vm3, %vm4380_vm11 }
 0x1c4   : > { %9142 = vst [vmem:[#allocation27_spill] sm:$0xff] %v8279_v58  ;;  %v2601_v32 = vadd.f32 %v8049_v1, %v7230_v10  ;;  %v2612_v43 = vadd.f32 %v5945_v33, %v7464_v3  ;;  %v4348_v29 = vsub.f32 %v4188_v27, %v4316_v16  ;;  %vm4444_vm9 = vcmp.le.f32.partialorder %v4284_v22, 16.0  ;;  %v8309_v19 = vpop.f32.mrf.mxu1  ;;  %v8311_v12 = vpop.f32.mrf.mxu0  ;;  %v9149_v58 = vld [vmem:[#allocation14_spill] sm:$0xff]  ;;  %vm8317_vm1 = vmand %vm8284_vm5, %vm4445_vm7 }
 0x1c5   : > { %v2603_v17 = vadd.f32 %v8094_v21, %v7278_v52  ;;  %vm4654_vm0 = vcmp.eq.s32.totalorder %v9149_v58, 1  ;;  %vm4509_vm8 = vcmp.ge.f32.partialorder %v8276_v54, 1.0  ;;  %v8323_v3 = vsub.f32 %v8165_v51, %v4159_v38  ;;  %vm8330_vm13 = vmand %vm8291_vm10, %vm4570_vm4  ;;  %v9169_v21 = vld [vmem:[#allocation18_spill] sm:$0xff] }
 0x1c6   : > { %v4126_v1 = vfloor.f32 %v4094_v44  ;;  %v8325_v52 = vadd.f32 %v5995_v50, %v2612_v43  ;;  %vm4508_vm6 = vcmp.ge.f32.partialorder %v4348_v29, 1.0  ;;  %vm3871_vm3 = vcmp.ge.s32.totalorder %v8081_v30, 0  ;;  %v5948_v27 = vpop.f32.mrf.mxu1  ;;  %v5998_v39 = vpop.f32.mrf.mxu0  ;;  %vm8340_vm5 = vmand %vm8303_vm2, %vm4444_vm9 }
 0x1c7   : > { %vm3903_vm12 = vcmp.lt.s32.totalorder %v8081_v30, 648  ;;  %vm4653_vm15 = vcmp.eq.s32.totalorder %v7221_v4, 1  ;;  %v4223_v61 = vadd.f32 0.5, %v8323_v3  ;;  %vm3990_vm7 = vcmp.gt.s32.totalorder %v8296_v15, 0  ;;  %vm8360_vm10 = vmand %vm8317_vm1, %vm4509_vm8 }
 0x1c8   : > { %v4158_v59 = vmul.f32 324.0, %v4126_v1  ;;  %v5322_v20 = vcvt.s32.f32 %v8296_v15  ;;  %v8348_v16 = vadd.f32 %v8051_v57, %v2601_v32  ;;  %v2614_v33 = vadd.f32 %v5948_v27, %v7523_v53  ;;  %v8368_v53 = vpop.f32.mrf.mxu1  ;;  %v8370_v0 = vpop.f32.mrf.mxu0  ;;  %vm8377_vm2 = vmand %vm3871_vm3, %vm3903_vm12  ;;  %v9162_v32 = vld [vmem:[#allocation16_spill] sm:$0xff] }
 0x1c9   : > { %vm4717_vm11 = vcmask 261120   ;;  %v8354_v22 = vsel %vm8271_vm14, 1, %v8962_v55  ;;  %vm4573_vm4 = vcmp.le.f32.partialorder %v8276_v54, 16.0  ;;  %v8366_v57 = vadd.f32 %v8096_v9, %v2603_v17  ;;  %9158 = vst [vmem:[#allocation14_spill] sm:$0xff] %v8368_v53  ;;  %9159 = vst [vmem:[#allocation28_spill] sm:$0xff] %v8370_v0 }
 0x1ca   : > { %vm4656_vm14 = vcmp.eq.s32.totalorder %v7574_v18, 1  ;;  %v4255_v38 = vmul.f32 0.055555556, %v4223_v61  ;;  %v8382_v44 = vsub.f32 %v8243_v37, %v4158_v59  ;;  %v8384_v9 = vsel %vm3990_vm7, %v5322_v20, 0.0  ;;  %vm8395_vm9 = vmand %vm8340_vm5, %vm4508_vm6  ;;  %v6003_v37 = vpop.f32.mrf.mxu1  ;;  %v6053_v10 = vpop.f32.mrf.mxu0  ;;  %v9168_v61 = vld [vmem:[#allocation17_spill] sm:$0xff] }
 0x1cb   : > { %v8388_v43 = vadd.f32 %v8152_v46, %v9162_v32  ;;  %v8390_v8 = vadd.f32 %v5998_v39, %v2614_v33  ;;  %vm4572_vm1 = vcmp.le.f32.partialorder %v4348_v29, 16.0  ;;  %v4065_v17 = vadd.f32 0.5, %v8384_v9  ;;  %vm8410_vm6 = vmand %vm8360_vm10, %vm4573_vm4 }
 0x1cc   : > { %vm4655_vm8 = vcmp.eq.s32.totalorder %v7640_v36, 1  ;;  %v8404_v46 = vsel %vm8330_vm13, 1, %v8962_v55  ;;  %v4287_v27 = vfloor.f32 %v4255_v38  ;;  %v4222_v39 = vadd.f32 0.5, %v8382_v44  ;;  %v3204_v50 = vpop.f32.mrf.mxu1  ;;  %v3594_v32 = vpop.f32.mrf.mxu0  ;;  %vm8429_vm3 = vmand %vm8395_vm9, %vm4572_vm1 }
 0x1cd   : > { %9163 = vst [vmem:[#allocation16_spill] sm:$0xff] %v8390_v8  ;;  %v3807_v51 = vadd.s32 160, %v6841_v56  ;;  %v8418_v59 = vadd.f32 %v8206_v41, %v9168_v61  ;;  %v8422_v20 = vadd.f32 %v8258_v40, %v9169_v21  ;;  %v3364_v54 = vadd.f32 %v6003_v37, %v7585_v6 }
 0x1ce   : > { %v4097_v33 = vmul.f32 0.0030864198, %v4065_v17  ;;  %vm4658_vm13 = vcmp.eq.s32.totalorder %v7645_v23, 1  ;;  %v4319_v41 = vmul.f32 18.0, %v4287_v27  ;;  %vm4383_vm12 = vcmp.ge.f32.partialorder %v4287_v27, 1.0  ;;  %v6006_v17 = vpop.f32.mrf.mxu1  ;;  %v6056_v37 = vpop.f32.mrf.mxu0 }
 0x1cf   : > { %vm4447_vm5 = vcmp.le.f32.partialorder %v4287_v27, 16.0  ;;  %v4254_v61 = vmul.f32 0.055555556, %v4222_v39  ;;  %v3754_v40 = vadd.f32 %v6053_v10, %v3364_v54  ;;  %v3363_v21 = vadd.f32 %v3204_v50, %v7916_v5  ;;  %vm4415_vm7 = vmand %vm8377_vm2, %vm4383_vm12  ;;  %v9174_v50 = vld [vmem:[#allocation21_spill] sm:$0xff] }
 0x1d0   : > { %v8437_v6 = vsel %vm8410_vm6, 1, %v8962_v55  ;;  %v4129_v29 = vfloor.f32 %v4097_v33  ;;  %v8443_v30 = vadd.f32 %v8309_v19, %v7496_v14  ;;  %vm4657_vm10 = vcmp.eq.s32.totalorder %v7715_v63, 1  ;;  %vm8447_vm4 = vmand %vm4415_vm7, %vm4447_vm5  ;;  %v3214_v54 = vpop.f32.mrf.mxu1  ;;  %v3604_v33 = vpop.f32.mrf.mxu0  ;;  %v9183_v63 = vld [vmem:[#allocation9_spill] sm:$0xff] }
 0x1d1   : > { %v4351_v10 = vsub.f32 %v8323_v3, %v4319_v41  ;;  %vm3870_vm9 = vcmp.ge.s32.totalorder %v8137_v45, 0  ;;  %vm3902_vm1 = vcmp.lt.s32.totalorder %v8137_v45, 648  ;;  %v8453_v11 = vfloor.f32 %v4254_v61 }
 0x1d2   : > { %v8456_v1 = vadd.s32 %v6852_v2, %v3807_v51  ;;  %v4686_v14 = vsel %vm4654_vm0, %v3754_v40, 0.0  ;;  %v3753_v19 = vadd.f32 %v3594_v32, %v3363_v21  ;;  %v3366_v27 = vadd.f32 %v6006_v17, %v7635_v47  ;;  %v6009_v21 = vpop.f32.mrf.mxu1  ;;  %v6059_v17 = vpop.f32.mrf.mxu0 }
 0x1d3   : > { %v8462_v3 = vadd.s32 184, %v6841_v56  ;;  %v4788_v39 = vmul.f32 %v4686_v14, %v4686_v14  ;;  %vm4660_vm2 = vcmp.eq.s32.totalorder %v9174_v50, 1  ;;  %v8468_v41 = vsel %vm8429_vm3, 1, %v8962_v55 }
 0x1d4   : > { %vm4511_vm6 = vcmp.ge.f32.partialorder %v4351_v10, 1.0  ;;  %vm4575_vm12 = vcmp.le.f32.partialorder %v4351_v10, 16.0  ;;  %v4685_v58 = vsel %vm4653_vm15, %v3753_v19, 0.0  ;;  %v3756_v51 = vadd.f32 %v6056_v37, %v3366_v27 }
 0x1d5   : > { %v3365_v47 = vadd.f32 %v3214_v54, %v7936_v25  ;;  %vm4543_vm0 = vmand %vm8447_vm4, %vm4511_vm6  ;;  %v8475_v32 = vmul.f32 324.0, %v4129_v29  ;;  %v4719_v61 = vsel %vm4717_vm11, %v4686_v14, 0.0  ;;  %v4718_v40 = vsel %vm4717_vm11, %v4685_v58, 0.0  ;;  %v9175_v25 = vld [vmem:[#allocation7_spill] sm:$0xff]  ;;  %v3224_v54 = vpop.f32.mrf.mxu1 }
 0x1d6   : > { %v4787_v38 = vmul.f32 %v4685_v58, %v4685_v58  ;;  %v4318_v8 = vmul.f32 18.0, %v8453_v11  ;;  %v4720_v0 = vadd.f32 %v4719_v61, %v4718_v40  ;;  %v4688_v4 = vsel %vm4656_vm14, %v3756_v51, 0.0  ;;  %vm8485_vm3 = vmand %vm4543_vm0, %vm4575_vm12  ;;  %v3614_v58 = vpop.f32.mrf.mxu0  ;;  %v9178_v61 = vld [vmem:[#allocation23_spill] sm:$0xff] }
 0x1d7   : > { %v3755_v37 = vadd.f32 %v3604_v33, %v3365_v47  ;;  %v3368_v19 = vadd.f32 %v6009_v21, %v9175_v25  ;;  %vm4659_vm15 = vcmp.eq.s32.totalorder %v7811_v62, 1  ;;  %v4820_v5 = vsel %vm4717_vm11, %v4788_v39, 0.0 }
 0x1d8   : > { %v4819_v14 = vsel %vm4717_vm11, %v4787_v38, 0.0  ;;  %v4790_v27 = vmul.f32 %v4688_v4, %v4688_v4  ;;  %vm4662_vm5 = vcmp.eq.s32.totalorder %v9178_v61, 1  ;;  %vm4382_vm14 = vcmp.ge.f32.partialorder %v8453_v11, 1.0  ;;  %v6012_v38 = vpop.f32.mrf.mxu1  ;;  %v6062_v21 = vpop.f32.mrf.mxu0 }
 0x1d9   : > { %v4821_v18 = vadd.f32 %v4820_v5, %v4819_v14  ;;  %v4687_v33 = vsel %vm4655_vm8, %v3755_v37, 0.0  ;;  %v3758_v10 = vadd.f32 %v6059_v17, %v3368_v19  ;;  %v3367_v51 = vadd.f32 %v3224_v54, %v7972_v48  ;;  %v9179_v17 = vld [vmem:[#allocation20_spill] sm:$0xff] }
 0x1da   : > { %v4723_v47 = vsel %vm4717_vm11, %v4688_v4, 0.0  ;;  %v4721_v39 = vsel %vm4717_vm11, %v4687_v33, 0.0  ;;  %v4789_v40 = vmul.f32 %v4687_v33, %v4687_v33  ;;  %v8501_v25 = vsel %vm8485_vm3, 1, %v8962_v55  ;;  %v3234_v54 = vpop.f32.mrf.mxu1  ;;  %v3624_v29 = vpop.f32.mrf.mxu0 }
 0x1db   : > { %v4722_v53 = vadd.f32 %v4721_v39, %v4720_v0  ;;  %v4690_v36 = vsel %vm4658_vm13, %v3758_v10, 0.0  ;;  %v3757_v37 = vadd.f32 %v3614_v58, %v3367_v51  ;;  %v3370_v19 = vadd.f32 %v6012_v38, %v9179_v17  ;;  %vm8516_vm13 = vmand %vm3870_vm9, %vm3902_vm1  ;;  %v9182_v38 = vld [vmem:[#allocation12_spill] sm:$0xff] }
 0x1dc   : > { %vm4661_vm8 = vcmp.eq.s32.totalorder %v7904_v24, 1  ;;  %v4824_v48 = vsel %vm4717_vm11, %v4790_v27, 0.0  ;;  %v4822_v4 = vsel %vm4717_vm11, %v4789_v40, 0.0  ;;  %v4727_v5 = vsel %vm4717_vm11, %v4690_v36, 0.0  ;;  %v6015_v40 = vpop.f32.mrf.mxu1  ;;  %vm8534_vm4 = vmand %vm8516_vm13, %vm4382_vm14 }
 0x1dd   : > { %v4792_v14 = vmul.f32 %v4690_v36, %v4690_v36  ;;  %v4823_v33 = vadd.f32 %v4822_v4, %v4821_v18  ;;  %v4689_v0 = vsel %vm4657_vm10, %v3757_v37, 0.0  ;;  %v4724_v23 = vadd.f32 %v4723_v47, %v4722_v53  ;;  %v6065_v18 = vpop.f32.mrf.mxu0  ;;  %v9184_v36 = vld [vmem:[#allocation22_spill] sm:$0xff] }
 0x1de   : > { %v3760_v10 = vadd.f32 %v6062_v21, %v3370_v19  ;;  %v4725_v27 = vsel %vm4717_vm11, %v4689_v0, 0.0  ;;  %v4791_v51 = vmul.f32 %v4689_v0, %v4689_v0  ;;  %v3369_v39 = vadd.f32 %v3234_v54, %v8007_v49  ;;  %v3244_v54 = vpop.f32.mrf.mxu1 }
 0x1df   : > { %vm4664_vm7 = vcmp.eq.s32.totalorder %v9182_v38, 1  ;;  %vm4663_vm10 = vcmp.eq.s32.totalorder %v9183_v63, 1  ;;  %v4350_v53 = vsub.f32 %v8382_v44, %v4318_v8  ;;  %v4726_v47 = vadd.f32 %v4725_v27, %v4724_v23  ;;  %v3634_v0 = vpop.f32.mrf.mxu0 }
 0x1e0   : > { %v4825_v21 = vadd.f32 %v4824_v48, %v4823_v33  ;;  %v4692_v45 = vsel %vm4660_vm2, %v3760_v10, 0.0  ;;  %v3372_v37 = vadd.f32 %v6015_v40, %v9184_v36  ;;  %v4828_v17 = vsel %vm4717_vm11, %v4792_v14, 0.0  ;;  %v9187_v33 = vld [vmem:[#allocation25_spill] sm:$0xff]  ;;  %v6018_v10 = vpop.f32.mrf.mxu1 }
 0x1e1   : > { %v4826_v19 = vsel %vm4717_vm11, %v4791_v51, 0.0  ;;  %v4794_v49 = vmul.f32 %v4692_v45, %v4692_v45  ;;  %v3759_v4 = vadd.f32 %v3624_v29, %v3369_v39  ;;  %v4728_v50 = vadd.f32 %v4727_v5, %v4726_v47  ;;  %v6068_v27 = vpop.f32.mrf.mxu0 }
 0x1e2   : > { %v4827_v8 = vadd.f32 %v4826_v19, %v4825_v21  ;;  %v3762_v48 = vadd.f32 %v6065_v18, %v3372_v37  ;;  %v3371_v23 = vadd.f32 %v3244_v54, %v9187_v33  ;;  %v4731_v14 = vsel %vm4717_vm11, %v4692_v45, 0.0  ;;  %v3254_v21 = vpop.f32.mrf.mxu1  ;;  %v9190_v37 = vld [vmem:[#allocation6_spill] sm:$0xff] }
 0x1e3   : > { %v4691_v29 = vsel %vm4659_vm15, %v3759_v4, 0.0  ;;  %vm4666_vm9 = vcmp.eq.s32.totalorder %v8088_v34, 1  ;;  %vm4665_vm1 = vcmp.eq.s32.totalorder %v8265_v13, 1  ;;  %vm4446_vm2 = vcmp.le.f32.partialorder %v8453_v11, 16.0  ;;  %v3644_v45 = vpop.f32.mrf.mxu0 }
 0x1e4   : > { %vm4510_vm6 = vcmp.ge.f32.partialorder %v4350_v53, 1.0  ;;  %v4729_v58 = vsel %vm4717_vm11, %v4691_v29, 0.0  ;;  %v4793_v5 = vmul.f32 %v4691_v29, %v4691_v29  ;;  %v4829_v51 = vadd.f32 %v4828_v17, %v4827_v8  ;;  %vm4478_vm12 = vmand %vm8534_vm4, %vm4446_vm2 }
 0x1e5   : > { %v4694_v39 = vsel %vm4662_vm5, %v3762_v48, 0.0  ;;  %v4832_v62 = vsel %vm4717_vm11, %v4794_v49, 0.0  ;;  %v4730_v40 = vadd.f32 %v4729_v58, %v4728_v50  ;;  %v3761_v47 = vadd.f32 %v3634_v0, %v3371_v23  ;;  %vm8551_vm0 = vmand %vm4478_vm12, %vm4510_vm6  ;;  %v6021_v0 = vpop.f32.mrf.mxu1  ;;  %v6071_v44 = vpop.f32.mrf.mxu0 }
 0x1e6   : > { %v4796_v18 = vmul.f32 %v4694_v39, %v4694_v39  ;;  %v4830_v36 = vsel %vm4717_vm11, %v4793_v5, 0.0  ;;  %v3374_v17 = vadd.f32 %v6018_v10, %v9190_v37  ;;  %v3373_v61 = vadd.f32 %v3254_v21, %v8066_v31 }
 0x1e7   : > { %vm4574_vm15 = vcmp.le.f32.partialorder %v4350_v53, 16.0  ;;  %v4831_v19 = vadd.f32 %v4830_v36, %v4829_v51  ;;  %v4735_v4 = vsel %vm4717_vm11, %v4694_v39, 0.0  ;;  %v4693_v49 = vsel %vm4661_vm8, %v3761_v47, 0.0  ;;  %v3264_v10 = vpop.f32.mrf.mxu1  ;;  %v3654_v58 = vpop.f32.mrf.mxu0 }
 0x1e8   : > { %v4732_v54 = vadd.f32 %v4731_v14, %v4730_v40  ;;  %vm4668_vm3 = vcmp.eq.s32.totalorder %v8354_v22, 1  ;;  %vm4667_vm5 = vcmp.eq.s32.totalorder %v8404_v46, 1  ;;  %v4733_v8 = vsel %vm4717_vm11, %v4693_v49, 0.0  ;;  %vm8566_vm14 = vmand %vm8551_vm0, %vm4574_vm15  ;;  %v9193_v14 = vld [vmem:[#allocation8_spill] sm:$0xff]  ;;  %v9196_v46 = vld [vmem:[#allocation26_spill] sm:$0xff] }
 0x1e9   : > { %v4795_v50 = vmul.f32 %v4693_v49, %v4693_v49  ;;  %v3764_v48 = vadd.f32 %v6068_v27, %v3374_v17  ;;  %v3763_v33 = vadd.f32 %v3644_v45, %v3373_v61  ;;  %v4836_v24 = vsel %vm4717_vm11, %v4796_v18, 0.0  ;;  %v6024_v18 = vpop.f32.mrf.mxu1  ;;  %v6074_v45 = vpop.f32.mrf.mxu0  ;;  %v9194_v61 = vld [vmem:[#allocation24_spill] sm:$0xff] }
 0x1ea   : > { %v4734_v53 = vadd.f32 %v4733_v8, %v4732_v54  ;;  %v4833_v23 = vadd.f32 %v4832_v62, %v4831_v19  ;;  %v3376_v29 = vadd.f32 %v6021_v0, %v9193_v14  ;;  %v3375_v39 = vadd.f32 %v3264_v10, %v8202_v26 }
 0x1eb   : > { %v4834_v5 = vsel %vm4717_vm11, %v4795_v50, 0.0  ;;  %v4696_v27 = vsel %vm4664_vm7, %v3764_v48, 0.0  ;;  %v4695_v51 = vsel %vm4663_vm10, %v3763_v33, 0.0  ;;  %vm4670_vm8 = vcmp.eq.s32.totalorder %v8437_v6, 1  ;;  %v3664_v49 = vpop.f32.mrf.mxu0 }
 0x1ec   : > { %v4835_v40 = vadd.f32 %v4834_v5, %v4833_v23  ;;  %v4798_v47 = vmul.f32 %v4696_v27, %v4696_v27  ;;  %v4736_v21 = vadd.f32 %v4735_v4, %v4734_v53  ;;  %vm4669_vm13 = vcmp.eq.s32.totalorder %v8468_v41, 1  ;;  %v3274_v4 = vpop.f32.mrf.mxu1  ;;  %v9195_v5 = vld [vmem:[#allocation10_spill] sm:$0xff] }
 0x1ed   : > { %v8583_v62 = vsel %vm8566_vm14, 1, %v8962_v55  ;;  %v4737_v38 = vsel %vm4717_vm11, %v4695_v51, 0.0  ;;  %v4797_v63 = vmul.f32 %v4695_v51, %v4695_v51  ;;  %v3766_v11 = vadd.f32 %v6071_v44, %v3376_v29  ;;  %v6077_v53 = vpop.f32.mrf.mxu0 }
 0x1ee   : > { %v3765_v36 = vadd.f32 %v3654_v58, %v3375_v39  ;;  %v4739_v26 = vsel %vm4717_vm11, %v4696_v27, 0.0  ;;  %v4738_v37 = vadd.f32 %v4737_v38, %v4736_v21  ;;  %v4837_v17 = vadd.f32 %v4836_v24, %v4835_v40  ;;  %v6027_v24 = vpop.f32.mrf.mxu1 }
 0x1ef   : > { %v3378_v19 = vadd.f32 %v6024_v18, %v9194_v61  ;;  %v4838_v54 = vsel %vm4717_vm11, %v4797_v63, 0.0  ;;  %v4698_v0 = vsel %vm4666_vm9, %v3766_v11, 0.0  ;;  %v3377_v50 = vadd.f32 %v3274_v4, %v8231_v60  ;;  %v3674_v51 = vpop.f32.mrf.mxu0 }
 0x1f0   : > { %v4697_v8 = vsel %vm4665_vm1, %v3765_v36, 0.0  ;;  %v4840_v44 = vsel %vm4717_vm11, %v4798_v47, 0.0  ;;  %v4839_v48 = vadd.f32 %v4838_v54, %v4837_v17  ;;  %v4800_v33 = vmul.f32 %v4698_v0, %v4698_v0  ;;  %v3284_v27 = vpop.f32.mrf.mxu1 }
 0x1f1   : > { %v4740_v31 = vadd.f32 %v4739_v26, %v4738_v37  ;;  %vm4672_vm7 = vcmp.eq.s32.totalorder %v8501_v25, 1  ;;  %v4741_v23 = vsel %vm4717_vm11, %v4697_v8, 0.0  ;;  %v4799_v14 = vmul.f32 %v4697_v8, %v4697_v8  ;;  %v6080_v36 = vpop.f32.mrf.mxu0 }
 0x1f2   : > { %v3768_v29 = vadd.f32 %v6074_v45, %v3378_v19  ;;  %v3767_v34 = vadd.f32 %v3664_v49, %v3377_v50  ;;  %v4743_v10 = vsel %vm4717_vm11, %v4698_v0, 0.0  ;;  %v4841_v58 = vadd.f32 %v4840_v44, %v4839_v48  ;;  %v6030_v11 = vpop.f32.mrf.mxu1 }
 0x1f3   : > { %v4742_v13 = vadd.f32 %v4741_v23, %v4740_v31  ;;  %v3380_v60 = vadd.f32 %v6027_v24, %v9195_v5  ;;  %v4842_v39 = vsel %vm4717_vm11, %v4799_v14, 0.0  ;;  %v3379_v21 = vadd.f32 %v3284_v27, %v8256_v42  ;;  %v3684_v24 = vpop.f32.mrf.mxu0 }
 0x1f4   : > { %v4700_v40 = vsel %vm4668_vm3, %v3768_v29, 0.0  ;;  %v4699_v47 = vsel %vm4667_vm5, %v3767_v34, 0.0  ;;  %v4844_v18 = vsel %vm4717_vm11, %v4800_v33, 0.0  ;;  %v4843_v45 = vadd.f32 %v4842_v39, %v4841_v58  ;;  %v3294_v54 = vpop.f32.mrf.mxu1 }
 0x1f5   : > { %v4802_v38 = vmul.f32 %v4700_v40, %v4700_v40  ;;  %v4744_v63 = vadd.f32 %v4743_v10, %v4742_v13  ;;  %v4745_v26 = vsel %vm4717_vm11, %v4699_v47, 0.0  ;;  %v4801_v37 = vmul.f32 %v4699_v47, %v4699_v47 }
 0x1f6   : > { %v3770_v17 = vadd.f32 %v6077_v53, %v3380_v60  ;;  %v3769_v61 = vadd.f32 %v3674_v51, %v3379_v21  ;;  %v4747_v22 = vsel %vm4717_vm11, %v4700_v40, 0.0  ;;  %v4845_v4 = vadd.f32 %v4844_v18, %v4843_v45  ;;  %v6033_v5 = vpop.f32.mrf.mxu1 }
 0x1f7   : > { %v4746_v19 = vadd.f32 %v4745_v26, %v4744_v63  ;;  %v3382_v49 = vadd.f32 %v6030_v11, %v9196_v46  ;;  %v4846_v42 = vsel %vm4717_vm11, %v4801_v37, 0.0  ;;  %v3381_v50 = vadd.f32 %v3294_v54, %v8348_v16 }
 0x1f8   : > { %v4702_v0 = vsel %vm4670_vm8, %v3770_v17, 0.0  ;;  %v4701_v8 = vsel %vm4669_vm13, %v3769_v61, 0.0  ;;  %v4848_v44 = vsel %vm4717_vm11, %v4802_v38, 0.0  ;;  %v4847_v48 = vadd.f32 %v4846_v42, %v4845_v4  ;;  %v9197_v42 = vld [vmem:[#allocation11_spill] sm:$0xff] }
 0x1f9   : > { %v4804_v33 = vmul.f32 %v4702_v0, %v4702_v0  ;;  %v4748_v31 = vadd.f32 %v4747_v22, %v4746_v19  ;;  %vm3873_vm10 = vcmp.ge.s32.totalorder %v8296_v15, 0  ;;  %v4749_v53 = vsel %vm4717_vm11, %v4701_v8, 0.0  ;;  %v6083_v19 = vpop.f32.mrf.mxu0 }
 0x1fa   : > { %v4803_v23 = vmul.f32 %v4701_v8, %v4701_v8  ;;  %v3772_v14 = vadd.f32 %v6080_v36, %v3382_v49  ;;  %v3771_v29 = vadd.f32 %v3684_v24, %v3381_v50  ;;  %v4849_v34 = vadd.f32 %v4848_v44, %v4847_v48  ;;  %v3304_v36 = vpop.f32.mrf.mxu1 }
 0x1fb   : > { %v4750_v6 = vadd.f32 %v4749_v53, %v4748_v31  ;;  %vm4671_vm4 = vcmp.eq.s32.totalorder %v8583_v62, 1  ;;  %v5320_v41 = vcvt.s32.f32 %v8456_v1  ;;  %v4751_v16 = vsel %vm4717_vm11, %v4702_v0, 0.0 }
 0x1fc   : > { %v4850_v10 = vsel %vm4717_vm11, %v4803_v23, 0.0  ;;  %v4704_v13 = vsel %vm4672_vm7, %v3772_v14, 0.0  ;;  %v4703_v58 = vsel %vm4671_vm4, %v3771_v29, 0.0  ;;  %v4852_v60 = vsel %vm4717_vm11, %v4804_v33, 0.0  ;;  %v9198_v14 = vld [vmem:[#allocation13_spill] sm:$0xff] }
 0x1fd   : > { %v4851_v27 = vadd.f32 %v4850_v10, %v4849_v34  ;;  %v4752_v51 = vadd.f32 %v4751_v16, %v4750_v6  ;;  %vm3988_vm9 = vcmp.gt.s32.totalorder %v8456_v1, 0  ;;  %v4806_v39 = vmul.f32 %v4704_v13, %v4704_v13 }
 0x1fe   : > { %v4753_v62 = vsel %vm4717_vm11, %v4703_v58, 0.0  ;;  %v4805_v40 = vmul.f32 %v4703_v58, %v4703_v58  ;;  %v4193_v47 = vsub.f32 %v8384_v9, %v8475_v32  ;;  %v8631_v25 = vadd.s32 %v6852_v2, %v8462_v3 }
 0x1ff   : > { %v4754_v21 = vadd.f32 %v4753_v62, %v4752_v51  ;;  %v4853_v18 = vadd.f32 %v4852_v60, %v4851_v27  ;;  %v3809_v45 = vadd.s32 176, %v6841_v56  ;;  %v4755_v38 = vsel %vm4717_vm11, %v4704_v13, 0.0 }
 0x200   : > { %v4854_v63 = vsel %vm4717_vm11, %v4805_v40, 0.0  ;;  %v4225_v11 = vadd.f32 0.5, %v4193_v47  ;;  %v5321_v26 = vsel %vm3988_vm9, %v5320_v41, 0.0  ;;  %vm3905_vm1 = vcmp.lt.s32.totalorder %v8296_v15, 648  ;;  %v3694_v15 = vpop.f32.mrf.mxu0 }
 0x201   : > { %v4855_v37 = vadd.f32 %v4854_v63, %v4853_v18  ;;  %v4064_v17 = vadd.f32 0.5, %v5321_v26  ;;  %v8637_v9 = vadd.f32 %v4755_v38, %v4754_v21  ;;  %v2995_v32 = vadd.f32 %v8154_v35, %v8388_v43  ;;  %vm3937_vm6 = vmand %vm3873_vm10, %vm3905_vm1  ;;  %v6036_v43 = vpop.f32.mrf.mxu1 }
 0x202   : > { %v8643_v3 = vadd.f32 %v8208_v7, %v8418_v59  ;;  %v4856_v61 = vsel %vm4717_vm11, %v4806_v39, 0.0  ;;  %v4257_v22 = vmul.f32 0.055555556, %v4225_v11  ;;  %vm3994_vm2 = vcmp.gt.s32.totalorder %v8631_v25, 0  ;;  %v6086_v10 = vpop.f32.mrf.mxu0 }
 0x203   : > { %v4096_v4 = vmul.f32 0.0030864198, %v4064_v17  ;;  %v8646_v46 = vadd.f32 %v4856_v61, %v4855_v37  ;;  %v5326_v49 = vcvt.s32.f32 %v8631_v25  ;;  %v8652_v54 = vadd.f32 %v8260_v28, %v8422_v20  ;;  %v3314_v31 = vpop.f32.mrf.mxu1 }
 0x204   : > { %v8656_v35 = vadd.f32 %v8311_v12, %v8443_v30  ;;  %v4289_v7 = vfloor.f32 %v4257_v22  ;;  %v8661_v59 = vadd.s32 %v6852_v2, %v3809_v45  ;;  %v3384_v0 = vadd.f32 %v6033_v5, %v9197_v42  ;;  %v3704_v45 = vpop.f32.mrf.mxu0 }
 0x205   : > { %v4128_v8 = vfloor.f32 %v4096_v4  ;;  %v5327_v50 = vsel %vm3994_vm2, %v5326_v49, 0.0  ;;  %v3812_v44 = vadd.s32 200, %v6841_v56  ;;  %v3383_v12 = vadd.f32 %v3304_v36, %v8366_v57 }
 0x206   : > { %v4321_v28 = vmul.f32 18.0, %v4289_v7  ;;  %vm4385_vm12 = vcmp.ge.f32.partialorder %v4289_v7, 1.0  ;;  %vm4449_vm0 = vcmp.le.f32.partialorder %v4289_v7, 16.0  ;;  %v4067_v20 = vadd.f32 0.5, %v5327_v50 }
 0x207   : > { %vm4417_vm15 = vmand %vm3937_vm6, %vm4385_vm12  ;;  %vm3872_vm3 = vcmp.ge.s32.totalorder %v8456_v1, 0  ;;  %vm3904_vm5 = vcmp.lt.s32.totalorder %v8456_v1, 648  ;;  %v4160_v30 = vmul.f32 324.0, %v4128_v8  ;;  %vm3992_vm8 = vcmp.gt.s32.totalorder %v8661_v59, 0 }
 0x208   : > { %v4353_v48 = vsub.f32 %v4193_v47, %v4321_v28  ;;  %vm4481_vm14 = vmand %vm4417_vm15, %vm4449_vm0  ;;  %v4099_v33 = vmul.f32 0.0030864198, %v4067_v20  ;;  %v5324_v24 = vcvt.s32.f32 %v8661_v59  ;;  %v3774_v53 = vadd.f32 %v6083_v19, %v3384_v0 }
 0x209   : > { %v4192_v23 = vsub.f32 %v5321_v26, %v4160_v30  ;;  %v3386_v29 = vadd.f32 %v6036_v43, %v9198_v14  ;;  %v8672_v57 = vadd.s32 %v6852_v2, %v3812_v44  ;;  %v8674_v41 = vadd.f32 %v3694_v15, %v3383_v12  ;;  %vm3936_vm6 = vmand %vm3872_vm3, %vm3904_vm5 }
 0x20a   : > { %vm4513_vm13 = vcmp.ge.f32.partialorder %v4353_v48, 1.0  ;;  %vm4577_vm7 = vcmp.le.f32.partialorder %v4353_v48, 16.0  ;;  %v4131_v6 = vfloor.f32 %v4099_v33  ;;  %v5325_v34 = vsel %vm3992_vm8, %v5324_v24, 0.0 }
 0x20b   : > { %vm4545_vm10 = vmand %vm4481_vm14, %vm4513_vm13  ;;  %v4224_v16 = vadd.f32 0.5, %v4192_v23  ;;  %v3385_v13 = vadd.f32 %v3314_v31, %v2995_v32  ;;  %v4066_v58 = vadd.f32 0.5, %v5325_v34  ;;  %vm3998_vm9 = vcmp.gt.s32.totalorder %v8672_v57, 0 }
 0x20c   : > { %vm4609_vm4 = vmand %vm4545_vm10, %vm4577_vm7  ;;  %v4163_v5 = vmul.f32 324.0, %v4131_v6  ;;  %v5330_v60 = vcvt.s32.f32 %v8672_v57  ;;  %v3811_v27 = vadd.s32 192, %v6841_v56  ;;  %v8680_v62 = vadd.f32 %v6086_v10, %v3386_v29 }
 0x20d   : > { %v4642_v51 = vsel %vm4609_vm4, 1, %v8962_v55  ;;  %v4256_v39 = vmul.f32 0.055555556, %v4224_v16  ;;  %v4098_v40 = vmul.f32 0.0030864198, %v4066_v58  ;;  %vm3875_vm2 = vcmp.ge.s32.totalorder %v8631_v25, 0 }
 0x20e   : > { %vm4674_vm1 = vcmp.eq.s32.totalorder %v4642_v51, 1  ;;  %v4195_v47 = vsub.f32 %v5327_v50, %v4163_v5  ;;  %v5331_v21 = vsel %vm3998_vm9, %v5330_v60, 0.0  ;;  %v8688_v11 = vadd.s32 %v6852_v2, %v3811_v27  ;;  %v6039_v5 = vpop.f32.mrf.mxu1 }
 0x20f   : > { %v4288_v18 = vfloor.f32 %v4256_v39  ;;  %v4130_v38 = vfloor.f32 %v4098_v40  ;;  %v4069_v63 = vadd.f32 0.5, %v5331_v21  ;;  %v4706_v36 = vsel %vm4674_vm1, %v3774_v53, 0.0 }
 0x210   : > { %vm3907_vm12 = vcmp.lt.s32.totalorder %v8631_v25, 648  ;;  %v4227_v26 = vadd.f32 0.5, %v4195_v47  ;;  %v8691_v37 = vadd.f32 %v3704_v45, %v3385_v13  ;;  %vm3874_vm3 = vcmp.ge.s32.totalorder %v8661_v59, 0  ;;  %v3324_v45 = vpop.f32.mrf.mxu1 }
 0x211   : > { %v4320_v17 = vmul.f32 18.0, %v4288_v18  ;;  %vm4384_vm0 = vcmp.ge.f32.partialorder %v4288_v18, 1.0  ;;  %vm4448_vm15 = vcmp.le.f32.partialorder %v4288_v18, 16.0  ;;  %v4162_v32 = vmul.f32 324.0, %v4130_v38  ;;  %vm8702_vm9 = vmand %vm3875_vm2, %vm3907_vm12 }
 0x212   : > { %vm4416_vm14 = vmand %vm3936_vm6, %vm4384_vm0  ;;  %v4259_v1 = vmul.f32 0.055555556, %v4227_v26  ;;  %vm3906_vm5 = vcmp.lt.s32.totalorder %v8661_v59, 648  ;;  %v4101_v61 = vmul.f32 0.0030864198, %v4069_v63  ;;  %vm3996_vm13 = vcmp.gt.s32.totalorder %v8688_v11, 0 }
 0x213   : > { %v4352_v22 = vsub.f32 %v4192_v23, %v4320_v17  ;;  %vm4480_vm8 = vmand %vm4416_vm14, %vm4448_vm15  ;;  %v4194_v19 = vsub.f32 %v5325_v34, %v4162_v32  ;;  %v5328_v4 = vcvt.s32.f32 %v8688_v11  ;;  %v4808_v49 = vmul.f32 %v4706_v36, %v4706_v36 }
 0x214   : > { %v4291_v7 = vfloor.f32 %v4259_v1  ;;  %vm3877_vm7 = vcmp.ge.s32.totalorder %v8672_v57, 0  ;;  %v4133_v43 = vfloor.f32 %v4101_v61  ;;  %v4759_v28 = vsel %vm4717_vm11, %v4706_v36, 0.0 }
 0x215   : > { %vm4512_vm10 = vcmp.ge.f32.partialorder %v4352_v22, 1.0  ;;  %vm4576_vm4 = vcmp.le.f32.partialorder %v4352_v22, 16.0  ;;  %v4226_v0 = vadd.f32 0.5, %v4194_v19  ;;  %v5329_v8 = vsel %vm3996_vm13, %v5328_v4, 0.0 }
 0x216   : > { %vm4544_vm1 = vmand %vm4480_vm8, %vm4512_vm10  ;;  %v4323_v50 = vmul.f32 18.0, %v4291_v7  ;;  %vm4387_vm6 = vcmp.ge.f32.partialorder %v4291_v7, 1.0  ;;  %vm4451_vm0 = vcmp.le.f32.partialorder %v4291_v7, 16.0  ;;  %v4165_v44 = vmul.f32 324.0, %v4133_v43 }
 0x217   : > { %vm4608_vm15 = vmand %vm4544_vm1, %vm4576_vm4  ;;  %v4258_v20 = vmul.f32 0.055555556, %v4226_v0  ;;  %vm3909_vm14 = vcmp.lt.s32.totalorder %v8672_v57, 648  ;;  %v4068_v12 = vadd.f32 0.5, %v5329_v8  ;;  %v4860_v25 = vsel %vm4717_vm11, %v4808_v49, 0.0  ;;  %v6042_v49 = vpop.f32.mrf.mxu1  ;;  %v9205_v0 = vld [vmem:[#allocation15_spill] sm:$0xff] }
 0x218   : > { %v4641_v15 = vsel %vm4608_vm15, 1, %v8962_v55  ;;  %v4355_v30 = vsub.f32 %v4195_v47, %v4323_v50  ;;  %vm4419_vm2 = vmand %vm8702_vm9, %vm4387_vm6  ;;  %v4197_v48 = vsub.f32 %v5331_v21, %v4165_v44  ;;  %v3814_v24 = vadd.s32 216, %v6841_v56 }
 0x219   : > { %vm4673_vm12 = vcmp.eq.s32.totalorder %v4641_v15, 1  ;;  %vm4483_vm8 = vmand %vm4419_vm2, %vm4451_vm0  ;;  %v4290_v33 = vfloor.f32 %v4258_v20  ;;  %v4100_v31 = vmul.f32 0.0030864198, %v4068_v12  ;;  %v3813_v47 = vadd.s32 208, %v6841_v56 }
 0x21a   : > { %v4705_v53 = vsel %vm4673_vm12, %v8674_v41, 0.0  ;;  %vm4515_vm13 = vcmp.ge.f32.partialorder %v4355_v30, 1.0  ;;  %vm4579_vm10 = vcmp.le.f32.partialorder %v4355_v30, 16.0  ;;  %vm8718_vm4 = vmand %vm3874_vm3, %vm3906_vm5  ;;  %v4229_v14 = vadd.f32 0.5, %v4197_v48 }
 0x21b   : > { %v4757_v29 = vsel %vm4717_vm11, %v4705_v53, 0.0  ;;  %v4807_v6 = vmul.f32 %v4705_v53, %v4705_v53  ;;  %vm4547_vm9 = vmand %vm4483_vm8, %vm4515_vm13  ;;  %v4322_v34 = vmul.f32 18.0, %v4290_v33  ;;  %vm4386_vm1 = vcmp.ge.f32.partialorder %v4290_v33, 1.0 }
 0x21c   : > { %v4758_v16 = vadd.f32 %v4757_v29, %v8637_v9  ;;  %vm4611_vm6 = vmand %vm4547_vm9, %vm4579_vm10  ;;  %vm4450_vm0 = vcmp.le.f32.partialorder %v4290_v33, 16.0  ;;  %v4261_v41 = vmul.f32 0.055555556, %v4229_v14  ;;  %v4132_v10 = vfloor.f32 %v4100_v31 }
 0x21d   : > { %v4858_v13 = vsel %vm4717_vm11, %v4807_v6, 0.0  ;;  %v4644_v59 = vsel %vm4611_vm6, 1, %v8962_v55  ;;  %v4354_v58 = vsub.f32 %v4194_v19, %v4322_v34  ;;  %vm4418_vm3 = vmand %vm8718_vm4, %vm4386_vm1  ;;  %v8729_v60 = vadd.s32 %v6852_v2, %v3814_v24  ;;  %v6089_v19 = vpop.f32.mrf.mxu0  ;;  %v9208_v34 = vld [vmem:[#allocation27_spill] sm:$0xff] }
 0x21e   : > { %v4859_v27 = vadd.f32 %v4858_v13, %v8646_v46  ;;  %vm4676_vm5 = vcmp.eq.s32.totalorder %v4644_v59, 1  ;;  %vm4482_vm15 = vmand %vm4418_vm3, %vm4450_vm0  ;;  %v4760_v9 = vadd.f32 %v4759_v28, %v4758_v16  ;;  %v4293_v51 = vfloor.f32 %v4261_v41 }
 0x21f   : > { %vm4514_vm2 = vcmp.ge.f32.partialorder %v4354_v58, 1.0  ;;  %vm4578_vm12 = vcmp.le.f32.partialorder %v4354_v58, 16.0  ;;  %vm8736_vm8 = vmand %vm3877_vm7, %vm3909_vm14  ;;  %v4164_v40 = vmul.f32 324.0, %v4132_v10  ;;  %v4708_v21 = vsel %vm4676_vm5, %v8680_v62, 0.0 }
 0x220   : > { %vm4546_vm13 = vmand %vm4482_vm15, %vm4514_vm2  ;;  %v4861_v46 = vadd.f32 %v4860_v25, %v4859_v27  ;;  %v4325_v18 = vmul.f32 18.0, %v4293_v51  ;;  %vm3876_vm10 = vcmp.ge.s32.totalorder %v8688_v11, 0  ;;  %vm4389_vm9 = vcmp.ge.f32.partialorder %v4293_v51, 1.0 }
 0x221   : > { %vm4610_vm4 = vmand %vm4546_vm13, %vm4578_vm12  ;;  %vm4453_vm1 = vcmp.le.f32.partialorder %v4293_v51, 16.0  ;;  %v4196_v38 = vsub.f32 %v5329_v8, %v4164_v40  ;;  %vm4002_vm7 = vcmp.gt.s32.totalorder %v8729_v60, 0  ;;  %vm3908_vm6 = vcmp.lt.s32.totalorder %v8688_v11, 648  ;;  %v3334_v11 = vpop.f32.mrf.mxu1 }
 0x222   : > { %v4643_v57 = vsel %vm4610_vm4, 1, %v8962_v55  ;;  %v4357_v63 = vsub.f32 %v4197_v48, %v4325_v18  ;;  %vm4421_vm14 = vmand %vm8736_vm8, %vm4389_vm9  ;;  %v5334_v62 = vcvt.s32.f32 %v8729_v60  ;;  %v4810_v36 = vmul.f32 %v4708_v21, %v4708_v21  ;;  %v3714_v48 = vpop.f32.mrf.mxu0 }
 0x223   : > { %vm4675_vm0 = vcmp.eq.s32.totalorder %v4643_v57, 1  ;;  %vm4485_vm3 = vmand %vm4421_vm14, %vm4453_vm1  ;;  %v4228_v26 = vadd.f32 0.5, %v4196_v38  ;;  %v8750_v17 = vadd.s32 %v6852_v2, %v3813_v47  ;;  %v4763_v43 = vsel %vm4717_vm11, %v4708_v21, 0.0 }
 0x224   : > { %v4707_v32 = vsel %vm4675_vm0, %v8691_v37, 0.0  ;;  %vm4517_vm5 = vcmp.ge.f32.partialorder %v4357_v63, 1.0  ;;  %vm4581_vm15 = vcmp.le.f32.partialorder %v4357_v63, 16.0  ;;  %v5335_v1 = vsel %vm4002_vm7, %v5334_v62, 0.0  ;;  %vm8762_vm8 = vmand %vm3876_vm10, %vm3908_vm6 }
 0x225   : > { %v4761_v61 = vsel %vm4717_vm11, %v4707_v32, 0.0  ;;  %v4809_v22 = vmul.f32 %v4707_v32, %v4707_v32  ;;  %vm4549_vm2 = vmand %vm4485_vm3, %vm4517_vm5  ;;  %v4260_v4 = vmul.f32 0.055555556, %v4228_v26  ;;  %v4071_v7 = vadd.f32 0.5, %v5335_v1 }
 0x226   : > { %v4762_v42 = vadd.f32 %v4761_v61, %v4760_v9  ;;  %v3388_v8 = vadd.f32 %v6039_v5, %v9205_v0  ;;  %vm4613_vm12 = vmand %vm4549_vm2, %vm4581_vm15  ;;  %v3387_v50 = vadd.f32 %v3324_v45, %v8643_v3  ;;  %vm4000_vm13 = vcmp.gt.s32.totalorder %v8750_v17, 0 }
 0x227   : > { %v4862_v37 = vsel %vm4717_vm11, %v4809_v22, 0.0  ;;  %v4292_v28 = vfloor.f32 %v4260_v4  ;;  %v4103_v20 = vmul.f32 0.0030864198, %v4071_v7  ;;  %v4646_v25 = vsel %vm4613_vm12, 1, %v8962_v55 }
 0x228   : > { %v4863_v12 = vadd.f32 %v4862_v37, %v4861_v46  ;;  %v4764_v15 = vadd.f32 %v4763_v43, %v4762_v42  ;;  %v5332_v3 = vcvt.s32.f32 %v8750_v17  ;;  %v4864_v30 = vsel %vm4717_vm11, %v4810_v36, 0.0 }
 0x229   : > { %v4324_v33 = vmul.f32 18.0, %v4292_v28  ;;  %vm4388_vm4 = vcmp.ge.f32.partialorder %v4292_v28, 1.0  ;;  %vm4452_vm9 = vcmp.le.f32.partialorder %v4292_v28, 16.0  ;;  %v3778_v31 = vadd.f32 %v6089_v19, %v3388_v8 }
 0x22a   : > { %v3777_v24 = vadd.f32 %v3714_v48, %v3387_v50  ;;  %vm4420_vm10 = vmand %vm8762_vm8, %vm4388_vm4  ;;  %v4865_v53 = vadd.f32 %v4864_v30, %v4863_v12  ;;  %v4135_v23 = vfloor.f32 %v4103_v20  ;;  %vm4678_vm1 = vcmp.eq.s32.totalorder %v4646_v25, 1  ;;  %v6045_v20 = vpop.f32.mrf.mxu1 }
 0x22b   : > { %v4356_v14 = vsub.f32 %v4196_v38, %v4324_v33  ;;  %vm4484_vm7 = vmand %vm4420_vm10, %vm4452_vm9  ;;  %v5333_v29 = vsel %vm4000_vm13, %v5332_v3, 0.0  ;;  %v3816_v6 = vadd.s32 232, %v6841_v56  ;;  %v3390_v16 = vadd.f32 %v6042_v49, %v9208_v34  ;;  %v6092_v49 = vpop.f32.mrf.mxu0 }
 0x22c   : > { %v4167_v41 = vmul.f32 324.0, %v4135_v23  ;;  %v8777_v10 = vadd.f32 %v3334_v11, %v8652_v54  ;;  %v4070_v13 = vadd.f32 0.5, %v5333_v29  ;;  %vm3879_vm0 = vcmp.ge.s32.totalorder %v8729_v60, 0  ;;  %v3344_v23 = vpop.f32.mrf.mxu1 }
 0x22d   : > { %vm4516_vm14 = vcmp.ge.f32.partialorder %v4356_v14, 1.0  ;;  %vm4580_vm6 = vcmp.le.f32.partialorder %v4356_v14, 16.0  ;;  %v8781_v59 = vadd.s32 %v6852_v2, %v3816_v6  ;;  %v4710_v58 = vsel %vm4678_vm1, %v3778_v31, 0.0  ;;  %v3724_v3 = vpop.f32.mrf.mxu0 }
 0x22e   : > { %vm4548_vm3 = vmand %vm4484_vm7, %vm4516_vm14  ;;  %v4199_v5 = vsub.f32 %v5335_v1, %v4167_v41  ;;  %v4102_v27 = vmul.f32 0.0030864198, %v4070_v13  ;;  %v3815_v9 = vadd.s32 224, %v6841_v56  ;;  %vm3911_vm15 = vcmp.lt.s32.totalorder %v8729_v60, 648 }
 0x22f   : > { %vm4612_vm5 = vmand %vm4548_vm3, %vm4580_vm6  ;;  %vm3878_vm2 = vcmp.ge.s32.totalorder %v8750_v17, 0  ;;  %vm4006_vm12 = vcmp.gt.s32.totalorder %v8781_v59, 0  ;;  %v5338_v54 = vcvt.s32.f32 %v8781_v59  ;;  %vm3910_vm8 = vcmp.lt.s32.totalorder %v8750_v17, 648 }
 0x230   : > { %v4645_v51 = vsel %vm4612_vm5, 1, %v8962_v55  ;;  %v4231_v39 = vadd.f32 0.5, %v4199_v5  ;;  %v4134_v40 = vfloor.f32 %v4102_v27  ;;  %v4812_v47 = vmul.f32 %v4710_v58, %v4710_v58  ;;  %vm3943_vm4 = vmand %vm3879_vm0, %vm3911_vm15 }
 0x231   : > { %vm4677_vm13 = vcmp.eq.s32.totalorder %v4645_v51, 1  ;;  %v5339_v21 = vsel %vm4006_vm12, %v5338_v54, 0.0  ;;  %v8791_v46 = vadd.s32 %v6852_v2, %v3815_v9  ;;  %v4767_v63 = vsel %vm4717_vm11, %v4710_v58, 0.0  ;;  %vm8821_vm3 = vmand %vm3878_vm2, %vm3910_vm8 }
 0x232   : > { %v4709_v18 = vsel %vm4677_vm13, %v3777_v24, 0.0  ;;  %v4263_v45 = vmul.f32 0.055555556, %v4231_v39  ;;  %v4166_v38 = vmul.f32 324.0, %v4134_v40  ;;  %v4073_v57 = vadd.f32 0.5, %v5339_v21 }
 0x233   : > { %v4765_v62 = vsel %vm4717_vm11, %v4709_v18, 0.0  ;;  %v4811_v36 = vmul.f32 %v4709_v18, %v4709_v18  ;;  %v3818_v26 = vadd.s32 248, %v6841_v56  ;;  %v4868_v19 = vsel %vm4717_vm11, %v4812_v47, 0.0 }
 0x234   : > { %v4766_v32 = vadd.f32 %v4765_v62, %v4764_v15  ;;  %v4295_v1 = vfloor.f32 %v4263_v45  ;;  %v4198_v61 = vsub.f32 %v5333_v29, %v4166_v38  ;;  %v4105_v22 = vmul.f32 0.0030864198, %v4073_v57 }
 0x235   : > { %v4866_v4 = vsel %vm4717_vm11, %v4811_v36, 0.0  ;;  %vm4004_vm9 = vcmp.gt.s32.totalorder %v8791_v46, 0  ;;  %v5336_v7 = vcvt.s32.f32 %v8791_v46  ;;  %v8813_v25 = vadd.s32 %v6852_v2, %v3818_v26 }
 0x236   : > { %v4867_v43 = vadd.f32 %v4866_v4, %v4865_v53  ;;  %v4327_v42 = vmul.f32 18.0, %v4295_v1  ;;  %vm4391_vm10 = vcmp.ge.f32.partialorder %v4295_v1, 1.0  ;;  %vm4455_vm1 = vcmp.le.f32.partialorder %v4295_v1, 16.0 }
 0x237   : > { %vm4423_vm7 = vmand %vm3943_vm4, %vm4391_vm10  ;;  %v4230_v0 = vadd.f32 0.5, %v4198_v61  ;;  %v8804_v60 = vadd.f32 %v4767_v63, %v4766_v32  ;;  %v4137_v8 = vfloor.f32 %v4105_v22  ;;  %v5337_v50 = vsel %vm4004_vm9, %v5336_v7, 0.0 }
 0x238   : > { %v4359_v37 = vsub.f32 %v4199_v5, %v4327_v42  ;;  %vm8806_vm14 = vmand %vm4423_vm7, %vm4455_vm1  ;;  %v8810_v28 = vadd.f32 %v4868_v19, %v4867_v43  ;;  %v4072_v12 = vadd.f32 0.5, %v5337_v50  ;;  %v3780_v15 = vadd.f32 %v6092_v49, %v3390_v16  ;;  %v6095_v43 = vpop.f32.mrf.mxu0 }
 0x239   : > { %v4262_v30 = vmul.f32 0.055555556, %v4230_v0  ;;  %v4169_v48 = vmul.f32 324.0, %v4137_v8  ;;  %v3817_v33 = vadd.s32 240, %v6841_v56  ;;  %v3779_v11 = vadd.f32 %v3724_v3, %v8777_v10 }
 0x23a   : > { %vm4519_vm6 = vcmp.ge.f32.partialorder %v4359_v37, 1.0  ;;  %vm4583_vm0 = vcmp.le.f32.partialorder %v4359_v37, 16.0  ;;  %v4104_v24 = vmul.f32 0.0030864198, %v4072_v12  ;;  %vm3881_vm15 = vcmp.ge.s32.totalorder %v8781_v59, 0 }
 0x23b   : > { %vm4551_vm5 = vmand %vm8806_vm14, %vm4519_vm6  ;;  %v4294_v53 = vfloor.f32 %v4262_v30  ;;  %v4201_v56 = vsub.f32 %v5339_v21, %v4169_v48  ;;  %vm4010_vm12 = vcmp.gt.s32.totalorder %v8813_v25, 0  ;;  %vm3913_vm4 = vcmp.lt.s32.totalorder %v8781_v59, 648  ;;  %v3734_v30 = vpop.f32.mrf.mxu0 }
 0x23c   : > { %vm4615_vm13 = vmand %vm4551_vm5, %vm4583_vm0  ;;  %v4136_v14 = vfloor.f32 %v4104_v24  ;;  %v5342_v17 = vcvt.s32.f32 %v8813_v25  ;;  %v8832_v29 = vadd.s32 %v6852_v2, %v3817_v33  ;;  %v3392_v58 = vadd.f32 %v6045_v20, %v8325_v52 }
 0x23d   : > { %v4648_v6 = vsel %vm4615_vm13, 1, %v8962_v55  ;;  %v4326_v34 = vmul.f32 18.0, %v4294_v53  ;;  %vm4390_vm2 = vcmp.ge.f32.partialorder %v4294_v53, 1.0  ;;  %vm4454_vm8 = vcmp.le.f32.partialorder %v4294_v53, 16.0  ;;  %vm8846_vm0 = vmand %vm3881_vm15, %vm3913_vm4  ;;  %v6048_v53 = vpop.f32.mrf.mxu1 }
 0x23e   : > { %vm4680_vm9 = vcmp.eq.s32.totalorder %v4648_v6, 1  ;;  %vm4422_vm10 = vmand %vm8821_vm3, %vm4390_vm2  ;;  %v4233_v16 = vadd.f32 0.5, %v4201_v56  ;;  %v4168_v41 = vmul.f32 324.0, %v4136_v14  ;;  %v5343_v10 = vsel %vm4010_vm12, %v5342_v17, 0.0 }
 0x23f   : > { %v4358_v13 = vsub.f32 %v4198_v61, %v4326_v34  ;;  %vm4486_vm1 = vmand %vm4422_vm10, %vm4454_vm8  ;;  %v8839_v5 = vadd.f32 %v3344_v23, %v8656_v35  ;;  %v4075_v2 = vadd.f32 0.5, %v5343_v10  ;;  %v4712_v27 = vsel %vm4680_vm9, %v3780_v15, 0.0  ;;  %v9218_v23 = vld [vmem:[#allocation14_spill] sm:$0xff] }
 0x240   : > { %v4265_v9 = vmul.f32 0.055555556, %v4233_v16  ;;  %vm3880_vm7 = vcmp.ge.s32.totalorder %v8791_v46, 0  ;;  %v4200_v54 = vsub.f32 %v5337_v50, %v4168_v41  ;;  %vm3912_vm3 = vcmp.lt.s32.totalorder %v8791_v46, 648 }
 0x241   : > { %vm4518_vm14 = vcmp.ge.f32.partialorder %v4358_v13, 1.0  ;;  %vm4582_vm6 = vcmp.le.f32.partialorder %v4358_v13, 16.0  ;;  %v4107_v52 = vmul.f32 0.0030864198, %v4075_v2  ;;  %vm3883_vm12 = vcmp.ge.s32.totalorder %v8813_v25, 0 }
 0x242   : > { %vm4550_vm5 = vmand %vm4486_vm1, %vm4518_vm14  ;;  %v4297_v35 = vfloor.f32 %v4265_v9  ;;  %v4232_v39 = vadd.f32 0.5, %v4200_v54  ;;  %vm4008_vm13 = vcmp.gt.s32.totalorder %v8832_v29, 0  ;;  %v4771_v40 = vsel %vm4717_vm11, %v4712_v27, 0.0 }
 0x243   : > { %vm4614_vm2 = vmand %vm4550_vm5, %vm4582_vm6  ;;  %vm3915_vm8 = vcmp.lt.s32.totalorder %v8813_v25, 648  ;;  %v4139_v59 = vfloor.f32 %v4107_v52  ;;  %v5340_v47 = vcvt.s32.f32 %v8832_v29  ;;  %v4814_v63 = vmul.f32 %v4712_v27, %v4712_v27  ;;  %v3354_v27 = vpop.f32.mrf.mxu1 }
 0x244   : > { %v4647_v21 = vsel %vm4614_vm2, 1, %v8962_v55  ;;  %v4329_v18 = vmul.f32 18.0, %v4297_v35  ;;  %vm4393_vm15 = vcmp.ge.f32.partialorder %v4297_v35, 1.0  ;;  %vm4457_vm4 = vcmp.le.f32.partialorder %v4297_v35, 16.0  ;;  %v9222_v35 = vld [vmem:[#allocation16_spill] sm:$0xff] }
 0x245   : > { %vm4679_vm9 = vcmp.eq.s32.totalorder %v4647_v21, 1  ;;  %vm4425_vm10 = vmand %vm8846_vm0, %vm4393_vm15  ;;  %v4264_v45 = vmul.f32 0.055555556, %v4232_v39  ;;  %v4171_v38 = vmul.f32 324.0, %v4139_v59  ;;  %v5341_v57 = vsel %vm4008_vm13, %v5340_v47, 0.0  ;;  %v6098_v59 = vpop.f32.mrf.mxu0 }
 0x246   : > { %v4711_v62 = vsel %vm4679_vm9, %v3779_v11, 0.0  ;;  %v4361_v36 = vsub.f32 %v4201_v56, %v4329_v18  ;;  %vm4489_vm1 = vmand %vm4425_vm10, %vm4457_vm4  ;;  %v4074_v26 = vadd.f32 0.5, %v5341_v57  ;;  %v4872_v46 = vsel %vm4717_vm11, %v4814_v63, 0.0  ;;  %v9217_v56 = vld [vmem:[#allocation19_spill] sm:$0xff] }
 0x247   : > { %v4769_v32 = vsel %vm4717_vm11, %v4711_v62, 0.0  ;;  %v4813_v1 = vmul.f32 %v4711_v62, %v4711_v62  ;;  %v4296_v61 = vfloor.f32 %v4264_v45  ;;  %v4203_v22 = vsub.f32 %v5343_v10, %v4171_v38  ;;  %vm8865_vm0 = vmand %vm3880_vm7, %vm3912_vm3  ;;  %v3744_v63 = vpop.f32.mrf.mxu0 }
 0x248   : > { %v4770_v19 = vadd.f32 %v4769_v32, %v8804_v60  ;;  %vm4521_vm14 = vcmp.ge.f32.partialorder %v4361_v36, 1.0  ;;  %vm4585_vm6 = vcmp.le.f32.partialorder %v4361_v36, 16.0  ;;  %v4106_v49 = vmul.f32 0.0030864198, %v4074_v26 }
 0x249   : > { %v4870_v7 = vsel %vm4717_vm11, %v4813_v1, 0.0  ;;  %vm4553_vm5 = vmand %vm4489_vm1, %vm4521_vm14  ;;  %v4328_v42 = vmul.f32 18.0, %v4296_v61  ;;  %vm4392_vm13 = vcmp.ge.f32.partialorder %v4296_v61, 1.0  ;;  %vm4456_vm2 = vcmp.le.f32.partialorder %v4296_v61, 16.0 }
 0x24a   : > { %v4871_v0 = vadd.f32 %v4870_v7, %v8810_v28  ;;  %vm4617_vm15 = vmand %vm4553_vm5, %vm4585_vm6  ;;  %v4772_v60 = vadd.f32 %v4771_v40, %v4770_v19  ;;  %v4235_v8 = vadd.f32 0.5, %v4203_v22  ;;  %v4138_v50 = vfloor.f32 %v4106_v49 }
 0x24b   : > { %v4650_v37 = vsel %vm4617_vm15, 1, %v8962_v55  ;;  %v4360_v44 = vsub.f32 %v4200_v54, %v4328_v42  ;;  %vm4424_vm7 = vmand %vm8865_vm0, %vm4392_vm13  ;;  %v3782_v20 = vadd.f32 %v6095_v43, %v3392_v58  ;;  %v3781_v28 = vadd.f32 %v3734_v30, %v8839_v5  ;;  %v9221_v54 = vld [vmem:[#allocation28_spill] sm:$0xff] }
 0x24c   : > { %vm4488_vm3 = vmand %vm4424_vm7, %vm4456_vm2  ;;  %v4873_v12 = vadd.f32 %v4872_v46, %v4871_v0  ;;  %v4267_v15 = vmul.f32 0.055555556, %v4235_v8  ;;  %v4170_v3 = vmul.f32 324.0, %v4138_v50  ;;  %vm4682_vm4 = vcmp.eq.s32.totalorder %v4650_v37, 1 }
 0x24d   : > { %vm4520_vm9 = vcmp.ge.f32.partialorder %v4360_v44, 1.0  ;;  %vm4584_vm10 = vcmp.le.f32.partialorder %v4360_v44, 16.0  ;;  %vm3947_vm1 = vmand %vm3883_vm12, %vm3915_vm8  ;;  %vm3882_vm0 = vcmp.ge.s32.totalorder %v8832_v29, 0  ;;  %v4714_v11 = vsel %vm4682_vm4, %v3782_v20, 0.0 }
 0x24e   : > { %vm4552_vm14 = vmand %vm4488_vm3, %vm4520_vm9  ;;  %v4299_v48 = vfloor.f32 %v4267_v15  ;;  %v4202_v33 = vsub.f32 %v5341_v57, %v4170_v3  ;;  %vm3914_vm7 = vcmp.lt.s32.totalorder %v8832_v29, 648  ;;  %v2613_v14 = vadd.f32 %v9218_v23, %v9217_v56  ;;  %v4620_v3 = vld [vmem:[#allocation3] sm:$0x3] }
 0x24f   : > { %vm4616_vm6 = vmand %vm4552_vm14, %vm4584_vm10  ;;  %v4816_v34 = vmul.f32 %v4714_v11, %v4714_v11  ;;  %v4775_v5 = vsel %vm4717_vm11, %v4714_v11, 0.0  ;;  %v3394_v39 = vadd.f32 %v6048_v53, %v9222_v35 }
 0x250   : > { %v4649_v31 = vsel %vm4616_vm6, 1, %v8962_v55  ;;  %v4331_v24 = vmul.f32 18.0, %v4299_v48  ;;  %vm4395_vm5 = vcmp.ge.f32.partialorder %v4299_v48, 1.0  ;;  %vm4459_vm15 = vcmp.le.f32.partialorder %v4299_v48, 16.0  ;;  %vm8888_vm4 = vmand %vm3882_vm0, %vm3914_vm7 }
 0x251   : > { %vm4681_vm13 = vcmp.eq.s32.totalorder %v4649_v31, 1  ;;  %vm4427_vm2 = vmand %vm3947_vm1, %vm4395_vm5  ;;  %v4234_v25 = vadd.f32 0.5, %v4202_v33  ;;  %v3003_v51 = vadd.f32 %v9221_v54, %v2613_v14  ;;  %v4876_v29 = vsel %vm4717_vm11, %v4816_v34, 0.0 }
 0x252   : > { %v4713_v17 = vsel %vm4681_vm13, %v3781_v28, 0.0  ;;  %v4363_v6 = vsub.f32 %v4203_v22, %v4331_v24  ;;  %vm4491_vm12 = vmand %vm4427_vm2, %vm4459_vm15  ;;  %v3784_v57 = vadd.f32 %v6098_v59, %v3394_v39 }
 0x253   : > { %v4773_v16 = vsel %vm4717_vm11, %v4713_v17, 0.0  ;;  %v4815_v41 = vmul.f32 %v4713_v17, %v4713_v17  ;;  %v4266_v10 = vmul.f32 0.055555556, %v4234_v25  ;;  %v3393_v18 = vadd.f32 %v3354_v27, %v3003_v51 }
 0x254   : > { %v4774_v13 = vadd.f32 %v4773_v16, %v4772_v60  ;;  %vm4523_vm8 = vcmp.ge.f32.partialorder %v4363_v6, 1.0  ;;  %vm4587_vm3 = vcmp.le.f32.partialorder %v4363_v6, 16.0 }
 0x255   : > { %v4874_v2 = vsel %vm4717_vm11, %v4815_v41, 0.0  ;;  %vm4555_vm9 = vmand %vm4491_vm12, %vm4523_vm8  ;;  %v4298_v9 = vfloor.f32 %v4266_v10  ;;  %v3783_v62 = vadd.f32 %v3744_v63, %v3393_v18  ;;  %vm4888_vm8 = vcmask 1040384  }
 0x256   : > { %v4875_v52 = vadd.f32 %v4874_v2, %v4873_v12  ;;  %vm4619_vm10 = vmand %vm4555_vm9, %vm4587_vm3  ;;  %v4776_v40 = vadd.f32 %v4775_v5, %v4774_v13 }
 0x257   : > { %v4330_v47 = vmul.f32 18.0, %v4298_v9  ;;  %vm4394_vm1 = vcmp.ge.f32.partialorder %v4298_v9, 1.0  ;;  %vm4458_vm14 = vcmp.le.f32.partialorder %v4298_v9, 16.0  ;;  %v4652_v21 = vsel %vm4619_vm10, 1, %v8962_v55 }
 0x258   : > { %vm4426_vm6 = vmand %vm8888_vm4, %vm4394_vm1  ;;  %v4877_v45 = vadd.f32 %v4876_v29, %v4875_v52  ;;  %vm4684_vm5 = vcmp.eq.s32.totalorder %v4652_v21, 1 }
 0x259   : > { %v4362_v38 = vsub.f32 %v4202_v33, %v4330_v47  ;;  %vm4490_vm0 = vmand %vm4426_vm6, %vm4458_vm14  ;;  %v4716_v36 = vsel %vm4684_vm5, %v3784_v57, 0.0 }
 0x25a   : > { %v4818_v1 = vmul.f32 %v4716_v36, %v4716_v36  ;;  %v4779_v4 = vsel %vm4717_vm11, %v4716_v36, 0.0 }
 0x25b   : > { %vm4522_vm13 = vcmp.ge.f32.partialorder %v4362_v38, 1.0  ;;  %vm4586_vm2 = vcmp.le.f32.partialorder %v4362_v38, 16.0 }
 0x25c   : > { %vm4554_vm15 = vmand %vm4490_vm0, %vm4522_vm13  ;;  %v4880_v42 = vsel %vm4717_vm11, %v4818_v1, 0.0 }
 0x25d   : > { %vm4618_vm7 = vmand %vm4554_vm15, %vm4586_vm2 }
 0x25e   : > { %v4651_v26 = vsel %vm4618_vm7, 1, %v8962_v55 }
 0x25f   : > { %vm4683_vm12 = vcmp.eq.s32.totalorder %v4651_v26, 1 }
 0x260   : > { %v4715_v32 = vsel %vm4683_vm12, %v3783_v62, 0.0 }
 0x261   : > { %v4777_v61 = vsel %vm4717_vm11, %v4715_v32, 0.0  ;;  %v4817_v22 = vmul.f32 %v4715_v32, %v4715_v32 }
 0x262   : > { %v4778_v19 = vadd.f32 %v4777_v61, %v4776_v40 }
 0x263   : > { %v4878_v49 = vsel %vm4717_vm11, %v4817_v22, 0.0  ;;  %vm4891_vm11 = vcmask 254976  }
 0x264   : > { %v4780_v7 = vadd.f32 %v4779_v4, %v4778_v19  ;;  %v4879_v43 = vadd.f32 %v4878_v49, %v4877_v45 }
 0x266   : > { %v4781_v0 = vrot.slane %v4780_v7, 4  ;;  %v4881_v60 = vadd.f32 %v4880_v42, %v4879_v43 }
 0x268   : > { %v4782_v8 = vadd.f32 %v4781_v0, %v4780_v7  ;;  %v4882_v50 = vrot.slane %v4881_v60, 4 }
 0x26a   : > { %v4783_v55 = vrot.slane %v4782_v8, 2  ;;  %v4883_v46 = vadd.f32 %v4882_v50, %v4881_v60 }
 0x26c   : > { %v4784_v37 = vadd.f32 %v4783_v55, %v4782_v8  ;;  %v4884_v44 = vrot.slane %v4883_v46, 2 }
 0x26e   : > { %v4785_v20 = vrot.slane %v4784_v37, 1  ;;  %v4885_v12 = vadd.f32 %v4884_v44, %v4883_v46 }
 0x270   : > { %v4886_v15 = vrot.slane %v4885_v12, 1  ;;  %v4786_v30 = vadd.f32 %v4785_v20, %v4784_v37 }
 0x272   : > { %v4887_v28 = vadd.f32 %v4886_v15, %v4885_v12 }
 0x274   : > { %v4889_v48 = vsel %vm4888_vm8, %v4786_v30, %v4887_v28 }
 0x275   : > { %v4890_v33 = vadd.f32 %v4889_v48, %v4620_v3 }
 0x277   : > { %4892 = vst.msk [vmem:[#allocation3] sm:$0x3] %vm4891_vm11, %v4890_v33 }
 0x278   : > { %6131 = shalt.err (!%p6128_p0)
}
 0x279   : > { %6102 = dma.vmem_to_hbm [thread:$0]  (%p6105_p7), %s4901_s28, 32, %s8924_s4, [#allocation4]  }
 0x27a   : > { %6147 = dma.done.wait (%p6105_p7), [#allocation4], 32  }
 0x27b   : > { %6149 = vsyncadd (%p6105_p7), [#allocation4], 4294967264 }
 0x27c PF: > { %s15_s15 = sadd.s32 1, %s6152_s15  }
 0x27d   : > { %p12_p1 = scmp.ge.s32.totalorder %s15_s15, 5  }
 0x27f   :  { %14 = sbr.rel (!%p12_p1) target bundleno = 1 (0x1), region = 81 }
 0x284   :  { %4913 = vsyncpa [#allocation4], 1 }
 0x285   :  { %4915 = vsyncpa [#allocation4 + $0x1], 1 }

</bundles_post_ra>
